<compile_context>
chip_gen: v7x
topology: tpu7x:2x2x1
jax: 0.10.0
libtpu: 0.0.40
codegen_flags: <defaults>
</compile_context>

<pallas_src>
import math

import numpy as np
import jax
import jax.numpy as jnp
from jax.experimental import pallas as pl
from jax.experimental.pallas import tpu as pltpu

# ---- model hyper-parameters (match the PyTorch module defaults) -------------
EMBED_DIM = 32                    # config['embedding_dim'] (divisible by 8)
NHEAD = 8
HEAD_DIM = EMBED_DIM // NHEAD
FF_DIM = 2048                     # nn.TransformerEncoderLayer default dim_feedforward
NUM_LAYERS = 2
NUM_CLASSES = 4                   # config['num_classes']
VOCAB_SIZE = 50
LN_EPS = 1e-5


def _layer_norm(x, gamma, beta):
    mean = jnp.mean(x, axis=-1, keepdims=True)
    var = jnp.mean((x - mean) ** 2, axis=-1, keepdims=True)
    return (x - mean) * jax.lax.rsqrt(var + LN_EPS) * gamma + beta


# ---- Pallas kernel: 2 post-norm encoder layers + final linear head ----------
def transformer_kernel(x_ref, hm_ref,
                       wqkv_ref, bqkv_ref, wo_ref, bo_ref,
                       ln1g_ref, ln1b_ref,
                       w1_ref, b1_ref, w2_ref, b2_ref,
                       ln2g_ref, ln2b_ref,
                       wf_ref, bf_ref,
                       out_ref):
    N, D = x_ref.shape              # N = Bt * S rows of this block
    Bt = out_ref.shape[0]
    S = N // Bt
    f32, bf16 = jnp.float32, jnp.bfloat16
    scale = 1.0 / math.sqrt(HEAD_DIM)

    hm = hm_ref[...]                # (D, D) bf16 block-diagonal head mixer
    x = x_ref[...].astype(f32)      # (N, D) residual stream, kept in f32

    def qkv_proj(xin, l):
        qkv = jnp.dot(xin.astype(bf16), wqkv_ref[l],
                      preferred_element_type=f32) + bqkv_ref[l]          # (N, 3D)
        q3 = (qkv[:, :D] * scale).reshape(Bt, S, D)
        k3 = qkv[:, D:2 * D].reshape(Bt, S, D)
        v3 = qkv[:, 2 * D:].reshape(Bt, S, D)
        return q3, k3, v3

    def ffn(xin, l):
        h1 = jnp.dot(xin.astype(bf16), w1_ref[l],
                     preferred_element_type=f32) + b1_ref[l]
        h1 = jnp.maximum(h1, 0.0)
        return jnp.dot(h1.astype(bf16), w2_ref[l],
                       preferred_element_type=f32) + b2_ref[l]

    # ---------------- layers 0 .. L-2: full sequence ----------------
    for l in range(NUM_LAYERS - 1):
        q3, k3, v3 = qkv_proj(x, l)
        # pair grid (Bt, Sq, Sk, D) via sublane / plane broadcasts (no gathers)
        prod = q3[:, :, None, :] * k3[:, None, :, :]
        # per-head score, replicated across each head's HEAD_DIM lanes
        s = jnp.dot(prod.reshape(N * S, D).astype(bf16), hm,
                    preferred_element_type=f32).reshape(Bt, S, S, D)
        m = jnp.max(s, axis=2, keepdims=True)            # per-head max over keys
        p = jnp.exp(s - m)                                # (Bt, Sq, Sk, D), f32
        denom = jnp.sum(p, axis=2)                        # (Bt, Sq, D), f32
        ctx = jnp.sum(p * v3[:, None, :, :], axis=2)      # (Bt, Sq, D)
        ctx = ctx * pl.reciprocal(denom, approx=True)
        attn = jnp.dot(ctx.reshape(N, D).astype(bf16), wo_ref[l],
                       preferred_element_type=f32) + bo_ref[l]            # (N, D)
        # TODO(synk): dropout omitted — forward matches model.eval() semantics.
        x = _layer_norm(x + attn, ln1g_ref[l], ln1b_ref[l])
        x = _layer_norm(x + ffn(x, l), ln2g_ref[l], ln2b_ref[l])

    # ------ last layer: only sequence position 0 feeds the classifier ------
    l = NUM_LAYERS - 1
    q3, k3, v3 = qkv_proj(x, l)                           # keys/values need all rows
    q0 = q3[:, 0, :]                                      # (Bt, D) position-0 queries
    prod = q0[:, None, :] * k3                            # (Bt, Sk, D)
    s = jnp.dot(prod.reshape(N, D).astype(bf16), hm,
                preferred_element_type=f32).reshape(Bt, S, D)
    m = jnp.max(s, axis=1, keepdims=True)
    p = jnp.exp(s - m)
    denom = jnp.sum(p, axis=1)                            # (Bt, D)
    ctx = jnp.sum(p * v3, axis=1) * pl.reciprocal(denom, approx=True)
    attn0 = jnp.dot(ctx.astype(bf16), wo_ref[l],
                    preferred_element_type=f32) + bo_ref[l]               # (Bt, D)
    x0 = x.reshape(Bt, S, D)[:, 0, :]                     # residual, position 0
    x0 = _layer_norm(x0 + attn0, ln1g_ref[l], ln1b_ref[l])
    x0 = _layer_norm(x0 + ffn(x0, l), ln2g_ref[l], ln2b_ref[l])

    logits = jnp.dot(x0.astype(bf16), wf_ref[...],
                     preferred_element_type=f32) + bf_ref[...]            # (Bt, C)
    out_ref[...] = logits


# ---- wrapper -----------------------------------------------------------------
def transformer_forward(tokens, params, block_batch=128):
    # Embedding lookup (gather) is glue; the transformer hot path runs in Pallas.
    emb = params["emb"][tokens.astype(jnp.int32)].astype(jnp.float32)  # (B, S, D)
    B, S = tokens.shape
    D = emb.shape[-1]
    C = params["wf"].shape[-1]

    Bt = B if B < block_batch else block_batch
    nb = (B + Bt - 1) // Bt
    B_pad = nb * Bt
    if B_pad != B:
        emb = jnp.pad(emb, ((0, B_pad - B), (0, 0), (0, 0)))
    N = Bt * S
    x2d = emb.reshape(B_pad * S, D)            # lane-friendly 2-D activation slab

    # tiny block-diagonal head-mix matrix: hm[d, e] = 1 iff head(d) == head(e)
    d = np.arange(D)
    hm_np = (d[:, None] // HEAD_DIM == d[None, :] // HEAD_DIM).astype(np.float32)
    hm = jnp.asarray(hm_np, dtype=jnp.bfloat16)

    param_order = ["wqkv", "bqkv", "wo", "bo", "ln1g", "ln1b",
                   "w1", "b1", "w2", "b2", "ln2g", "ln2b", "wf", "bf"]

    def const_spec(arr):
        nd = arr.ndim
        return pl.BlockSpec(arr.shape, lambda b, _nd=nd: (0,) * _nd)

    in_specs = [pl.BlockSpec((N, D), lambda b: (b, 0)),   # Bt batch elements / grid step
                const_spec(hm)]
    args = [x2d, hm]
    for name in param_order:
        arr = params[name]
        in_specs.append(const_spec(arr))
        args.append(arr)

    out = pl.pallas_call(
        transformer_kernel,
        out_shape=jax.ShapeDtypeStruct((B_pad, C), jnp.float32),
        grid=(nb,),
        in_specs=in_specs,
        out_specs=pl.BlockSpec((Bt, C), lambda b: (b, 0)),
        compiler_params=pltpu.CompilerParams(
            dimension_semantics=("parallel",),
            vmem_limit_bytes=48 * 1024 * 1024),
    )(*args)
    return out[:B]


# ---- deterministic parameter init ---------------------------------------------
def init_params(key):
    ks = jax.random.split(key, 11)

    def rnd(k, shape, scale=0.05, dtype=jnp.float32):
        return (jax.random.normal(k, shape, dtype=jnp.float32) * scale).astype(dtype)

    L, D, FF, C = NUM_LAYERS, EMBED_DIM, FF_DIM, NUM_CLASSES
    bf16 = jnp.bfloat16
    return {
        "emb":  rnd(ks[0], (VOCAB_SIZE, D), 0.1),
        # weights are stored pre-transposed: (in_features, out_features)
        "wqkv": rnd(ks[1], (L, D, 3 * D), dtype=bf16),     # in_proj per layer
        "bqkv": rnd(ks[2], (L, 1, 3 * D)),
        "wo":   rnd(ks[3], (L, D, D), dtype=bf16),         # out_proj
        "bo":   rnd(ks[4], (L, 1, D)),
        "ln1g": jnp.ones((L, 1, D), jnp.float32),
        "ln1b": jnp.zeros((L, 1, D), jnp.float32),
        "w1":   rnd(ks[5], (L, D, FF), dtype=bf16),        # linear1
        "b1":   rnd(ks[6], (L, 1, FF)),
        "w2":   rnd(ks[7], (L, FF, D), dtype=bf16),        # linear2
        "b2":   rnd(ks[8], (L, 1, D)),
        "ln2g": jnp.ones((L, 1, D), jnp.float32),
        "ln2b": jnp.zeros((L, 1, D), jnp.float32),
        "wf":   rnd(ks[9], (D, C), dtype=bf16),            # final fc
        "bf":   rnd(ks[10], (1, C)),
    }


# ---- pure-JAX reference for verification ---------------------------------------
def reference_forward(tokens, params):
    x = params["emb"][tokens].astype(jnp.float32)          # (B, S, D)
    B, S, D = x.shape
    for l in range(NUM_LAYERS):
        wqkv = params["wqkv"][l].astype(jnp.float32)
        qkv = jnp.einsum("bsd,de->bse", x, wqkv) + params["bqkv"][l]
        q, k, v = jnp.split(qkv, 3, axis=-1)
        q = q.reshape(B, S, NHEAD, HEAD_DIM)
        k = k.reshape(B, S, NHEAD, HEAD_DIM)
        v = v.reshape(B, S, NHEAD, HEAD_DIM)
        s = jnp.einsum("bqhd,bkhd->bhqk", q, k) / math.sqrt(HEAD_DIM)
        p = jax.nn.softmax(s, axis=-1)
        attn = jnp.einsum("bhqk,bkhd->bqhd", p, v).reshape(B, S, D)
        attn = jnp.einsum("bsd,de->bse", attn,
                          params["wo"][l].astype(jnp.float32)) + params["bo"][l]
        x = _layer_norm(x + attn, params["ln1g"][l], params["ln1b"][l])
        h1 = jax.nn.relu(jnp.einsum("bsd,df->bsf", x,
                                    params["w1"][l].astype(jnp.float32)) + params["b1"][l])
        ff = jnp.einsum("bsf,fd->bsd", h1,
                        params["w2"][l].astype(jnp.float32)) + params["b2"][l]
        x = _layer_norm(x + ff, params["ln2g"][l], params["ln2b"][l])
    return x[:, 0, :] @ params["wf"].astype(jnp.float32) + params["bf"]


if __name__ == "__main__":
    key = jax.random.PRNGKey(0)
    pkey, tkey, tkey2 = jax.random.split(key, 3)
    params = init_params(pkey)

    # small demo shape
    B, S = 2, 8
    tokens = jax.random.randint(tkey, (B, S), 0, VOCAB_SIZE, dtype=jnp.int32)
    out = jax.block_until_ready(transformer_forward(tokens, params))
    ref = reference_forward(tokens, params)
    np.testing.assert_allclose(np.asarray(out), np.asarray(ref), rtol=5e-2, atol=5e-2)

    # larger batch: exercises a bigger per-step row count (Bt = 48)
    B2 = 48
    tokens2 = jax.random.randint(tkey2, (B2, S), 0, VOCAB_SIZE, dtype=jnp.int32)
    out2 = jax.block_until_ready(transformer_forward(tokens2, params))
    ref2 = reference_forward(tokens2, params)
    np.testing.assert_allclose(np.asarray(out2), np.asarray(ref2), rtol=5e-2, atol=5e-2)

    print("KERNEL_OK")
</pallas_src>

<mosaic_0001>
module attributes {stable_mosaic.version = 11 : i64} {
  func.func @transformer_kernel(%arg0: i32, %arg1: memref<16x32xf32, #tpu.memory_space<vmem>>, %arg2: memref<32x32xbf16, #tpu.memory_space<vmem>>, %arg3: memref<2x32x96xbf16, #tpu.memory_space<vmem>>, %arg4: memref<2x1x96xf32, #tpu.memory_space<vmem>>, %arg5: memref<2x32x32xbf16, #tpu.memory_space<vmem>>, %arg6: memref<2x1x32xf32, #tpu.memory_space<vmem>>, %arg7: memref<2x1x32xf32, #tpu.memory_space<vmem>>, %arg8: memref<2x1x32xf32, #tpu.memory_space<vmem>>, %arg9: memref<2x32x2048xbf16, #tpu.memory_space<vmem>>, %arg10: memref<2x1x2048xf32, #tpu.memory_space<vmem>>, %arg11: memref<2x2048x32xbf16, #tpu.memory_space<vmem>>, %arg12: memref<2x1x32xf32, #tpu.memory_space<vmem>>, %arg13: memref<2x1x32xf32, #tpu.memory_space<vmem>>, %arg14: memref<2x1x32xf32, #tpu.memory_space<vmem>>, %arg15: memref<32x4xbf16, #tpu.memory_space<vmem>>, %arg16: memref<1x4xf32, #tpu.memory_space<vmem>>, %arg17: memref<2x4xf32, #tpu.memory_space<vmem>>) attributes {dimension_semantics = [#tpu.dimension_semantics<parallel>], iteration_bounds = array<i64: 1>, scalar_prefetch = 0 : i64, scratch_operands = 0 : i64, tpu.core_type = #tpu.core_type<tc>, window_params = [{transform_indices = @transform_0, window_bounds = array<i64: 16, 32>}, {pipeline_mode = #tpu.pipeline_mode<synchronous>, transform_indices = @transform_1, window_bounds = array<i64: 32, 32>}, {pipeline_mode = #tpu.pipeline_mode<synchronous>, transform_indices = @transform_2, window_bounds = array<i64: 2, 32, 96>}, {pipeline_mode = #tpu.pipeline_mode<synchronous>, transform_indices = @transform_3, window_bounds = array<i64: 2, 1, 96>}, {pipeline_mode = #tpu.pipeline_mode<synchronous>, transform_indices = @transform_4, window_bounds = array<i64: 2, 32, 32>}, {pipeline_mode = #tpu.pipeline_mode<synchronous>, transform_indices = @transform_5, window_bounds = array<i64: 2, 1, 32>}, {pipeline_mode = #tpu.pipeline_mode<synchronous>, transform_indices = @transform_6, window_bounds = array<i64: 2, 1, 32>}, {pipeline_mode = #tpu.pipeline_mode<synchronous>, transform_indices = @transform_7, window_bounds = array<i64: 2, 1, 32>}, {pipeline_mode = #tpu.pipeline_mode<synchronous>, transform_indices = @transform_8, window_bounds = array<i64: 2, 32, 2048>}, {pipeline_mode = #tpu.pipeline_mode<synchronous>, transform_indices = @transform_9, window_bounds = array<i64: 2, 1, 2048>}, {pipeline_mode = #tpu.pipeline_mode<synchronous>, transform_indices = @transform_10, window_bounds = array<i64: 2, 2048, 32>}, {pipeline_mode = #tpu.pipeline_mode<synchronous>, transform_indices = @transform_11, window_bounds = array<i64: 2, 1, 32>}, {pipeline_mode = #tpu.pipeline_mode<synchronous>, transform_indices = @transform_12, window_bounds = array<i64: 2, 1, 32>}, {pipeline_mode = #tpu.pipeline_mode<synchronous>, transform_indices = @transform_13, window_bounds = array<i64: 2, 1, 32>}, {pipeline_mode = #tpu.pipeline_mode<synchronous>, transform_indices = @transform_14, window_bounds = array<i64: 32, 4>}, {pipeline_mode = #tpu.pipeline_mode<synchronous>, transform_indices = @transform_15, window_bounds = array<i64: 1, 4>}, {transform_indices = @transform_16, window_bounds = array<i64: 2, 4>}]} {
    %c0 = arith.constant 0 : index
    %c0_0 = arith.constant 0 : index
    %0 = vector.load %arg2[%c0, %c0_0] : memref<32x32xbf16, #tpu.memory_space<vmem>>, vector<32x32xbf16>
    %c0_1 = arith.constant 0 : index
    %c0_2 = arith.constant 0 : index
    %1 = vector.load %arg1[%c0_1, %c0_2] : memref<16x32xf32, #tpu.memory_space<vmem>>, vector<16x32xf32>
    %2 = arith.truncf %1 : vector<16x32xf32> to vector<16x32xbf16>
    %c0_3 = arith.constant 0 : index
    %c0_4 = arith.constant 0 : index
    %c0_5 = arith.constant 0 : index
    %3 = vector.load %arg3[%c0_3, %c0_4, %c0_5] : memref<2x32x96xbf16, #tpu.memory_space<vmem>>, vector<1x32x96xbf16>
    %4 = vector.shape_cast %3 : vector<1x32x96xbf16> to vector<32x96xbf16>
    %cst = arith.constant dense<0.000000e+00> : vector<16x96xf32>
    %5 = tpu.matmul %2, %4, %cst {dimension_numbers = #tpu.dot_dimension_numbers<[1], [0], [0], [1], [0, 0, 1, 1], [], []>} : vector<16x32xbf16>, vector<32x96xbf16>, vector<16x96xf32> -> vector<16x96xf32>
    %c0_6 = arith.constant 0 : index
    %c0_7 = arith.constant 0 : index
    %c0_8 = arith.constant 0 : index
    %6 = vector.load %arg4[%c0_6, %c0_7, %c0_8] : memref<2x1x96xf32, #tpu.memory_space<vmem>>, vector<1x1x96xf32>
    %7 = vector.shape_cast %6 : vector<1x1x96xf32> to vector<1x96xf32>
    %8 = vector.broadcast %7 : vector<1x96xf32> to vector<16x96xf32>
    %9 = arith.addf %5, %8 : vector<16x96xf32>
    %10 = vector.extract_strided_slice %9 {offsets = [0, 0], sizes = [16, 32], strides = [1, 1]} : vector<16x96xf32> to vector<16x32xf32>
    %cst_9 = arith.constant 5.000000e-01 : f32
    %11 = vector.broadcast %cst_9 : f32 to vector<16x32xf32>
    %12 = arith.mulf %10, %11 : vector<16x32xf32>
    %13 = vector.shape_cast %12 : vector<16x32xf32> to vector<2x8x32xf32>
    %14 = vector.extract_strided_slice %9 {offsets = [0, 32], sizes = [16, 32], strides = [1, 1]} : vector<16x96xf32> to vector<16x32xf32>
    %15 = vector.shape_cast %14 : vector<16x32xf32> to vector<2x8x32xf32>
    %16 = vector.extract_strided_slice %9 {offsets = [0, 64], sizes = [16, 32], strides = [1, 1]} : vector<16x96xf32> to vector<16x32xf32>
    %17 = vector.shape_cast %16 : vector<16x32xf32> to vector<2x8x32xf32>
    %18 = vector.shape_cast %13 : vector<2x8x32xf32> to vector<2x8x1x32xf32>
    %19 = vector.shape_cast %15 : vector<2x8x32xf32> to vector<2x1x8x32xf32>
    %20 = vector.broadcast %18 : vector<2x8x1x32xf32> to vector<2x8x8x32xf32>
    %21 = vector.broadcast %19 : vector<2x1x8x32xf32> to vector<2x8x8x32xf32>
    %22 = arith.mulf %20, %21 : vector<2x8x8x32xf32>
    %23 = vector.shape_cast %22 : vector<2x8x8x32xf32> to vector<128x32xf32>
    %24 = arith.truncf %23 : vector<128x32xf32> to vector<128x32xbf16>
    %cst_10 = arith.constant dense<0.000000e+00> : vector<128x32xf32>
    %25 = tpu.matmul %24, %0, %cst_10 {dimension_numbers = #tpu.dot_dimension_numbers<[1], [0], [0], [1], [0, 0, 1, 1], [], []>} : vector<128x32xbf16>, vector<32x32xbf16>, vector<128x32xf32> -> vector<128x32xf32>
    %26 = vector.shape_cast %25 : vector<128x32xf32> to vector<2x8x8x32xf32>
    %cst_11 = arith.constant dense<0xFF800000> : vector<2x8x32xf32>
    %27 = vector.multi_reduction <maximumf>, %26, %cst_11 [2] : vector<2x8x8x32xf32> to vector<2x8x32xf32>
    %28 = vector.shape_cast %27 : vector<2x8x32xf32> to vector<2x8x1x32xf32>
    %29 = vector.broadcast %28 : vector<2x8x1x32xf32> to vector<2x8x8x32xf32>
    %30 = arith.subf %26, %29 : vector<2x8x8x32xf32>
    %31 = math.exp %30 : vector<2x8x8x32xf32>
    %cst_12 = arith.constant dense<0.000000e+00> : vector<2x8x32xf32>
    %32 = vector.multi_reduction <add>, %31, %cst_12 [2] : vector<2x8x8x32xf32> to vector<2x8x32xf32>
    %33 = vector.shape_cast %17 : vector<2x8x32xf32> to vector<2x1x8x32xf32>
    %34 = vector.broadcast %33 : vector<2x1x8x32xf32> to vector<2x8x8x32xf32>
    %35 = arith.mulf %31, %34 : vector<2x8x8x32xf32>
    %cst_13 = arith.constant dense<0.000000e+00> : vector<2x8x32xf32>
    %36 = vector.multi_reduction <add>, %35, %cst_13 [2] : vector<2x8x8x32xf32> to vector<2x8x32xf32>
    %37 = tpu.reciprocal %32 {approx = true} : vector<2x8x32xf32> -> vector<2x8x32xf32>
    %38 = arith.mulf %36, %37 : vector<2x8x32xf32>
    %39 = vector.shape_cast %38 : vector<2x8x32xf32> to vector<16x32xf32>
    %40 = arith.truncf %39 : vector<16x32xf32> to vector<16x32xbf16>
    %c0_14 = arith.constant 0 : index
    %c0_15 = arith.constant 0 : index
    %c0_16 = arith.constant 0 : index
    %41 = vector.load %arg5[%c0_14, %c0_15, %c0_16] : memref<2x32x32xbf16, #tpu.memory_space<vmem>>, vector<1x32x32xbf16>
    %42 = vector.shape_cast %41 : vector<1x32x32xbf16> to vector<32x32xbf16>
    %cst_17 = arith.constant dense<0.000000e+00> : vector<16x32xf32>
    %43 = tpu.matmul %40, %42, %cst_17 {dimension_numbers = #tpu.dot_dimension_numbers<[1], [0], [0], [1], [0, 0, 1, 1], [], []>} : vector<16x32xbf16>, vector<32x32xbf16>, vector<16x32xf32> -> vector<16x32xf32>
    %c0_18 = arith.constant 0 : index
    %c0_19 = arith.constant 0 : index
    %c0_20 = arith.constant 0 : index
    %44 = vector.load %arg6[%c0_18, %c0_19, %c0_20] : memref<2x1x32xf32, #tpu.memory_space<vmem>>, vector<1x1x32xf32>
    %45 = vector.shape_cast %44 : vector<1x1x32xf32> to vector<1x32xf32>
    %46 = vector.broadcast %45 : vector<1x32xf32> to vector<16x32xf32>
    %47 = arith.addf %43, %46 : vector<16x32xf32>
    %48 = arith.addf %1, %47 : vector<16x32xf32>
    %c0_21 = arith.constant 0 : index
    %c0_22 = arith.constant 0 : index
    %c0_23 = arith.constant 0 : index
    %49 = vector.load %arg7[%c0_21, %c0_22, %c0_23] : memref<2x1x32xf32, #tpu.memory_space<vmem>>, vector<1x1x32xf32>
    %50 = vector.shape_cast %49 : vector<1x1x32xf32> to vector<1x32xf32>
    %c0_24 = arith.constant 0 : index
    %c0_25 = arith.constant 0 : index
    %c0_26 = arith.constant 0 : index
    %51 = vector.load %arg8[%c0_24, %c0_25, %c0_26] : memref<2x1x32xf32, #tpu.memory_space<vmem>>, vector<1x1x32xf32>
    %52 = vector.shape_cast %51 : vector<1x1x32xf32> to vector<1x32xf32>
    %cst_27 = arith.constant dense<0.000000e+00> : vector<16xf32>
    %53 = vector.multi_reduction <add>, %48, %cst_27 [1] : vector<16x32xf32> to vector<16xf32>
    %54 = vector.shape_cast %53 : vector<16xf32> to vector<16x1xf32>
    %cst_28 = arith.constant 3.200000e+01 : f32
    %55 = vector.broadcast %cst_28 : f32 to vector<16x1xf32>
    %56 = arith.divf %54, %55 : vector<16x1xf32>
    %57 = vector.broadcast %56 : vector<16x1xf32> to vector<16x32xf32>
    %58 = arith.subf %48, %57 : vector<16x32xf32>
    %59 = arith.mulf %58, %58 : vector<16x32xf32>
    %cst_29 = arith.constant dense<0.000000e+00> : vector<16xf32>
    %60 = vector.multi_reduction <add>, %59, %cst_29 [1] : vector<16x32xf32> to vector<16xf32>
    %61 = vector.shape_cast %60 : vector<16xf32> to vector<16x1xf32>
    %cst_30 = arith.constant 3.200000e+01 : f32
    %62 = vector.broadcast %cst_30 : f32 to vector<16x1xf32>
    %63 = arith.divf %61, %62 : vector<16x1xf32>
    %64 = vector.broadcast %56 : vector<16x1xf32> to vector<16x32xf32>
    %65 = arith.subf %48, %64 : vector<16x32xf32>
    %cst_31 = arith.constant 9.99999974E-6 : f32
    %66 = vector.broadcast %cst_31 : f32 to vector<16x1xf32>
    %67 = arith.addf %63, %66 : vector<16x1xf32>
    %68 = math.rsqrt %67 : vector<16x1xf32>
    %69 = vector.broadcast %68 : vector<16x1xf32> to vector<16x32xf32>
    %70 = arith.mulf %65, %69 : vector<16x32xf32>
    %71 = vector.broadcast %50 : vector<1x32xf32> to vector<16x32xf32>
    %72 = arith.mulf %70, %71 : vector<16x32xf32>
    %73 = vector.broadcast %52 : vector<1x32xf32> to vector<16x32xf32>
    %74 = arith.addf %72, %73 : vector<16x32xf32>
    %75 = arith.truncf %74 : vector<16x32xf32> to vector<16x32xbf16>
    %c0_32 = arith.constant 0 : index
    %c0_33 = arith.constant 0 : index
    %c0_34 = arith.constant 0 : index
    %76 = vector.load %arg9[%c0_32, %c0_33, %c0_34] : memref<2x32x2048xbf16, #tpu.memory_space<vmem>>, vector<1x32x2048xbf16>
    %77 = vector.shape_cast %76 : vector<1x32x2048xbf16> to vector<32x2048xbf16>
    %cst_35 = arith.constant dense<0.000000e+00> : vector<16x2048xf32>
    %78 = tpu.matmul %75, %77, %cst_35 {dimension_numbers = #tpu.dot_dimension_numbers<[1], [0], [0], [1], [0, 0, 1, 1], [], []>} : vector<16x32xbf16>, vector<32x2048xbf16>, vector<16x2048xf32> -> vector<16x2048xf32>
    %c0_36 = arith.constant 0 : index
    %c0_37 = arith.constant 0 : index
    %c0_38 = arith.constant 0 : index
    %79 = vector.load %arg10[%c0_36, %c0_37, %c0_38] : memref<2x1x2048xf32, #tpu.memory_space<vmem>>, vector<1x1x2048xf32>
    %80 = vector.shape_cast %79 : vector<1x1x2048xf32> to vector<1x2048xf32>
    %81 = vector.broadcast %80 : vector<1x2048xf32> to vector<16x2048xf32>
    %82 = arith.addf %78, %81 : vector<16x2048xf32>
    %cst_39 = arith.constant 0.000000e+00 : f32
    %83 = vector.broadcast %cst_39 : f32 to vector<16x2048xf32>
    %84 = arith.maximumf %82, %83 : vector<16x2048xf32>
    %85 = arith.truncf %84 : vector<16x2048xf32> to vector<16x2048xbf16>
    %c0_40 = arith.constant 0 : index
    %c0_41 = arith.constant 0 : index
    %c0_42 = arith.constant 0 : index
    %86 = vector.load %arg11[%c0_40, %c0_41, %c0_42] : memref<2x2048x32xbf16, #tpu.memory_space<vmem>>, vector<1x2048x32xbf16>
    %87 = vector.shape_cast %86 : vector<1x2048x32xbf16> to vector<2048x32xbf16>
    %cst_43 = arith.constant dense<0.000000e+00> : vector<16x32xf32>
    %88 = tpu.matmul %85, %87, %cst_43 {dimension_numbers = #tpu.dot_dimension_numbers<[1], [0], [0], [1], [0, 0, 1, 1], [], []>} : vector<16x2048xbf16>, vector<2048x32xbf16>, vector<16x32xf32> -> vector<16x32xf32>
    %c0_44 = arith.constant 0 : index
    %c0_45 = arith.constant 0 : index
    %c0_46 = arith.constant 0 : index
    %89 = vector.load %arg12[%c0_44, %c0_45, %c0_46] : memref<2x1x32xf32, #tpu.memory_space<vmem>>, vector<1x1x32xf32>
    %90 = vector.shape_cast %89 : vector<1x1x32xf32> to vector<1x32xf32>
    %91 = vector.broadcast %90 : vector<1x32xf32> to vector<16x32xf32>
    %92 = arith.addf %88, %91 : vector<16x32xf32>
    %93 = arith.addf %74, %92 : vector<16x32xf32>
    %c0_47 = arith.constant 0 : index
    %c0_48 = arith.constant 0 : index
    %c0_49 = arith.constant 0 : index
    %94 = vector.load %arg13[%c0_47, %c0_48, %c0_49] : memref<2x1x32xf32, #tpu.memory_space<vmem>>, vector<1x1x32xf32>
    %95 = vector.shape_cast %94 : vector<1x1x32xf32> to vector<1x32xf32>
    %c0_50 = arith.constant 0 : index
    %c0_51 = arith.constant 0 : index
    %c0_52 = arith.constant 0 : index
    %96 = vector.load %arg14[%c0_50, %c0_51, %c0_52] : memref<2x1x32xf32, #tpu.memory_space<vmem>>, vector<1x1x32xf32>
    %97 = vector.shape_cast %96 : vector<1x1x32xf32> to vector<1x32xf32>
    %cst_53 = arith.constant dense<0.000000e+00> : vector<16xf32>
    %98 = vector.multi_reduction <add>, %93, %cst_53 [1] : vector<16x32xf32> to vector<16xf32>
    %99 = vector.shape_cast %98 : vector<16xf32> to vector<16x1xf32>
    %cst_54 = arith.constant 3.200000e+01 : f32
    %100 = vector.broadcast %cst_54 : f32 to vector<16x1xf32>
    %101 = arith.divf %99, %100 : vector<16x1xf32>
    %102 = vector.broadcast %101 : vector<16x1xf32> to vector<16x32xf32>
    %103 = arith.subf %93, %102 : vector<16x32xf32>
    %104 = arith.mulf %103, %103 : vector<16x32xf32>
    %cst_55 = arith.constant dense<0.000000e+00> : vector<16xf32>
    %105 = vector.multi_reduction <add>, %104, %cst_55 [1] : vector<16x32xf32> to vector<16xf32>
    %106 = vector.shape_cast %105 : vector<16xf32> to vector<16x1xf32>
    %cst_56 = arith.constant 3.200000e+01 : f32
    %107 = vector.broadcast %cst_56 : f32 to vector<16x1xf32>
    %108 = arith.divf %106, %107 : vector<16x1xf32>
    %109 = vector.broadcast %101 : vector<16x1xf32> to vector<16x32xf32>
    %110 = arith.subf %93, %109 : vector<16x32xf32>
    %cst_57 = arith.constant 9.99999974E-6 : f32
    %111 = vector.broadcast %cst_57 : f32 to vector<16x1xf32>
    %112 = arith.addf %108, %111 : vector<16x1xf32>
    %113 = math.rsqrt %112 : vector<16x1xf32>
    %114 = vector.broadcast %113 : vector<16x1xf32> to vector<16x32xf32>
    %115 = arith.mulf %110, %114 : vector<16x32xf32>
    %116 = vector.broadcast %95 : vector<1x32xf32> to vector<16x32xf32>
    %117 = arith.mulf %115, %116 : vector<16x32xf32>
    %118 = vector.broadcast %97 : vector<1x32xf32> to vector<16x32xf32>
    %119 = arith.addf %117, %118 : vector<16x32xf32>
    %120 = arith.truncf %119 : vector<16x32xf32> to vector<16x32xbf16>
    %c1 = arith.constant 1 : index
    %c0_58 = arith.constant 0 : index
    %c0_59 = arith.constant 0 : index
    %121 = vector.load %arg3[%c1, %c0_58, %c0_59] : memref<2x32x96xbf16, #tpu.memory_space<vmem>>, vector<1x32x96xbf16>
    %122 = vector.shape_cast %121 : vector<1x32x96xbf16> to vector<32x96xbf16>
    %cst_60 = arith.constant dense<0.000000e+00> : vector<16x96xf32>
    %123 = tpu.matmul %120, %122, %cst_60 {dimension_numbers = #tpu.dot_dimension_numbers<[1], [0], [0], [1], [0, 0, 1, 1], [], []>} : vector<16x32xbf16>, vector<32x96xbf16>, vector<16x96xf32> -> vector<16x96xf32>
    %c1_61 = arith.constant 1 : index
    %c0_62 = arith.constant 0 : index
    %c0_63 = arith.constant 0 : index
    %124 = vector.load %arg4[%c1_61, %c0_62, %c0_63] : memref<2x1x96xf32, #tpu.memory_space<vmem>>, vector<1x1x96xf32>
    %125 = vector.shape_cast %124 : vector<1x1x96xf32> to vector<1x96xf32>
    %126 = vector.broadcast %125 : vector<1x96xf32> to vector<16x96xf32>
    %127 = arith.addf %123, %126 : vector<16x96xf32>
    %128 = vector.extract_strided_slice %127 {offsets = [0, 0], sizes = [16, 32], strides = [1, 1]} : vector<16x96xf32> to vector<16x32xf32>
    %cst_64 = arith.constant 5.000000e-01 : f32
    %129 = vector.broadcast %cst_64 : f32 to vector<16x32xf32>
    %130 = arith.mulf %128, %129 : vector<16x32xf32>
    %131 = vector.shape_cast %130 : vector<16x32xf32> to vector<2x8x32xf32>
    %132 = vector.extract_strided_slice %127 {offsets = [0, 32], sizes = [16, 32], strides = [1, 1]} : vector<16x96xf32> to vector<16x32xf32>
    %133 = vector.shape_cast %132 : vector<16x32xf32> to vector<2x8x32xf32>
    %134 = vector.extract_strided_slice %127 {offsets = [0, 64], sizes = [16, 32], strides = [1, 1]} : vector<16x96xf32> to vector<16x32xf32>
    %135 = vector.shape_cast %134 : vector<16x32xf32> to vector<2x8x32xf32>
    %136 = vector.extract_strided_slice %131 {offsets = [0, 0, 0], sizes = [2, 1, 32], strides = [1, 1, 1]} : vector<2x8x32xf32> to vector<2x1x32xf32>
    %137 = vector.shape_cast %136 : vector<2x1x32xf32> to vector<2x32xf32>
    %138 = vector.shape_cast %137 : vector<2x32xf32> to vector<2x1x32xf32>
    %139 = vector.broadcast %138 : vector<2x1x32xf32> to vector<2x8x32xf32>
    %140 = arith.mulf %139, %133 : vector<2x8x32xf32>
    %141 = vector.shape_cast %140 : vector<2x8x32xf32> to vector<16x32xf32>
    %142 = arith.truncf %141 : vector<16x32xf32> to vector<16x32xbf16>
    %cst_65 = arith.constant dense<0.000000e+00> : vector<16x32xf32>
    %143 = tpu.matmul %142, %0, %cst_65 {dimension_numbers = #tpu.dot_dimension_numbers<[1], [0], [0], [1], [0, 0, 1, 1], [], []>} : vector<16x32xbf16>, vector<32x32xbf16>, vector<16x32xf32> -> vector<16x32xf32>
    %144 = vector.shape_cast %143 : vector<16x32xf32> to vector<2x8x32xf32>
    %cst_66 = arith.constant dense<0xFF800000> : vector<2x32xf32>
    %145 = vector.multi_reduction <maximumf>, %144, %cst_66 [1] : vector<2x8x32xf32> to vector<2x32xf32>
    %146 = vector.shape_cast %145 : vector<2x32xf32> to vector<2x1x32xf32>
    %147 = vector.broadcast %146 : vector<2x1x32xf32> to vector<2x8x32xf32>
    %148 = arith.subf %144, %147 : vector<2x8x32xf32>
    %149 = math.exp %148 : vector<2x8x32xf32>
    %cst_67 = arith.constant dense<0.000000e+00> : vector<2x32xf32>
    %150 = vector.multi_reduction <add>, %149, %cst_67 [1] : vector<2x8x32xf32> to vector<2x32xf32>
    %151 = arith.mulf %149, %135 : vector<2x8x32xf32>
    %cst_68 = arith.constant dense<0.000000e+00> : vector<2x32xf32>
    %152 = vector.multi_reduction <add>, %151, %cst_68 [1] : vector<2x8x32xf32> to vector<2x32xf32>
    %153 = tpu.reciprocal %150 {approx = true} : vector<2x32xf32> -> vector<2x32xf32>
    %154 = arith.mulf %152, %153 : vector<2x32xf32>
    %155 = arith.truncf %154 : vector<2x32xf32> to vector<2x32xbf16>
    %c1_69 = arith.constant 1 : index
    %c0_70 = arith.constant 0 : index
    %c0_71 = arith.constant 0 : index
    %156 = vector.load %arg5[%c1_69, %c0_70, %c0_71] : memref<2x32x32xbf16, #tpu.memory_space<vmem>>, vector<1x32x32xbf16>
    %157 = vector.shape_cast %156 : vector<1x32x32xbf16> to vector<32x32xbf16>
    %cst_72 = arith.constant dense<0.000000e+00> : vector<2x32xf32>
    %158 = tpu.matmul %155, %157, %cst_72 {dimension_numbers = #tpu.dot_dimension_numbers<[1], [0], [0], [1], [0, 0, 1, 1], [], []>} : vector<2x32xbf16>, vector<32x32xbf16>, vector<2x32xf32> -> vector<2x32xf32>
    %c1_73 = arith.constant 1 : index
    %c0_74 = arith.constant 0 : index
    %c0_75 = arith.constant 0 : index
    %159 = vector.load %arg6[%c1_73, %c0_74, %c0_75] : memref<2x1x32xf32, #tpu.memory_space<vmem>>, vector<1x1x32xf32>
    %160 = vector.shape_cast %159 : vector<1x1x32xf32> to vector<1x32xf32>
    %161 = vector.broadcast %160 : vector<1x32xf32> to vector<2x32xf32>
    %162 = arith.addf %158, %161 : vector<2x32xf32>
    %163 = vector.shape_cast %119 : vector<16x32xf32> to vector<2x8x32xf32>
    %164 = vector.extract_strided_slice %163 {offsets = [0, 0, 0], sizes = [2, 1, 32], strides = [1, 1, 1]} : vector<2x8x32xf32> to vector<2x1x32xf32>
    %165 = vector.shape_cast %164 : vector<2x1x32xf32> to vector<2x32xf32>
    %166 = arith.addf %165, %162 : vector<2x32xf32>
    %c1_76 = arith.constant 1 : index
    %c0_77 = arith.constant 0 : index
    %c0_78 = arith.constant 0 : index
    %167 = vector.load %arg7[%c1_76, %c0_77, %c0_78] : memref<2x1x32xf32, #tpu.memory_space<vmem>>, vector<1x1x32xf32>
    %168 = vector.shape_cast %167 : vector<1x1x32xf32> to vector<1x32xf32>
    %c1_79 = arith.constant 1 : index
    %c0_80 = arith.constant 0 : index
    %c0_81 = arith.constant 0 : index
    %169 = vector.load %arg8[%c1_79, %c0_80, %c0_81] : memref<2x1x32xf32, #tpu.memory_space<vmem>>, vector<1x1x32xf32>
    %170 = vector.shape_cast %169 : vector<1x1x32xf32> to vector<1x32xf32>
    %cst_82 = arith.constant dense<0.000000e+00> : vector<2xf32>
    %171 = vector.multi_reduction <add>, %166, %cst_82 [1] : vector<2x32xf32> to vector<2xf32>
    %172 = vector.shape_cast %171 : vector<2xf32> to vector<2x1xf32>
    %cst_83 = arith.constant 3.200000e+01 : f32
    %173 = vector.broadcast %cst_83 : f32 to vector<2x1xf32>
    %174 = arith.divf %172, %173 : vector<2x1xf32>
    %175 = vector.broadcast %174 : vector<2x1xf32> to vector<2x32xf32>
    %176 = arith.subf %166, %175 : vector<2x32xf32>
    %177 = arith.mulf %176, %176 : vector<2x32xf32>
    %cst_84 = arith.constant dense<0.000000e+00> : vector<2xf32>
    %178 = vector.multi_reduction <add>, %177, %cst_84 [1] : vector<2x32xf32> to vector<2xf32>
    %179 = vector.shape_cast %178 : vector<2xf32> to vector<2x1xf32>
    %cst_85 = arith.constant 3.200000e+01 : f32
    %180 = vector.broadcast %cst_85 : f32 to vector<2x1xf32>
    %181 = arith.divf %179, %180 : vector<2x1xf32>
    %182 = vector.broadcast %174 : vector<2x1xf32> to vector<2x32xf32>
    %183 = arith.subf %166, %182 : vector<2x32xf32>
    %cst_86 = arith.constant 9.99999974E-6 : f32
    %184 = vector.broadcast %cst_86 : f32 to vector<2x1xf32>
    %185 = arith.addf %181, %184 : vector<2x1xf32>
    %186 = math.rsqrt %185 : vector<2x1xf32>
    %187 = vector.broadcast %186 : vector<2x1xf32> to vector<2x32xf32>
    %188 = arith.mulf %183, %187 : vector<2x32xf32>
    %189 = vector.broadcast %168 : vector<1x32xf32> to vector<2x32xf32>
    %190 = arith.mulf %188, %189 : vector<2x32xf32>
    %191 = vector.broadcast %170 : vector<1x32xf32> to vector<2x32xf32>
    %192 = arith.addf %190, %191 : vector<2x32xf32>
    %193 = arith.truncf %192 : vector<2x32xf32> to vector<2x32xbf16>
    %c1_87 = arith.constant 1 : index
    %c0_88 = arith.constant 0 : index
    %c0_89 = arith.constant 0 : index
    %194 = vector.load %arg9[%c1_87, %c0_88, %c0_89] : memref<2x32x2048xbf16, #tpu.memory_space<vmem>>, vector<1x32x2048xbf16>
    %195 = vector.shape_cast %194 : vector<1x32x2048xbf16> to vector<32x2048xbf16>
    %cst_90 = arith.constant dense<0.000000e+00> : vector<2x2048xf32>
    %196 = tpu.matmul %193, %195, %cst_90 {dimension_numbers = #tpu.dot_dimension_numbers<[1], [0], [0], [1], [0, 0, 1, 1], [], []>} : vector<2x32xbf16>, vector<32x2048xbf16>, vector<2x2048xf32> -> vector<2x2048xf32>
    %c1_91 = arith.constant 1 : index
    %c0_92 = arith.constant 0 : index
    %c0_93 = arith.constant 0 : index
    %197 = vector.load %arg10[%c1_91, %c0_92, %c0_93] : memref<2x1x2048xf32, #tpu.memory_space<vmem>>, vector<1x1x2048xf32>
    %198 = vector.shape_cast %197 : vector<1x1x2048xf32> to vector<1x2048xf32>
    %199 = vector.broadcast %198 : vector<1x2048xf32> to vector<2x2048xf32>
    %200 = arith.addf %196, %199 : vector<2x2048xf32>
    %cst_94 = arith.constant 0.000000e+00 : f32
    %201 = vector.broadcast %cst_94 : f32 to vector<2x2048xf32>
    %202 = arith.maximumf %200, %201 : vector<2x2048xf32>
    %203 = arith.truncf %202 : vector<2x2048xf32> to vector<2x2048xbf16>
    %c1_95 = arith.constant 1 : index
    %c0_96 = arith.constant 0 : index
    %c0_97 = arith.constant 0 : index
    %204 = vector.load %arg11[%c1_95, %c0_96, %c0_97] : memref<2x2048x32xbf16, #tpu.memory_space<vmem>>, vector<1x2048x32xbf16>
    %205 = vector.shape_cast %204 : vector<1x2048x32xbf16> to vector<2048x32xbf16>
    %cst_98 = arith.constant dense<0.000000e+00> : vector<2x32xf32>
    %206 = tpu.matmul %203, %205, %cst_98 {dimension_numbers = #tpu.dot_dimension_numbers<[1], [0], [0], [1], [0, 0, 1, 1], [], []>} : vector<2x2048xbf16>, vector<2048x32xbf16>, vector<2x32xf32> -> vector<2x32xf32>
    %c1_99 = arith.constant 1 : index
    %c0_100 = arith.constant 0 : index
    %c0_101 = arith.constant 0 : index
    %207 = vector.load %arg12[%c1_99, %c0_100, %c0_101] : memref<2x1x32xf32, #tpu.memory_space<vmem>>, vector<1x1x32xf32>
    %208 = vector.shape_cast %207 : vector<1x1x32xf32> to vector<1x32xf32>
    %209 = vector.broadcast %208 : vector<1x32xf32> to vector<2x32xf32>
    %210 = arith.addf %206, %209 : vector<2x32xf32>
    %211 = arith.addf %192, %210 : vector<2x32xf32>
    %c1_102 = arith.constant 1 : index
    %c0_103 = arith.constant 0 : index
    %c0_104 = arith.constant 0 : index
    %212 = vector.load %arg13[%c1_102, %c0_103, %c0_104] : memref<2x1x32xf32, #tpu.memory_space<vmem>>, vector<1x1x32xf32>
    %213 = vector.shape_cast %212 : vector<1x1x32xf32> to vector<1x32xf32>
    %c1_105 = arith.constant 1 : index
    %c0_106 = arith.constant 0 : index
    %c0_107 = arith.constant 0 : index
    %214 = vector.load %arg14[%c1_105, %c0_106, %c0_107] : memref<2x1x32xf32, #tpu.memory_space<vmem>>, vector<1x1x32xf32>
    %215 = vector.shape_cast %214 : vector<1x1x32xf32> to vector<1x32xf32>
    %cst_108 = arith.constant dense<0.000000e+00> : vector<2xf32>
    %216 = vector.multi_reduction <add>, %211, %cst_108 [1] : vector<2x32xf32> to vector<2xf32>
    %217 = vector.shape_cast %216 : vector<2xf32> to vector<2x1xf32>
    %cst_109 = arith.constant 3.200000e+01 : f32
    %218 = vector.broadcast %cst_109 : f32 to vector<2x1xf32>
    %219 = arith.divf %217, %218 : vector<2x1xf32>
    %220 = vector.broadcast %219 : vector<2x1xf32> to vector<2x32xf32>
    %221 = arith.subf %211, %220 : vector<2x32xf32>
    %222 = arith.mulf %221, %221 : vector<2x32xf32>
    %cst_110 = arith.constant dense<0.000000e+00> : vector<2xf32>
    %223 = vector.multi_reduction <add>, %222, %cst_110 [1] : vector<2x32xf32> to vector<2xf32>
    %224 = vector.shape_cast %223 : vector<2xf32> to vector<2x1xf32>
    %cst_111 = arith.constant 3.200000e+01 : f32
    %225 = vector.broadcast %cst_111 : f32 to vector<2x1xf32>
    %226 = arith.divf %224, %225 : vector<2x1xf32>
    %227 = vector.broadcast %219 : vector<2x1xf32> to vector<2x32xf32>
    %228 = arith.subf %211, %227 : vector<2x32xf32>
    %cst_112 = arith.constant 9.99999974E-6 : f32
    %229 = vector.broadcast %cst_112 : f32 to vector<2x1xf32>
    %230 = arith.addf %226, %229 : vector<2x1xf32>
    %231 = math.rsqrt %230 : vector<2x1xf32>
    %232 = vector.broadcast %231 : vector<2x1xf32> to vector<2x32xf32>
    %233 = arith.mulf %228, %232 : vector<2x32xf32>
    %234 = vector.broadcast %213 : vector<1x32xf32> to vector<2x32xf32>
    %235 = arith.mulf %233, %234 : vector<2x32xf32>
    %236 = vector.broadcast %215 : vector<1x32xf32> to vector<2x32xf32>
    %237 = arith.addf %235, %236 : vector<2x32xf32>
    %238 = arith.truncf %237 : vector<2x32xf32> to vector<2x32xbf16>
    %c0_113 = arith.constant 0 : index
    %c0_114 = arith.constant 0 : index
    %239 = vector.load %arg15[%c0_113, %c0_114] : memref<32x4xbf16, #tpu.memory_space<vmem>>, vector<32x4xbf16>
    %cst_115 = arith.constant dense<0.000000e+00> : vector<2x4xf32>
    %240 = tpu.matmul %238, %239, %cst_115 {dimension_numbers = #tpu.dot_dimension_numbers<[1], [0], [0], [1], [0, 0, 1, 1], [], []>} : vector<2x32xbf16>, vector<32x4xbf16>, vector<2x4xf32> -> vector<2x4xf32>
    %c0_116 = arith.constant 0 : index
    %c0_117 = arith.constant 0 : index
    %241 = vector.load %arg16[%c0_116, %c0_117] : memref<1x4xf32, #tpu.memory_space<vmem>>, vector<1x4xf32>
    %242 = vector.broadcast %241 : vector<1x4xf32> to vector<2x4xf32>
    %243 = arith.addf %240, %242 : vector<2x4xf32>
    %c0_118 = arith.constant 0 : index
    %c0_119 = arith.constant 0 : index
    %244 = vector.load %arg17[%c0_118, %c0_119] : memref<2x4xf32, #tpu.memory_space<vmem>>, vector<2x4xf32>
    tpu.vector_store %arg17[%c0_118, %c0_119], %243 {strides = array<i32>} : memref<2x4xf32, #tpu.memory_space<vmem>>, vector<2x4xf32>,
    return
  }
  func.func @transform_0(%arg0: i32) -> (i32, i32) {
    %c0_i32 = arith.constant 0 : i32
    %c0_i32_0 = arith.constant 0 : i32
    return %arg0, %c0_i32 : i32, i32
  }
  func.func @transform_1(%arg0: i32) -> (i32, i32) {
    %c0_i32 = arith.constant 0 : i32
    %c0_i32_0 = arith.constant 0 : i32
    %c0_i32_1 = arith.constant 0 : i32
    return %c0_i32, %c0_i32_0 : i32, i32
  }
  func.func @transform_2(%arg0: i32) -> (i32, i32, i32) {
    %c0_i32 = arith.constant 0 : i32
    %c0_i32_0 = arith.constant 0 : i32
    %c0_i32_1 = arith.constant 0 : i32
    %c0_i32_2 = arith.constant 0 : i32
    return %c0_i32, %c0_i32_0, %c0_i32_1 : i32, i32, i32
  }
  func.func @transform_3(%arg0: i32) -> (i32, i32, i32) {
    %c0_i32 = arith.constant 0 : i32
    %c0_i32_0 = arith.constant 0 : i32
    %c0_i32_1 = arith.constant 0 : i32
    %c0_i32_2 = arith.constant 0 : i32
    return %c0_i32, %c0_i32_0, %c0_i32_1 : i32, i32, i32
  }
  func.func @transform_4(%arg0: i32) -> (i32, i32, i32) {
    %c0_i32 = arith.constant 0 : i32
    %c0_i32_0 = arith.constant 0 : i32
    %c0_i32_1 = arith.constant 0 : i32
    %c0_i32_2 = arith.constant 0 : i32
    return %c0_i32, %c0_i32_0, %c0_i32_1 : i32, i32, i32
  }
  func.func @transform_5(%arg0: i32) -> (i32, i32, i32) {
    %c0_i32 = arith.constant 0 : i32
    %c0_i32_0 = arith.constant 0 : i32
    %c0_i32_1 = arith.constant 0 : i32
    %c0_i32_2 = arith.constant 0 : i32
    return %c0_i32, %c0_i32_0, %c0_i32_1 : i32, i32, i32
  }
  func.func @transform_6(%arg0: i32) -> (i32, i32, i32) {
    %c0_i32 = arith.constant 0 : i32
    %c0_i32_0 = arith.constant 0 : i32
    %c0_i32_1 = arith.constant 0 : i32
    %c0_i32_2 = arith.constant 0 : i32
    return %c0_i32, %c0_i32_0, %c0_i32_1 : i32, i32, i32
  }
  func.func @transform_7(%arg0: i32) -> (i32, i32, i32) {
    %c0_i32 = arith.constant 0 : i32
    %c0_i32_0 = arith.constant 0 : i32
    %c0_i32_1 = arith.constant 0 : i32
    %c0_i32_2 = arith.constant 0 : i32
    return %c0_i32, %c0_i32_0, %c0_i32_1 : i32, i32, i32
  }
  func.func @transform_8(%arg0: i32) -> (i32, i32, i32) {
    %c0_i32 = arith.constant 0 : i32
    %c0_i32_0 = arith.constant 0 : i32
    %c0_i32_1 = arith.constant 0 : i32
    %c0_i32_2 = arith.constant 0 : i32
    return %c0_i32, %c0_i32_0, %c0_i32_1 : i32, i32, i32
  }
  func.func @transform_9(%arg0: i32) -> (i32, i32, i32) {
    %c0_i32 = arith.constant 0 : i32
    %c0_i32_0 = arith.constant 0 : i32
    %c0_i32_1 = arith.constant 0 : i32
    %c0_i32_2 = arith.constant 0 : i32
    return %c0_i32, %c0_i32_0, %c0_i32_1 : i32, i32, i32
  }
  func.func @transform_10(%arg0: i32) -> (i32, i32, i32) {
    %c0_i32 = arith.constant 0 : i32
    %c0_i32_0 = arith.constant 0 : i32
    %c0_i32_1 = arith.constant 0 : i32
    %c0_i32_2 = arith.constant 0 : i32
    return %c0_i32, %c0_i32_0, %c0_i32_1 : i32, i32, i32
  }
  func.func @transform_11(%arg0: i32) -> (i32, i32, i32) {
    %c0_i32 = arith.constant 0 : i32
    %c0_i32_0 = arith.constant 0 : i32
    %c0_i32_1 = arith.constant 0 : i32
    %c0_i32_2 = arith.constant 0 : i32
    return %c0_i32, %c0_i32_0, %c0_i32_1 : i32, i32, i32
  }
  func.func @transform_12(%arg0: i32) -> (i32, i32, i32) {
    %c0_i32 = arith.constant 0 : i32
    %c0_i32_0 = arith.constant 0 : i32
    %c0_i32_1 = arith.constant 0 : i32
    %c0_i32_2 = arith.constant 0 : i32
    return %c0_i32, %c0_i32_0, %c0_i32_1 : i32, i32, i32
  }
  func.func @transform_13(%arg0: i32) -> (i32, i32, i32) {
    %c0_i32 = arith.constant 0 : i32
    %c0_i32_0 = arith.constant 0 : i32
    %c0_i32_1 = arith.constant 0 : i32
    %c0_i32_2 = arith.constant 0 : i32
    return %c0_i32, %c0_i32_0, %c0_i32_1 : i32, i32, i32
  }
  func.func @transform_14(%arg0: i32) -> (i32, i32) {
    %c0_i32 = arith.constant 0 : i32
    %c0_i32_0 = arith.constant 0 : i32
    %c0_i32_1 = arith.constant 0 : i32
    return %c0_i32, %c0_i32_0 : i32, i32
  }
  func.func @transform_15(%arg0: i32) -> (i32, i32) {
    %c0_i32 = arith.constant 0 : i32
    %c0_i32_0 = arith.constant 0 : i32
    %c0_i32_1 = arith.constant 0 : i32
    return %c0_i32, %c0_i32_0 : i32, i32
  }
  func.func @transform_16(%arg0: i32) -> (i32, i32) {
    %c0_i32 = arith.constant 0 : i32
    %c0_i32_0 = arith.constant 0 : i32
    return %arg0, %c0_i32 : i32, i32
  }
}

</mosaic_0001>

<bundles_post_ra>
// kernel: tpu_custom_call.1
= control target key start
LH: loop header
LB: loop body
LE: loop exit
PB: predicated region body
PF: predicated region fallthrough
CT: control target
= control target key end

     0   :  { %s8859_s0 = inlined_call_operand.vmem [shape: f32[16,32], index: 0, kind: input, shape index: {}]   ;;  %s8860_s1 = inlined_call_operand.vmem [shape: bf16[32,32], index: 1, kind: input, shape index: {}]   ;;  %s8861_s2 = inlined_call_operand.vmem [shape: bf16[2,32,96], index: 2, kind: input, shape index: {}]   ;;  %s8862_s3 = inlined_call_operand.vmem [shape: f32[2,1,96], index: 3, kind: input, shape index: {}]   ;;  %s8863_s4 = inlined_call_operand.vmem [shape: bf16[2,32,32], index: 4, kind: input, shape index: {}]   ;;  %s8864_s5 = inlined_call_operand.vmem [shape: f32[2,1,32], index: 5, kind: input, shape index: {}]   ;;  %s8865_s6 = inlined_call_operand.vmem [shape: f32[2,1,32], index: 6, kind: input, shape index: {}]   ;;  %s8866_s7 = inlined_call_operand.vmem [shape: f32[2,1,32], index: 7, kind: input, shape index: {}]   ;;  %s8867_s8 = inlined_call_operand.vmem [shape: bf16[2,32,2048], index: 8, kind: input, shape index: {}]   ;;  %s8868_s9 = inlined_call_operand.vmem [shape: f32[2,1,2048], index: 9, kind: input, shape index: {}]   ;;  %s8869_s10 = inlined_call_operand.vmem [shape: bf16[2,2048,32], index: 10, kind: input, shape index: {}]   ;;  %s8870_s11 = inlined_call_operand.vmem [shape: f32[2,1,32], index: 11, kind: input, shape index: {}]   ;;  %s8871_s12 = inlined_call_operand.vmem [shape: f32[2,1,32], index: 12, kind: input, shape index: {}]   ;;  %s8872_s13 = inlined_call_operand.vmem [shape: f32[2,1,32], index: 13, kind: input, shape index: {}]   ;;  %s8873_s14 = inlined_call_operand.vmem [shape: bf16[32,4], index: 14, kind: input, shape index: {}]   ;;  %s8874_s15 = inlined_call_operand.vmem [shape: f32[1,4], index: 15, kind: input, shape index: {}]   ;;  %s8875_s16 = inlined_call_operand.hbm [shape: f32[2,4], index: 16, kind: output, shape index: {}]  }
   0x1   :  { %8877 = sst [smem:[#allocation5_spill]] %s8859_s0 }
   0x2   :  { %v6799_v0 = vld [vmem:[%s8861_s2] sm:$0xff]   ;;  %v7179_v1 = vmov 0.0   ;;  %v6800_v2 = vld [vmem:[%s8861_s2 + $0x8] sm:$0xff]   ;;  %vm7180_vm0 = vmmov 0   ;;  %s8878_s27 = sld [smem:[#allocation5_spill]]  ;;  %vm85_vm1 = vcmask 261120  }
   0x3   :  { %6724 = vmatprep.subr.bf16.mxu0 %v7179_v1  ;;  %6728 = vmatprep.mubr.msk.bf16.mxu0 %vm7180_vm0, %v7179_v1  ;;  %v6801_v6 = vld [vmem:[%s8860_s1] sm:$0xff]  }
   0x4   :  { %6725 = vmatpush3.bf16.msra.mxu0 %v6799_v0  ;;  %6732 = vmatprep.subr.bf16.mxu1 %v6801_v6 }
   0x5   :  { %6726 = vmatprep.subr.bf16.mxu0 %v7179_v1  ;;  %6733 = vmatpush3.bf16.msra.mxu1 %v6801_v6 }
   0x8   :  { %v59_v3 = vld [vmem:[%s8878_s27] sm:$0xff]  ;;  %v60_v4 = vld [vmem:[%s8878_s27 + $0x8] sm:$0xff]  ;;  %6727 = vmatpush3.bf16.msra.mxu0 %v6800_v2 }
   0x9   :  { %v61_v5 = vpack.c.bf16 %v60_v4, %v59_v3  ;;  %6752 = vmatprep.subr.bf16.mxu0 %v7179_v1 }
   0xb   :  { %6729 = vmatmul.mubr.msk.bf16.vlgmr.msra.gmra.mrb[0].mxu0 %vm85_vm1, %v61_v5 }
   0xc   :  { %6756 = vmatprep.mubr.msk.bf16.mxu0 %vm7180_vm0, %v7179_v1 }
   0xd   :  { %21 = vsyncpa [#allocation3], 0  ;;  %v6802_v7 = vld [vmem:[%s8860_s1 + $0x8] sm:$0xff]   ;;  %v5662_v8 = vld [vmem:[%s8862_s3] ss:$0 sm:$0xff]  ;;  %s7181_s21 = smov 64   ;;  %v138_v17 = vlaneseq }
   0xe   :  { %6734 = vmatprep.subr.bf16.mxu1 %v6802_v7  ;;  %s7182_s22 = smov 96   ;;  %v7183_v15 = vmov 1966171168   ;;  %vm974_vm2 = vcmask 1041409   ;;  %vm976_vm3 = vcmask 1042434   ;;  %vm978_vm4 = vcmask 1043459  }
   0xf   :  { %6735 = vmatpush3.bf16.msra.mxu1 %v6802_v7  ;;  %v136_v16 = vunpack.c.l.s4 %v7183_v15  ;;  %v7304_v19 = vshrl.u32 %v138_v17, 7  ;;  %vm980_vm5 = vcmask 1044484   ;;  %vm982_vm6 = vcmask 1045509  }
  0x10   :  { %vm984_vm7 = vcmask 1046534   ;;  %vm986_vm8 = vcmask 1047559   ;;  %vm3462_vm9 = vcmask 254976   ;;  %vm5646_vm10 = vcmask 25600  }
  0x11   :  { %v137_v18 = vunpack.c.0.s8 %v136_v16  ;;  %v7308_v31 = vsub.s32 0, %v7304_v19 }
  0x13   :  { %v140_v21 = vsub.s32 %v137_v18, %v7304_v19 }
  0xde   :  { %v123_v9 = vpop.f32.mrb[0].mxu0 }
  0xdf   :  { %v124_v10 = vadd.f32 %v5662_v8, %v123_v9  ;;  %v6730_v11 = vpop.f32.mrb[1].mxu0 }
  0xe0   :  { %v126_v12 = vpop.f32.mrb[2].mxu0 }
  0xe1   :  { %749 = vrot.lane.b32.xlu1 %v124_v10, %s7181_s21  ;;  %314 = vrot.lane.b32.xlu0 %v124_v10, %s7182_s22  ;;  %v6731_v13 = vpop.f32.mrb[3].mxu0  ;;  %v127_v14 = vadd.f32 %v5662_v8, %v126_v12  ;;  %v130_v20 = vmul.f32 0.5, %v124_v10 }
  0xe3   :  { %v141_v22 = vrot.slane %v130_v20, %v140_v21  ;;  %v134_v23 = vcombine.high %v130_v20, %v130_v20  ;;  %v131_v26 = vmul.f32 0.5, %v127_v14 }
  0xe5   :  { %751 = vrot.lane.b32.xlu1 %v127_v14, %s7181_s21  ;;  %316 = vrot.lane.b32.xlu0 %v127_v14, %s7182_s22  ;;  %v149_v24 = vcombine.high %v141_v22, %v141_v22  ;;  %v148_v25 = vrot.slane %v134_v23, %v140_v21  ;;  %v157_v27 = vrot.slane %v141_v22, %v140_v21 }
  0xe6   :  { %v190_v30 = vrot.slane %v131_v26, %v140_v21  ;;  %v183_v36 = vcombine.high %v131_v26, %v131_v26 }
  0xe7   :  { %v171_v28 = vrot.slane %v149_v24, %v140_v21  ;;  %v150_v29 = vcombine.high %v148_v25, %v148_v25  ;;  %v179_v32 = vcombine.high %v157_v27, %v157_v27  ;;  %v164_v34 = vrot.slane %v148_v25, %v140_v21 }
  0xe8   :  { %v198_v37 = vcombine.high %v190_v30, %v190_v30  ;;  %v235_v38 = vrot.slane %v157_v27, %v7308_v31  ;;  %v197_v42 = vrot.slane %v183_v36, %v140_v21  ;;  %v206_v54 = vrot.slane %v190_v30, %v140_v21 }
  0xe9   :  { %v181_v33 = vcombine.high %v171_v28, %v171_v28  ;;  %v178_v35 = vrot.slane %v150_v29, %v140_v21  ;;  %v239_v39 = vrot.slane %v171_v28, %v7308_v31  ;;  %v243_v40 = vrot.slane %v179_v32, %v7308_v31 }
  0xea   :  { %v251_v44 = vrot.slane %v164_v34, %v7308_v31  ;;  %v180_v50 = vcombine.high %v164_v34, %v164_v34  ;;  %v220_v55 = vrot.slane %v198_v37, %v140_v21  ;;  %v199_v62 = vcombine.high %v197_v42, %v197_v42 }
  0xeb   :  { %v247_v41 = vrot.slane %v181_v33, %v7308_v31  ;;  %v255_v45 = vrot.slane %v178_v35, %v7308_v31  ;;  %v182_v53 = vcombine.high %v178_v35, %v178_v35  ;;  %v267_v63 = vrot.slane %v206_v54, %v7308_v31 }
  0xec   :  { %v259_v60 = vrot.slane %v180_v50, %v7308_v31  ;;  %v271_v0 = vrot.slane %v220_v55, %v7308_v31  ;;  %v228_v6 = vcombine.high %v206_v54, %v206_v54  ;;  %v230_v7 = vcombine.high %v220_v55, %v220_v55 }
  0xed   :  { %v263_v61 = vrot.slane %v182_v53, %v7308_v31  ;;  %v213_v8 = vrot.slane %v197_v42, %v140_v21  ;;  %v227_v9 = vrot.slane %v199_v62, %v140_v21 }
  0xee   :  { %v275_v12 = vrot.slane %v228_v6, %v7308_v31  ;;  %v279_v13 = vrot.slane %v230_v7, %v7308_v31 }
  0xef   :  { %v283_v14 = vrot.slane %v213_v8, %v7308_v31  ;;  %v287_v15 = vrot.slane %v227_v9, %v7308_v31  ;;  %v229_v22 = vcombine.high %v213_v8, %v213_v8  ;;  %v231_v21 = vcombine.high %v227_v9, %v227_v9 }
  0xf1   :  { %v291_v25 = vrot.slane %v229_v22, %v7308_v31  ;;  %v295_v26 = vrot.slane %v231_v21, %v7308_v31 }
 0x153   :  { %v315_v43 = vpop.permute.xlu0 %314 }
 0x154   :  { %v320_v46 = vmul.f32 %v315_v43, %v235_v38  ;;  %v321_v47 = vmul.f32 %v315_v43, %v239_v39  ;;  %v322_v48 = vmul.f32 %v315_v43, %v243_v40  ;;  %v323_v49 = vmul.f32 %v315_v43, %v247_v41 }
 0x155   :  { %v324_v51 = vmul.f32 %v315_v43, %v251_v44  ;;  %v325_v52 = vmul.f32 %v315_v43, %v255_v45  ;;  %v326_v2 = vmul.f32 %v315_v43, %v259_v60  ;;  %v327_v3 = vmul.f32 %v315_v43, %v263_v61 }
 0x156   :  { %v336_v56 = vpack.c.bf16 %v321_v47, %v320_v46  ;;  %v337_v57 = vpack.c.bf16 %v323_v49, %v322_v48 }
 0x157   :  { %v338_v58 = vpack.c.bf16 %v325_v52, %v324_v51  ;;  %v317_v59 = vpop.permute.xlu0 %316  ;;  %v339_v10 = vpack.c.bf16 %v327_v3, %v326_v2 }
 0x158   :  { %6736 = vmatprep.mubr.msk.bf16.mxu1 %vm85_vm1, %v336_v56  ;;  %v328_v4 = vmul.f32 %v317_v59, %v267_v63  ;;  %v329_v5 = vmul.f32 %v317_v59, %v271_v0  ;;  %v330_v16 = vmul.f32 %v317_v59, %v275_v12  ;;  %v331_v17 = vmul.f32 %v317_v59, %v279_v13 }
 0x159   :  { %6737 = vmatmul.mubr.msk.bf16.vlgmr.msra.gmra.mrb[0].mxu1 %vm85_vm1, %v337_v57  ;;  %v332_v18 = vmul.f32 %v317_v59, %v283_v14  ;;  %v333_v20 = vmul.f32 %v317_v59, %v287_v15  ;;  %v334_v27 = vmul.f32 %v317_v59, %v291_v25  ;;  %v335_v28 = vmul.f32 %v317_v59, %v295_v26 }
 0x15a   :  { %6740 = vmatprep.mubr.msk.bf16.mxu1 %vm85_vm1, %v338_v58  ;;  %v340_v11 = vpack.c.bf16 %v329_v5, %v328_v4  ;;  %v341_v23 = vpack.c.bf16 %v331_v17, %v330_v16 }
 0x15b   :  { %v342_v24 = vpack.c.bf16 %v333_v20, %v332_v18  ;;  %v343_v29 = vpack.c.bf16 %v335_v28, %v334_v27 }
 0x161   :  { %6741 = vmatmul.mubr.msk.bf16.gmra.mrb[4].mxu1 %vm85_vm1, %v339_v10 }
 0x162   :  { %6744 = vmatprep.mubr.msk.bf16.mxu1 %vm85_vm1, %v340_v11 }
 0x169   :  { %6745 = vmatmul.mubr.msk.bf16.gmra.mrb[8].mxu1 %vm85_vm1, %v341_v23 }
 0x16a   :  { %6748 = vmatprep.mubr.msk.bf16.mxu1 %vm85_vm1, %v342_v24 }
 0x171   :  { %6749 = vmatmul.mubr.msk.bf16.gmra.mrb[12].mxu1 %vm85_vm1, %v343_v29 }
 0x22c   :  { %v6738_v30 = vpop.f32.mrb[0].mxu1 }
 0x22d   :  { %v491_v32 = vsel %vm85_vm1, %v6738_v30, -inf  ;;  %v414_v33 = vpop.f32.mrb[1].mxu1 }
 0x22e   :  { %v492_v34 = vrot.slane %v491_v32, 4  ;;  %v477_v35 = vsel %vm85_vm1, %v414_v33, -inf  ;;  %v6739_v36 = vpop.f32.mrb[2].mxu1 }
 0x22f   :  { %v478_v37 = vrot.slane %v477_v35, 4  ;;  %v498_v38 = vsel %vm85_vm1, %v6739_v36, -inf  ;;  %v417_v39 = vpop.f32.mrb[3].mxu1 }
 0x230   :  { %v493_v40 = vmax.f32 %v491_v32, %v492_v34  ;;  %v499_v41 = vrot.slane %v498_v38, 4  ;;  %v484_v42 = vsel %vm85_vm1, %v417_v39, -inf }
 0x231   :  { %v479_v43 = vmax.f32 %v477_v35, %v478_v37  ;;  %v485_v44 = vrot.slane %v484_v42, 4 }
 0x232   :  { %v494_v45 = vrot.slane %v493_v40, 2  ;;  %v500_v46 = vmax.f32 %v498_v38, %v499_v41 }
 0x233   :  { %v480_v47 = vrot.slane %v479_v43, 2  ;;  %v486_v48 = vmax.f32 %v484_v42, %v485_v44 }
 0x234   :  { %v495_v49 = vmax.f32 %v493_v40, %v494_v45  ;;  %v501_v50 = vrot.slane %v500_v46, 2  ;;  %v7338_v51 = vpop.f32.mrb[4].mxu1  ;;  %v6804_v40 = vld [vmem:[%s8863_s4 + $0x8] sm:$0xff]  }
 0x235   :  { %v481_v52 = vmax.f32 %v479_v43, %v480_v47  ;;  %v487_v53 = vrot.slane %v486_v48, 2  ;;  %v519_v54 = vsel %vm85_vm1, %v7338_v51, -inf  ;;  %v7342_v55 = vpop.f32.mrb[5].mxu1 }
 0x236   :  { %v496_v56 = vrot.slane %v495_v49, 1  ;;  %v502_v57 = vmax.f32 %v500_v46, %v501_v50  ;;  %v520_v58 = vrot.slane %v519_v54, 4  ;;  %v505_v59 = vsel %vm85_vm1, %v7342_v55, -inf  ;;  %v7346_v60 = vpop.f32.mrb[6].mxu1 }
 0x237   :  { %v482_v61 = vrot.slane %v481_v52, 1  ;;  %v488_v62 = vmax.f32 %v486_v48, %v487_v53  ;;  %v506_v63 = vrot.slane %v505_v59, 4  ;;  %v526_v0 = vsel %vm85_vm1, %v7346_v60, -inf  ;;  %v7350_v2 = vpop.f32.mrb[7].mxu1 }
 0x238   :  { %v497_v3 = vmax.f32 %v495_v49, %v496_v56  ;;  %v503_v4 = vrot.slane %v502_v57, 1  ;;  %v521_v5 = vmax.f32 %v519_v54, %v520_v58  ;;  %v527_v6 = vrot.slane %v526_v0, 4 }
 0x239   :  { %v483_v7 = vmax.f32 %v481_v52, %v482_v61  ;;  %v489_v8 = vrot.slane %v488_v62, 1  ;;  %v507_v9 = vmax.f32 %v505_v59, %v506_v63  ;;  %v512_v10 = vsel %vm85_vm1, %v7350_v2, -inf }
 0x23a   :  { %v591_v11 = vsub.f32 %v6738_v30, %v497_v3  ;;  %v504_v12 = vmax.f32 %v502_v57, %v503_v4  ;;  %v522_v13 = vrot.slane %v521_v5, 2  ;;  %v528_v14 = vmax.f32 %v526_v0, %v527_v6  ;;  %v7382_v57 = vpop.permute.xlu1 %749 }
 0x23b   :  { %v589_v15 = vsub.f32 %v414_v33, %v483_v7  ;;  %v490_v16 = vmax.f32 %v488_v62, %v489_v8  ;;  %v508_v17 = vrot.slane %v507_v9, 2  ;;  %v513_v27 = vrot.slane %v512_v10, 4  ;;  %v6803_v33 = vld [vmem:[%s8863_s4] sm:$0xff]  }
 0x23c   :  { %v609_v18 = vmul.f32 1.442695, %v591_v11  ;;  %v592_v20 = vsub.f32 %v6739_v36, %v504_v12  ;;  %v523_v22 = vmax.f32 %v521_v5, %v522_v13  ;;  %v529_v21 = vrot.slane %v528_v14, 2  ;;  %v7354_v23 = vpop.f32.mrb[8].mxu1  ;;  %6753 = vmatpush3.bf16.msra.mxu0 %v6803_v33 }
 0x23d   :  { %v605_v24 = vmul.f32 1.442695, %v589_v15  ;;  %v590_v25 = vsub.f32 %v417_v39, %v490_v16  ;;  %v509_v26 = vmax.f32 %v507_v9, %v508_v17  ;;  %v7356_v28 = vpop.f32.mrb[9].mxu1  ;;  %v514_v42 = vmax.f32 %v512_v10, %v513_v27  ;;  %6754 = vmatprep.subr.bf16.mxu0 %v7179_v1 }
 0x23e   :  { %7067 = vpow2.f32 %v609_v18  ;;  %v611_v29 = vmul.f32 1.442695, %v592_v20  ;;  %v524_v30 = vrot.slane %v523_v22, 1  ;;  %v530_v32 = vmax.f32 %v528_v14, %v529_v21  ;;  %v7358_v34 = vpop.f32.mrb[10].mxu1 }
 0x23f   :  { %7069 = vpow2.f32 %v605_v24  ;;  %v607_v35 = vmul.f32 1.442695, %v590_v25  ;;  %v510_v36 = vrot.slane %v509_v26, 1  ;;  %v7363_v37 = vpop.f32.mrb[11].mxu1  ;;  %v515_v47 = vrot.slane %v514_v42, 2 }
 0x240   :  { %7071 = vpow2.f32 %v611_v29  ;;  %v525_v38 = vmax.f32 %v523_v22, %v524_v30  ;;  %v531_v39 = vrot.slane %v530_v32, 1  ;;  %6755 = vmatpush3.bf16.msra.mxu0 %v6804_v40  ;;  %v547_v49 = vsel %vm85_vm1, %v7354_v23, -inf }
 0x241   :  { %7073 = vpow2.f32 %v607_v35  ;;  %v511_v41 = vmax.f32 %v509_v26, %v510_v36  ;;  %v516_v59 = vmax.f32 %v514_v42, %v515_v47  ;;  %v548_v61 = vrot.slane %v547_v49, 4 }
 0x242   :  { %v595_v43 = vsub.f32 %v7338_v51, %v525_v38  ;;  %v532_v45 = vmax.f32 %v530_v32, %v531_v39  ;;  %v533_v26 = vsel %vm85_vm1, %v7356_v28, -inf  ;;  %v554_v30 = vsel %vm85_vm1, %v7358_v34, -inf }
 0x243   :  { %v593_v44 = vsub.f32 %v7342_v55, %v511_v41  ;;  %v517_v13 = vrot.slane %v516_v59, 1  ;;  %v549_v17 = vmax.f32 %v547_v49, %v548_v61  ;;  %v534_v40 = vrot.slane %v533_v26, 4 }
 0x244   :  { %v7371_v46 = vpop.f32.mrb[12].mxu1  ;;  %v617_v52 = vmul.f32 1.442695, %v595_v43  ;;  %v596_v51 = vsub.f32 %v7346_v60, %v532_v45  ;;  %v555_v47 = vrot.slane %v554_v30, 4  ;;  %v540_v61 = vsel %vm85_vm1, %v7363_v37, -inf }
 0x245   :  { %v7373_v48 = vpop.f32.mrb[13].mxu1  ;;  %v613_v56 = vmul.f32 1.442695, %v593_v44  ;;  %v518_v29 = vmax.f32 %v516_v59, %v517_v13  ;;  %v550_v39 = vrot.slane %v549_v17, 2  ;;  %v535_v59 = vmax.f32 %v533_v26, %v534_v40 }
 0x246   :  { %v7377_v50 = vpop.f32.mrb[14].mxu1  ;;  %7075 = vpow2.f32 %v617_v52  ;;  %v619_v10 = vmul.f32 1.442695, %v596_v51 }
 0x247   :  { %v7379_v53 = vpop.f32.mrb[15].mxu1  ;;  %7077 = vpow2.f32 %v613_v56  ;;  %v594_v51 = vsub.f32 %v7350_v2, %v518_v29 }
 0x248   :  { %v7068_v54 = vpop.eup %7067  ;;  %7079 = vpow2.f32 %v619_v10 }
 0x249   :  { %v7070_v55 = vpop.eup %7069  ;;  %v651_v58 = vsel %vm85_vm1, %v7068_v54, 0.0  ;;  %v757_v0 = vmul.f32 %v7068_v54, %v7382_v57  ;;  %v615_v10 = vmul.f32 1.442695, %v594_v51 }
 0x24a   :  { %v7072_v62 = vpop.eup %7071  ;;  %v652_v63 = vrot.slane %v651_v58, 4  ;;  %v637_v3 = vsel %vm85_vm1, %v7070_v55, 0.0  ;;  %v755_v4 = vmul.f32 %v7070_v55, %v7382_v57 }
 0x24b   :  { %v7074_v5 = vpop.eup %7073  ;;  %v638_v6 = vrot.slane %v637_v3, 4  ;;  %v658_v7 = vsel %vm85_vm1, %v7072_v62, 0.0  ;;  %v758_v60 = vmul.f32 %v7072_v62, %v7382_v57  ;;  %v785_v15 = vsel %vm85_vm1, %v757_v0, 0.0 }
 0x24c   :  { %v653_v8 = vadd.f32 %v652_v63, %v651_v58  ;;  %v659_v9 = vrot.slane %v658_v7, 4  ;;  %v644_v12 = vsel %vm85_vm1, %v7074_v5, 0.0  ;;  %v771_v16 = vsel %vm85_vm1, %v755_v4, 0.0 }
 0x24d   :  { %v639_v11 = vadd.f32 %v638_v6, %v637_v3  ;;  %v792_v22 = vsel %vm85_vm1, %v758_v60, 0.0  ;;  %v756_v21 = vmul.f32 %v7074_v5, %v7382_v57  ;;  %v645_v25 = vrot.slane %v644_v12, 4 }
 0x24e   :  { %v654_v14 = vrot.slane %v653_v8, 2  ;;  %v660_v20 = vadd.f32 %v659_v9, %v658_v7  ;;  %v786_v27 = vrot.slane %v785_v15, 4  ;;  %v772_v33 = vrot.slane %v771_v16, 4 }
 0x24f   :  { %v640_v18 = vrot.slane %v639_v11, 2  ;;  %v793_v35 = vrot.slane %v792_v22, 4  ;;  %v778_v36 = vsel %vm85_vm1, %v756_v21, 0.0  ;;  %v646_v42 = vadd.f32 %v645_v25, %v644_v12 }
 0x250   :  { %v655_v24 = vadd.f32 %v654_v14, %v653_v8  ;;  %v661_v38 = vrot.slane %v660_v20, 2  ;;  %v7076_v43 = vpop.eup %7075  ;;  %v787_v44 = vadd.f32 %v786_v27, %v785_v15  ;;  %v779_v45 = vrot.slane %v778_v36, 4 }
 0x251   :  { %v641_v32 = vadd.f32 %v640_v18, %v639_v11  ;;  %v7078_v49 = vpop.eup %7077  ;;  %v773_v54 = vadd.f32 %v772_v33, %v771_v16  ;;  %v794_v56 = vadd.f32 %v793_v35, %v792_v22  ;;  %v551_v58 = vmax.f32 %v549_v17, %v550_v39 }
 0x252   :  { %v656_v41 = vrot.slane %v655_v24, 1  ;;  %v662_v55 = vadd.f32 %v661_v38, %v660_v20  ;;  %v647_v63 = vrot.slane %v646_v42, 2  ;;  %v679_v0 = vsel %vm85_vm1, %v7076_v43, 0.0  ;;  %v7080_v60 = vpop.eup %7079 }
 0x253   :  { %v642_v52 = vrot.slane %v641_v32, 1  ;;  %v761_v3 = vmul.f32 %v7076_v43, %v7382_v57  ;;  %v788_v4 = vrot.slane %v787_v44, 2  ;;  %v780_v5 = vadd.f32 %v779_v45, %v778_v36 }
 0x254   :  { %v657_v62 = vadd.f32 %v656_v41, %v655_v24  ;;  %v680_v6 = vrot.slane %v679_v0, 4  ;;  %v665_v7 = vsel %vm85_vm1, %v7078_v49, 0.0  ;;  %v774_v2 = vrot.slane %v773_v54, 2 }
 0x255   :  { %v643_v8 = vadd.f32 %v642_v52, %v641_v32  ;;  %v795_v9 = vrot.slane %v794_v56, 2  ;;  %v663_v11 = vrot.slane %v662_v55, 1  ;;  %v813_v12 = vsel %vm85_vm1, %v761_v3, 0.0 }
 0x256   :  { %v666_v13 = vrot.slane %v665_v7, 4  ;;  %v759_v14 = vmul.f32 %v7078_v49, %v7382_v57  ;;  %7081 = vrcp.f32 %v657_v62  ;;  %v648_v15 = vadd.f32 %v647_v63, %v646_v42 }
 0x257   :  { %v552_v16 = vrot.slane %v551_v58, 1  ;;  %v536_v17 = vrot.slane %v535_v59, 2  ;;  %v789_v18 = vadd.f32 %v788_v4, %v787_v44  ;;  %v781_v20 = vrot.slane %v780_v5, 2 }
 0x258   :  { %v681_v22 = vadd.f32 %v680_v6, %v679_v0  ;;  %v686_v21 = vsel %vm85_vm1, %v7080_v60, 0.0  ;;  %v775_v24 = vadd.f32 %v774_v2, %v773_v54  ;;  %7083 = vrcp.f32 %v643_v8 }
 0x259   :  { %v796_v25 = vadd.f32 %v795_v9, %v794_v56  ;;  %v814_v26 = vrot.slane %v813_v12, 4  ;;  %v664_v27 = vadd.f32 %v663_v11, %v662_v55  ;;  %v667_v29 = vadd.f32 %v666_v13, %v665_v7 }
 0x25a   :  { %v799_v32 = vsel %vm85_vm1, %v759_v14, 0.0  ;;  %7085 = vpow2.f32 %v615_v10  ;;  %v649_v33 = vrot.slane %v648_v15, 1  ;;  %v687_v35 = vrot.slane %v686_v21, 4 }
 0x25b   :  { %v537_v36 = vmax.f32 %v535_v59, %v536_v17  ;;  %v556_v38 = vmax.f32 %v554_v30, %v555_v47  ;;  %v790_v39 = vrot.slane %v789_v18, 1  ;;  %v782_v40 = vadd.f32 %v781_v20, %v780_v5 }
 0x25c   :  { %v682_v41 = vrot.slane %v681_v22, 2  ;;  %v541_v42 = vrot.slane %v540_v61, 4  ;;  %v776_v43 = vrot.slane %v775_v24, 1  ;;  %v815_v44 = vadd.f32 %v814_v26, %v813_v12 }
 0x25d   :  { %v800_v45 = vrot.slane %v799_v32, 4  ;;  %v762_v49 = vmul.f32 %v7080_v60, %v7382_v57  ;;  %v797_v52 = vrot.slane %v796_v25, 1  ;;  %7087 = vrcp.f32 %v664_v27 }
 0x25e   :  { %v668_v54 = vrot.slane %v667_v29, 2  ;;  %v553_v56 = vmax.f32 %v551_v58, %v552_v16  ;;  %v650_v51 = vadd.f32 %v649_v33, %v648_v15  ;;  %v688_v55 = vadd.f32 %v687_v35, %v686_v21 }
 0x25f   :  { %v538_v62 = vrot.slane %v537_v36, 1  ;;  %v557_v63 = vrot.slane %v556_v38, 2  ;;  %v783_v0 = vrot.slane %v782_v40, 1  ;;  %v683_v59 = vadd.f32 %v682_v41, %v681_v22 }
 0x260   :  { %v542_v30 = vmax.f32 %v540_v61, %v541_v42  ;;  %v575_v47 = vsel %vm85_vm1, %v7371_v46, -inf  ;;  %v7082_v3 = vpop.eup %7081  ;;  %v791_v4 = vadd.f32 %v790_v39, %v789_v18  ;;  %v816_v5 = vrot.slane %v815_v44, 2 }
 0x261   :  { %v801_v6 = vadd.f32 %v800_v45, %v799_v32  ;;  %v820_v7 = vsel %vm85_vm1, %v762_v49, 0.0  ;;  %v777_v60 = vadd.f32 %v776_v43, %v775_v24  ;;  %v798_v8 = vadd.f32 %v797_v52, %v796_v25 }
 0x262   :  { %v669_v2 = vadd.f32 %v668_v54, %v667_v29  ;;  %v599_v58 = vsub.f32 %v7354_v23, %v553_v56  ;;  %v7084_v9 = vpop.eup %7083  ;;  %7089 = vrcp.f32 %v650_v51  ;;  %v689_v10 = vrot.slane %v688_v55, 2 }
 0x263   :  { %v539_v11 = vmax.f32 %v537_v36, %v538_v62  ;;  %v558_v12 = vmax.f32 %v556_v38, %v557_v63  ;;  %v901_v13 = vmul.f32 %v7082_v3, %v791_v4  ;;  %v7415_v14 = vadd.f32 %v783_v0, %v782_v40 }
 0x264   :  { %v7086_v61 = vpop.eup %7085  ;;  %v684_v15 = vrot.slane %v683_v59, 1  ;;  %v821_v16 = vrot.slane %v820_v7, 4  ;;  %v817_v17 = vadd.f32 %v816_v5, %v815_v44  ;;  %v802_v18 = vrot.slane %v801_v6, 2 }
 0x265   :  { %v625_v20 = vmul.f32 1.442695, %v599_v58  ;;  %v597_v22 = vsub.f32 %v7356_v28, %v539_v11  ;;  %v7418_v21 = vmul.f32 %v7084_v9, %v777_v60  ;;  %v670_v24 = vrot.slane %v669_v2, 1 }
 0x266   :  { %v559_v23 = vrot.slane %v558_v12, 1  ;;  %v543_v25 = vrot.slane %v542_v30, 2  ;;  %v7420_v26 = vadd.f32 %v689_v10, %v688_v55  ;;  %v672_v27 = vsel %vm85_vm1, %v7086_v61, 0.0 }
 0x267   :  { %7091 = vpow2.f32 %v625_v20  ;;  %v621_v29 = vmul.f32 1.442695, %v597_v22  ;;  %v7088_v32 = vpop.eup %7087  ;;  %v576_v36 = vrot.slane %v575_v47, 4  ;;  %v561_v38 = vsel %vm85_vm1, %v7373_v48, -inf }
 0x268   :  { %v560_v33 = vmax.f32 %v558_v12, %v559_v23  ;;  %v544_v35 = vmax.f32 %v542_v30, %v543_v25  ;;  %v917_v39 = vpack.c.bf16 %v901_v13, %v901_v13  ;;  %v7425_v28 = vadd.f32 %v821_v16, %v820_v7 }
 0x269   :  { %7093 = vpow2.f32 %v621_v29  ;;  %v562_v40 = vrot.slane %v561_v38, 4  ;;  %v577_v43 = vmax.f32 %v575_v47, %v576_v36  ;;  %v582_v44 = vsel %vm85_vm1, %v7377_v50, -inf }
 0x26a   :  { %v600_v41 = vsub.f32 %v7358_v34, %v560_v33  ;;  %v545_v42 = vrot.slane %v544_v35, 1  ;;  %v7430_v45 = vmul.f32 %v7088_v32, %v798_v8  ;;  %v673_v49 = vrot.slane %v672_v27, 4 }
 0x26b   :  { %v563_v52 = vmax.f32 %v561_v38, %v562_v40  ;;  %v583_v54 = vrot.slane %v582_v44, 4  ;;  %v685_v56 = vadd.f32 %v684_v15, %v683_v59  ;;  %v578_v62 = vrot.slane %v577_v43, 2 }
 0x26c   :  { %v627_v51 = vmul.f32 1.442695, %v600_v41  ;;  %v546_v55 = vmax.f32 %v544_v35, %v545_v42  ;;  %v7090_v63 = vpop.eup %7089  ;;  %v915_v0 = vpack.c.bf16 %v7418_v21, %v7418_v21  ;;  %v818_v30 = vrot.slane %v817_v17, 1 }
 0x26d   :  { %v564_v34 = vrot.slane %v563_v52, 2  ;;  %v584_v3 = vmax.f32 %v582_v44, %v583_v54  ;;  %v671_v47 = vadd.f32 %v670_v24, %v669_v2  ;;  %v579_v5 = vmax.f32 %v577_v43, %v578_v62  ;;  %v7446_v24 = vpop.permute.xlu1 %751 }
 0x26e   :  { %7095 = vpow2.f32 %v627_v51  ;;  %v598_v4 = vsub.f32 %v7363_v37, %v546_v55  ;;  %v7435_v7 = vadd.f32 %v802_v18, %v801_v6  ;;  %v674_v60 = vadd.f32 %v673_v49, %v672_v27 }
 0x26f   :  { %v565_v8 = vmax.f32 %v563_v52, %v564_v34  ;;  %v585_v59 = vrot.slane %v584_v3, 2  ;;  %v691_v58 = vrot.slane %v7420_v26, 1  ;;  %v760_v9 = vmul.f32 %v7086_v61, %v7382_v57 }
 0x270   :  { %v623_v10 = vmul.f32 1.442695, %v598_v4  ;;  %v580_v11 = vrot.slane %v579_v5, 1  ;;  %v7439_v13 = vunpack.c.l.b16 %v917_v39  ;;  %7097 = vrcp.f32 %v685_v56 }
 0x271   :  { %v7092_v12 = vpop.eup %7091  ;;  %v566_v2 = vrot.slane %v565_v8, 1  ;;  %v586_v15 = vmax.f32 %v584_v3, %v585_v59  ;;  %v918_v37 = vpack.c.bf16 %v7430_v45, %v7430_v45  ;;  %v7443_v6 = vadd.f32 %v818_v30, %v817_v17 }
 0x272   :  { %v707_v16 = vsel %vm85_vm1, %v7092_v12, 0.0  ;;  %7099 = vpow2.f32 %v623_v10  ;;  %v675_v20 = vrot.slane %v674_v60, 2  ;;  %v7449_v23 = vmul.f32 %v7090_v63, %v7415_v14 }
 0x273   :  { %v7094_v18 = vpop.eup %7093  ;;  %v708_v22 = vrot.slane %v707_v16, 4  ;;  %v567_v57 = vmax.f32 %v565_v8, %v566_v2  ;;  %v587_v61 = vrot.slane %v586_v15, 1  ;;  %v806_v25 = vsel %vm85_vm1, %v760_v9, 0.0 }
 0x274   :  { %v693_v27 = vsel %vm85_vm1, %v7094_v18, 0.0  ;;  %v581_v29 = vmax.f32 %v579_v5, %v580_v11  ;;  %v763_v33 = vmul.f32 %v7094_v18, %v7446_v24  ;;  %v804_v36 = vrot.slane %v7435_v7, 1 }
 0x275   :  { %v709_v17 = vadd.f32 %v708_v22, %v707_v16  ;;  %v694_v32 = vrot.slane %v693_v27, 4  ;;  %v601_v35 = vsub.f32 %v7373_v48, %v567_v57  ;;  %7101 = vrcp.f32 %v671_v47 }
 0x276   :  { %v765_v38 = vmul.f32 %v7092_v12, %v7446_v24  ;;  %v588_v39 = vmax.f32 %v586_v15, %v587_v61  ;;  %v692_v14 = vadd.f32 %v691_v58, %v7420_v26  ;;  %v676_v40 = vadd.f32 %v675_v20, %v674_v60 }
 0x277   :  { %v710_v41 = vrot.slane %v709_v17, 2  ;;  %v695_v42 = vadd.f32 %v694_v32, %v693_v27  ;;  %v823_v44 = vrot.slane %v7425_v28, 2  ;;  %v807_v49 = vrot.slane %v806_v25, 4 }
 0x278   :  { %v7096_v43 = vpop.eup %7095  ;;  %v629_v52 = vmul.f32 1.442695, %v601_v35  ;;  %v568_v54 = vsel %vm85_vm1, %v7379_v53, -inf  ;;  %v827_v56 = vsel %vm85_vm1, %v763_v33, 0.0  ;;  %v603_v51 = vsub.f32 %v7371_v46, %v581_v29 }
 0x279   :  { %v696_v48 = vrot.slane %v695_v42, 2  ;;  %v604_v55 = vsub.f32 %v7377_v50, %v588_v39  ;;  %v841_v26 = vsel %vm85_vm1, %v765_v38, 0.0  ;;  %v714_v62 = vsel %vm85_vm1, %v7096_v43, 0.0 }
 0x27a   :  { %v766_v63 = vmul.f32 %v7096_v43, %v7446_v24  ;;  %7103 = vpow2.f32 %v629_v52  ;;  %v7467_v30 = vpop.eup %7097  ;;  %v677_v34 = vrot.slane %v676_v40, 1  ;;  %v711_v3 = vadd.f32 %v710_v41, %v709_v17 }
 0x27b   :  { %v697_v47 = vadd.f32 %v696_v48, %v695_v42  ;;  %v569_v4 = vrot.slane %v568_v54, 4  ;;  %7105 = vrcp.f32 %v692_v14  ;;  %v828_v60 = vrot.slane %v827_v56, 4 }
 0x27c   :  { %v7100_v5 = vpop.eup %7099  ;;  %v715_v8 = vrot.slane %v714_v62, 4  ;;  %v848_v46 = vsel %vm85_vm1, %v766_v63, 0.0  ;;  %v808_v50 = vadd.f32 %v807_v49, %v806_v25  ;;  %v842_v59 = vrot.slane %v841_v26, 4 }
 0x27d   :  { %v633_v58 = vmul.f32 1.442695, %v603_v51  ;;  %v635_v9 = vmul.f32 1.442695, %v604_v55  ;;  %v698_v10 = vrot.slane %v697_v47, 1  ;;  %v700_v12 = vsel %vm85_vm1, %v7100_v5, 0.0 }
 0x27e   :  { %v716_v11 = vadd.f32 %v715_v8, %v714_v62  ;;  %v764_v2 = vmul.f32 %v7100_v5, %v7446_v24  ;;  %v678_v15 = vadd.f32 %v677_v34, %v676_v40  ;;  %v712_v16 = vrot.slane %v711_v3, 1 }
 0x27f   :  { %v849_v18 = vrot.slane %v848_v46, 4  ;;  %v570_v20 = vmax.f32 %v568_v54, %v569_v4  ;;  %v7102_v22 = vpop.eup %7101  ;;  %v829_v57 = vadd.f32 %v828_v60, %v827_v56  ;;  %v701_v27 = vrot.slane %v700_v12, 4 }
 0x280   :  { %v717_v61 = vrot.slane %v716_v11, 2  ;;  %v834_v29 = vsel %vm85_vm1, %v764_v2, 0.0  ;;  %v809_v25 = vrot.slane %v808_v50, 2  ;;  %v843_v17 = vadd.f32 %v842_v59, %v841_v26 }
 0x281   :  { %v835_v32 = vrot.slane %v834_v29, 4  ;;  %7107 = vpow2.f32 %v633_v58  ;;  %v699_v33 = vadd.f32 %v698_v10, %v697_v47  ;;  %v702_v38 = vadd.f32 %v701_v27, %v700_v12 }
 0x282   :  { %v718_v35 = vadd.f32 %v717_v61, %v716_v11  ;;  %7109 = vpow2.f32 %v635_v9  ;;  %v805_v39 = vadd.f32 %v804_v36, %v7435_v7  ;;  %v713_v14 = vadd.f32 %v712_v16, %v711_v3 }
 0x283   :  { %7111 = vrcp.f32 %v678_v15  ;;  %v850_v40 = vadd.f32 %v849_v18, %v848_v46  ;;  %v830_v42 = vrot.slane %v829_v57, 2  ;;  %v703_v49 = vrot.slane %v702_v38, 2 }
 0x284   :  { %v7104_v41 = vpop.eup %7103  ;;  %v719_v43 = vrot.slane %v718_v35, 1  ;;  %v571_v52 = vrot.slane %v570_v20, 2  ;;  %v810_v54 = vadd.f32 %v809_v25, %v808_v50  ;;  %v836_v48 = vadd.f32 %v835_v32, %v834_v29 }
 0x285   :  { %v721_v56 = vsel %vm85_vm1, %v7104_v41, 0.0  ;;  %v767_v51 = vmul.f32 %v7104_v41, %v7446_v24  ;;  %v7476_v55 = vpop.eup %7105  ;;  %v844_v26 = vrot.slane %v843_v17, 2  ;;  %7113 = vrcp.f32 %v699_v33 }
 0x286   :  { %v720_v62 = vadd.f32 %v719_v43, %v718_v35  ;;  %v704_v7 = vadd.f32 %v703_v49, %v702_v38  ;;  %7115 = vrcp.f32 %v713_v14  ;;  %v851_v36 = vrot.slane %v850_v40, 2 }
 0x287   :  { %v722_v63 = vrot.slane %v721_v56, 4  ;;  %v855_v34 = vsel %vm85_vm1, %v767_v51, 0.0  ;;  %v831_v3 = vadd.f32 %v830_v42, %v829_v57  ;;  %v572_v4 = vmax.f32 %v570_v20, %v571_v52 }
 0x288   :  { %7117 = vrcp.f32 %v720_v62  ;;  %v705_v47 = vrot.slane %v704_v7, 1  ;;  %v824_v5 = vadd.f32 %v823_v44, %v7425_v28  ;;  %v837_v60 = vrot.slane %v836_v48, 2 }
 0x289   :  { %v723_v8 = vadd.f32 %v722_v63, %v721_v56  ;;  %v856_v46 = vrot.slane %v855_v34, 4  ;;  %v916_v50 = vpack.c.bf16 %v7449_v23, %v7449_v23  ;;  %v811_v59 = vrot.slane %v810_v54, 1 }
 0x28a   :  { %v845_v58 = vadd.f32 %v844_v26, %v843_v17  ;;  %v706_v9 = vadd.f32 %v705_v47, %v704_v7  ;;  %v958_v11 = vunpack.c.l.b16 %v915_v0  ;;  %v903_v12 = vmul.f32 %v7102_v22, %v805_v39 }
 0x28b   :  { %v7484_v10 = vpop.eup %7107  ;;  %v852_v2 = vadd.f32 %v851_v36, %v850_v40  ;;  %v724_v15 = vrot.slane %v723_v8, 2  ;;  %v832_v44 = vrot.slane %v831_v3, 1  ;;  %v857_v16 = vadd.f32 %v856_v46, %v855_v34 }
 0x28c   :  { %v7489_v28 = vpop.eup %7109  ;;  %7119 = vrcp.f32 %v706_v9  ;;  %v573_v18 = vrot.slane %v572_v4, 1  ;;  %v961_v20 = vunpack.c.l.b16 %v918_v37  ;;  %v825_v57 = vrot.slane %v824_v5, 1 }
 0x28d   :  { %v7112_v23 = vpop.eup %7111  ;;  %v838_v61 = vadd.f32 %v837_v60, %v836_v48  ;;  %v725_v27 = vadd.f32 %v724_v15, %v723_v8  ;;  %v959_v21 = vunpack.c.l.b16 %v916_v50  ;;  %v812_v0 = vadd.f32 %v811_v59, %v810_v54 }
 0x28e   :  { %v846_v22 = vrot.slane %v845_v58, 1  ;;  %v735_v29 = vsel %vm85_vm1, %v7484_v10, 0.0  ;;  %v919_v25 = vpack.c.bf16 %v903_v12, %v903_v12  ;;  %v853_v17 = vrot.slane %v852_v2, 1 }
 0x28f   :  { %v726_v32 = vrot.slane %v725_v27, 1  ;;  %v742_v33 = vsel %vm85_vm1, %v7489_v28, 0.0  ;;  %v7114_v45 = vpop.eup %7113  ;;  %v904_v37 = vmul.f32 %v7112_v23, %v812_v0  ;;  %v833_v35 = vadd.f32 %v832_v44, %v831_v3 }
 0x290   :  { %v858_v38 = vrot.slane %v857_v16, 2  ;;  %v574_v39 = vmax.f32 %v572_v4, %v573_v18  ;;  %v7116_v14 = vpop.eup %7115  ;;  %v839_v40 = vrot.slane %v838_v61, 1  ;;  %v736_v41 = vrot.slane %v735_v29, 4 }
 0x291   :  { %v727_v42 = vadd.f32 %v726_v32, %v725_v27  ;;  %v826_v43 = vadd.f32 %v825_v57, %v824_v5  ;;  %v847_v52 = vadd.f32 %v846_v22, %v845_v58  ;;  %v743_v54 = vrot.slane %v742_v33, 4 }
 0x292   :  { %v7118_v49 = vpop.eup %7117  ;;  %v602_v48 = vsub.f32 %v7379_v53, %v574_v39  ;;  %v905_v56 = vmul.f32 %v7467_v30, %v7443_v6  ;;  %v907_v51 = vmul.f32 %v7114_v45, %v833_v35  ;;  %v854_v26 = vadd.f32 %v853_v17, %v852_v2 }
 0x293   :  { %7121 = vrcp.f32 %v727_v42  ;;  %v906_v62 = vmul.f32 %v7476_v55, %v826_v43  ;;  %v909_v7 = vmul.f32 %v7116_v14, %v847_v52  ;;  %v859_v36 = vadd.f32 %v858_v38, %v857_v16 }
 0x294   :  { %v631_v63 = vmul.f32 1.442695, %v602_v48  ;;  %v920_v34 = vpack.c.bf16 %v904_v37, %v904_v37  ;;  %v910_v3 = vmul.f32 %v7118_v49, %v854_v26  ;;  %v840_v47 = vadd.f32 %v839_v40, %v838_v61 }
 0x295   :  { %v737_v4 = vadd.f32 %v736_v41, %v735_v29  ;;  %v975_v5 = vsel %vm974_vm2, %v959_v21, %v958_v11  ;;  %v962_v53 = vunpack.c.l.b16 %v919_v25  ;;  %v744_v8 = vadd.f32 %v743_v54, %v742_v33 }
 0x296   :  { %v7120_v60 = vpop.eup %7119  ;;  %7123 = vpow2.f32 %v631_v63  ;;  %v921_v6 = vpack.c.bf16 %v905_v56, %v905_v56  ;;  %v923_v30 = vpack.c.bf16 %v907_v51, %v907_v51  ;;  %v922_v50 = vpack.c.bf16 %v906_v62, %v906_v62 }
 0x297   :  { %v908_v46 = vmul.f32 %v7120_v60, %v840_v47  ;;  %v963_v59 = vunpack.c.l.b16 %v920_v34  ;;  %v925_v58 = vpack.c.bf16 %v909_v7, %v909_v7  ;;  %v769_v55 = vmul.f32 %v7484_v10, %v7446_v24 }
 0x298   :  { %v860_v9 = vrot.slane %v859_v36, 1  ;;  %v977_v12 = vsel %vm976_vm3, %v7439_v13, %v975_v5  ;;  %v926_v2 = vpack.c.bf16 %v910_v3, %v910_v3  ;;  %v738_v11 = vrot.slane %v737_v4, 2 }
 0x299   :  { %v924_v15 = vpack.c.bf16 %v908_v46, %v908_v46  ;;  %v979_v44 = vsel %vm978_vm4, %v961_v20, %v977_v12  ;;  %v745_v16 = vrot.slane %v744_v8, 2  ;;  %v770_v18 = vmul.f32 %v7489_v28, %v7446_v24 }
 0x29a   :  { %v964_v23 = vunpack.c.l.b16 %v921_v6  ;;  %v981_v57 = vsel %vm980_vm5, %v962_v53, %v979_v44  ;;  %v966_v61 = vunpack.c.l.b16 %v923_v30  ;;  %v965_v21 = vunpack.c.l.b16 %v922_v50 }
 0x29b   :  { %v967_v27 = vunpack.c.l.b16 %v924_v15  ;;  %v983_v10 = vsel %vm982_vm6, %v963_v59, %v981_v57  ;;  %v968_v0 = vunpack.c.l.b16 %v925_v58  ;;  %v869_v13 = vsel %vm85_vm1, %v769_v55, 0.0 }
 0x29c   :  { %v861_v22 = vadd.f32 %v860_v9, %v859_v36  ;;  %v985_v29 = vsel %vm984_vm7, %v964_v23, %v983_v10  ;;  %v969_v20 = vunpack.c.l.b16 %v926_v2  ;;  %v739_v17 = vadd.f32 %v738_v11, %v737_v4 }
 0x29d   :  { %v7122_v25 = vpop.eup %7121  ;;  %v987_v32 = vsel %vm986_vm8, %v965_v21, %v985_v29  ;;  %v988_v28 = vsel %vm974_vm2, %v967_v27, %v966_v61  ;;  %v746_v45 = vadd.f32 %v745_v16, %v744_v8  ;;  %v876_v37 = vsel %vm85_vm1, %v770_v18, 0.0 }
 0x29e   :  { %v911_v33 = vmul.f32 %v7122_v25, %v861_v22  ;;  %v989_v35 = vsel %vm976_vm3, %v968_v0, %v988_v28  ;;  %v870_v14 = vrot.slane %v869_v13, 4  ;;  %v740_v41 = vrot.slane %v739_v17, 1  ;;  %v5676_v25 = vld [vmem:[%s8864_s5] ss:$0 sm:$0xff] }
 0x29f   :  { %v990_v38 = vsel %vm978_vm4, %v969_v20, %v989_v35  ;;  %v877_v42 = vrot.slane %v876_v37, 4  ;;  %v747_v54 = vrot.slane %v746_v45, 1  ;;  %v7151_v35 = vld [vmem:[%s8878_s27] sm:$0xff] }
 0x2a0   :  { %v7124_v39 = vpop.eup %7123  ;;  %v927_v40 = vpack.c.bf16 %v911_v33, %v911_v33  ;;  %v871_v51 = vadd.f32 %v870_v14, %v869_v13  ;;  %v741_v36 = vadd.f32 %v740_v41, %v739_v17 }
 0x2a1   :  { %v728_v43 = vsel %vm85_vm1, %v7124_v39, 0.0  ;;  %v768_v49 = vmul.f32 %v7124_v39, %v7446_v24  ;;  %v878_v63 = vadd.f32 %v877_v42, %v876_v37  ;;  %v748_v34 = vadd.f32 %v747_v54, %v746_v45 }
 0x2a2   :  { %v970_v52 = vunpack.c.l.b16 %v927_v40  ;;  %v729_v48 = vrot.slane %v728_v43, 4  ;;  %v872_v4 = vrot.slane %v871_v51, 2  ;;  %7125 = vrcp.f32 %v741_v36  ;;  %v1103_v36 = vld [vmem:[%s8867_s8 + $0x18] sm:$0xff] }
 0x2a3   :  { %v862_v56 = vsel %vm85_vm1, %v768_v49, 0.0  ;;  %v879_v60 = vrot.slane %v878_v63, 2  ;;  %7127 = vrcp.f32 %v748_v34  ;;  %v1111_v34 = vld [vmem:[%s8867_s8 + $0x58] sm:$0xff] }
 0x2a4   :  { %v730_v26 = vadd.f32 %v729_v48, %v728_v43  ;;  %v863_v62 = vrot.slane %v862_v56, 4  ;;  %v991_v7 = vsel %vm980_vm5, %v970_v52, %v990_v38  ;;  %v873_v8 = vadd.f32 %v872_v4, %v871_v51 }
 0x2a5   :  { %v880_v30 = vadd.f32 %v879_v60, %v878_v63  ;;  %v5689_v4 = vcombine.high %v1103_v36, %v1111_v34  ;;  %v1124_v60 = vld [vmem:[%s8867_s8 + $0xc0] sm:$0xff] }
 0x2a6   :  { %v731_v3 = vrot.slane %v730_v26, 2  ;;  %v864_v47 = vadd.f32 %v863_v62, %v862_v56  ;;  %v874_v50 = vrot.slane %v873_v8, 1  ;;  %v1100_v62 = vld [vmem:[%s8867_s8] sm:$0xff] }
 0x2a7   :  { %v881_v59 = vrot.slane %v880_v30, 1  ;;  %1508 = vmatprep.subr.bf16.mxu1 %v5689_v4 }
 0x2a8   :  { %v732_v5 = vadd.f32 %v731_v3, %v730_v26  ;;  %v865_v53 = vrot.slane %v864_v47, 2  ;;  %v875_v12 = vadd.f32 %v874_v50, %v873_v8  ;;  %v1127_v8 = vld [vmem:[%s8867_s8 + $0xd8] sm:$0xff]  ;;  %v1101_v50 = vld [vmem:[%s8867_s8 + $0x8] sm:$0xff] }
 0x2a9   :  { %v882_v2 = vadd.f32 %v881_v59, %v880_v30  ;;  %v1109_v59 = vld [vmem:[%s8867_s8 + $0x48] sm:$0xff] }
 0x2aa   :  { %v733_v24 = vrot.slane %v732_v5, 1  ;;  %v866_v46 = vadd.f32 %v865_v53, %v864_v47  ;;  %v5688_v47 = vcombine.low %v1103_v36, %v1111_v34  ;;  %v1112_v34 = vld [vmem:[%s8867_s8 + $0x60] sm:$0xff] }
 0x2ac   :  { %v734_v6 = vadd.f32 %v733_v24, %v732_v5  ;;  %v7126_v58 = vpop.eup %7125  ;;  %v867_v55 = vrot.slane %v866_v46, 1  ;;  %v1116_v5 = vld [vmem:[%s8867_s8 + $0x80] sm:$0xff]  ;;  %v1119_v24 = vld [vmem:[%s8867_s8 + $0x98] sm:$0xff]  ;;  %1509 = vmatpush1.bf16.msra.mxu1 %v5688_v47 }
 0x2ad   :  { %v7128_v9 = vpop.eup %7127  ;;  %v913_v15 = vmul.f32 %v7126_v58, %v875_v12  ;;  %v5699_v53 = vcombine.high %v1116_v5, %v1124_v60  ;;  %v5704_v30 = vcombine.low %v1119_v24, %v1127_v8  ;;  %v1105_v58 = vld [vmem:[%s8867_s8 + $0x28] sm:$0xff] }
 0x2ae   :  { %7129 = vrcp.f32 %v734_v6  ;;  %v868_v11 = vadd.f32 %v867_v55, %v866_v46  ;;  %v914_v44 = vmul.f32 %v7128_v9, %v882_v2  ;;  %v5698_v6 = vcombine.low %v1116_v5, %v1124_v60  ;;  %v1113_v12 = vld [vmem:[%s8867_s8 + $0x68] sm:$0xff]  ;;  %v6810_v5 = vld [vmem:[%s8869_s10 + $0xc0] sm:$0xff]  }
 0x2af   :  { %v929_v23 = vpack.c.bf16 %v913_v15, %v913_v15  ;;  %v5705_v46 = vcombine.high %v1119_v24, %v1127_v8  ;;  %v5684_v55 = vcombine.low %v1101_v50, %v1109_v59  ;;  %v5685_v9 = vcombine.high %v1101_v50, %v1109_v59  ;;  %v1120_v60 = vld [vmem:[%s8867_s8 + $0xa0] sm:$0xff]  ;;  %v6814_v50 = vld [vmem:[%s8869_s10 + $0xc8] sm:$0xff]  }
 0x2b0   :  { %v930_v61 = vpack.c.bf16 %v914_v44, %v914_v44  ;;  %v7184_v2 = vmov 0   ;;  %v5692_v15 = vcombine.low %v1105_v58, %v1113_v12  ;;  %v1128_v24 = vld [vmem:[%s8867_s8 + $0xe0] sm:$0xff] }
 0x2b1   :  { %v972_v21 = vunpack.c.l.b16 %v929_v23  ;;  %1510 = vmatprep.subr.bf16.mxu1 %v5705_v46  ;;  %1540 = vmatprep.mubr.bf16.mxu1 %v7184_v2  ;;  %v5707_v8 = vcombine.high %v1120_v60, %v1128_v24  ;;  %v1114_v46 = vld [vmem:[%s8867_s8 + $0x70] sm:$0xff]  ;;  %v5706_v59 = vcombine.low %v1120_v60, %v1128_v24  ;;  %v7807_v60 = vsub.s32 3, %v7304_v19 }
 0x2b2   :  { %v973_v10 = vunpack.c.l.b16 %v930_v61  ;;  %1511 = vmatpush1.bf16.msra.mxu1 %v5704_v30  ;;  %v1106_v30 = vld [vmem:[%s8867_s8 + $0x30] sm:$0xff] }
 0x2b8   :  { %v7130_v16 = vpop.eup %7129 }
 0x2b9   :  { %v912_v18 = vmul.f32 %v7130_v16, %v868_v11  ;;  %v5693_v11 = vcombine.high %v1105_v58, %v1113_v12  ;;  %v5695_v58 = vcombine.high %v1106_v30, %v1114_v46  ;;  %v1130_v12 = vld [vmem:[%s8867_s8 + $0xf0] sm:$0xff] }
 0x2bb   :  { %v928_v57 = vpack.c.bf16 %v912_v18, %v912_v18  ;;  %1594 = vmatprep.subr.bf16.mxu1 %v5693_v11  ;;  %v5694_v11 = vcombine.low %v1106_v30, %v1114_v46 }
 0x2bd   :  { %v971_v27 = vunpack.c.l.b16 %v928_v57 }
 0x2bf   :  { %v992_v0 = vsel %vm982_vm6, %v971_v27, %v991_v7  ;;  %v1108_v7 = vld [vmem:[%s8867_s8 + $0x40] sm:$0xff] }
 0x2c0   :  { %v993_v13 = vsel %vm984_vm7, %v972_v21, %v992_v0  ;;  %v5683_v63 = vcombine.high %v1100_v62, %v1108_v7  ;;  %v5682_v3 = vcombine.low %v1100_v62, %v1108_v7 }
 0x2c1   :  { %v994_v22 = vsel %vm986_vm8, %v973_v10, %v993_v13  ;;  %v5680_v10 = vld [vmem:[%s8865_s6] ss:$0 sm:$0xff] }
 0x2c2   :  { %v995_v29 = vpack.c.b16 %v994_v22, %v987_v32  ;;  %v7152_v32 = vld [vmem:[%s8878_s27 + $0x8] sm:$0xff]  ;;  %1379 = vmatprep.subr.bf16.mxu0 %v5683_v63  ;;  %v1104_v63 = vld [vmem:[%s8867_s8 + $0x20] sm:$0xff] }
 0x2c3   :  { %v5691_v4 = vcombine.high %v1104_v63, %v1112_v34 }
 0x2c4   :  { %6757 = vmatmul.mubr.msk.bf16.vlgmr.msra.gmra.mrb[4].mxu0 %vm85_vm1, %v995_v29  ;;  %v5681_v29 = vld [vmem:[%s8866_s7] ss:$0 sm:$0xff] }
 0x2c5   :  { %1380 = vmatpush1.bf16.msra.mxu0 %v5682_v3  ;;  %1411 = vmatprep.mubr.bf16.mxu0 %v7184_v2 }
 0x2c6   :  { %1381 = vmatprep.subr.bf16.mxu0 %v5699_v53  ;;  %v5690_v53 = vcombine.low %v1104_v63, %v1112_v34 }
 0x2c9   :  { %1382 = vmatpush1.bf16.msra.mxu0 %v5698_v6  ;;  %v6812_v6 = vld [vmem:[%s8869_s10 + $0x80] sm:$0xff]  }
 0x2ca   :  { %1422 = vmatprep.subr.bf16.mxu0 %v5685_v9  ;;  %v1122_v9 = vld [vmem:[%s8867_s8 + $0xb0] sm:$0xff] }
 0x397   :  { %v1045_v20 = vpop.f32.mrb[4].mxu0 }
 0x398   :  { %v1046_v17 = vadd.f32 %v5676_v25, %v1045_v20  ;;  %v6758_v28 = vpop.f32.mrb[5].mxu0  ;;  %v1117_v20 = vld [vmem:[%s8867_s8 + $0x88] sm:$0xff] }
 0x399   :  { %v1048_v33 = vpop.f32.mrb[6].mxu0  ;;  %v1121_v28 = vld [vmem:[%s8867_s8 + $0xa8] sm:$0xff] }
 0x39a   :  { %v1049_v45 = vadd.f32 %v5676_v25, %v1048_v33  ;;  %v6759_v37 = vpop.f32.mrb[7].mxu0  ;;  %v1052_v38 = vadd.f32 %v7151_v35, %v1046_v17  ;;  %v1125_v17 = vld [vmem:[%s8867_s8 + $0xc8] sm:$0xff] }
 0x39b   :  { %v1129_v33 = vld [vmem:[%s8867_s8 + $0xe8] sm:$0xff] }
 0x39c   :  { %v1056_v39 = vsel %vm85_vm1, %v1052_v38, 0.0  ;;  %v1053_v14 = vadd.f32 %v7152_v32, %v1049_v45  ;;  %v1102_v32 = vld [vmem:[%s8867_s8 + $0x10] sm:$0xff] }
 0x39d   :  { %1057 = vadd.xlane.f32.xlu0 %v1056_v39  ;;  %v5709_v39 = vcombine.high %v1121_v28, %v1129_v33 }
 0x39e   :  { %v1059_v40 = vsel %vm85_vm1, %v1053_v14, 0.0 }
 0x39f   :  { %1060 = vadd.xlane.f32.xlu1 %v1059_v40  ;;  %v1107_v40 = vld [vmem:[%s8867_s8 + $0x38] sm:$0xff] }
 0x42a   :  { %v1058_v41 = vpop.xlane.xlu0 %1057 }
 0x42b   :  { %v1063_v42 = vmul.f32 0.03125, %v1058_v41  ;;  %v1115_v41 = vld [vmem:[%s8867_s8 + $0x78] sm:$0xff] }
 0x42c   :  { %v1061_v43 = vpop.xlane.xlu1 %1060  ;;  %v5696_v62 = vcombine.low %v1107_v40, %v1115_v41 }
 0x42d   :  { %v1065_v49 = vsub.f32 %v1052_v38, %v1063_v42  ;;  %v1064_v52 = vmul.f32 0.03125, %v1061_v43  ;;  %v5701_v38 = vcombine.high %v1117_v20, %v1125_v17  ;;  %v5700_v42 = vcombine.low %v1117_v20, %v1125_v17  ;;  %v6819_v20 = vld [vmem:[%s8869_s10 + $0x20] sm:$0xff]   ;;  %v6821_v17 = vld [vmem:[%s8869_s10 + $0x68] sm:$0xff]  }
 0x42e   :  { %v5708_v43 = vcombine.low %v1121_v28, %v1129_v33  ;;  %v6823_v28 = vld [vmem:[%s8869_s10 + $0x28] sm:$0xff]   ;;  %v6825_v33 = vld [vmem:[%s8869_s10 + $0x70] sm:$0xff]  }
 0x42f   :  { %v1066_v54 = vsub.f32 %v1053_v14, %v1064_v52  ;;  %v1067_v48 = vmul.f32 %v1065_v49, %v1065_v49  ;;  %v1110_v14 = vld [vmem:[%s8867_s8 + $0x50] sm:$0xff]  ;;  %v5697_v52 = vcombine.high %v1107_v40, %v1115_v41  ;;  %v6831_v40 = vld [vmem:[%s8869_s10 + $0x38] sm:$0xff]   ;;  %v6832_v41 = vld [vmem:[%s8869_s10 + $0xa8] sm:$0xff]  }
 0x431   :  { %v1069_v56 = vsel %vm85_vm1, %v1067_v48, 0.0  ;;  %v1068_v51 = vmul.f32 %v1066_v54, %v1066_v54  ;;  %v1126_v48 = vld [vmem:[%s8867_s8 + $0xd0] sm:$0xff] }
 0x432   :  { %1070 = vadd.xlane.f32.xlu0 %v1069_v56  ;;  %v1123_v56 = vld [vmem:[%s8867_s8 + $0xb8] sm:$0xff] }
 0x433   :  { %v1072_v26 = vsel %vm85_vm1, %v1068_v51, 0.0  ;;  %v1131_v51 = vld [vmem:[%s8867_s8 + $0xf8] sm:$0xff] }
 0x434   :  { %v5713_v36 = vcombine.high %v1123_v56, %v1131_v51  ;;  %v5712_v47 = vcombine.low %v1123_v56, %v1131_v51  ;;  %v7777_v56 = vsub.s32 6, %v7304_v19  ;;  %v7782_v51 = vld [vmem:[%s8868_s9] sm:$0xff] }
 0x436   :  { %1073 = vadd.xlane.f32.xlu0 %v1072_v26  ;;  %v5686_v26 = vcombine.low %v1102_v32, %v1110_v14 }
 0x4bf   :  { %v1071_v44 = vpop.xlane.xlu0 %1070 }
 0x4c0   :  { %v1075_v16 = vmul.f32 0.03125, %v1071_v44  ;;  %v5711_v44 = vcombine.high %v1122_v9, %v1130_v12 }
 0x4c2   :  { %v1077_v18 = vadd.f32 1e-05, %v1075_v16  ;;  %v6820_v16 = vld [vmem:[%s8869_s10 + $0x90] sm:$0xff]  }
 0x4c3   :  { %v1074_v23 = vpop.xlane.xlu0 %1073 }
 0x4c4   :  { %7131 = vrsqrt.f32 %v1077_v18  ;;  %v1076_v57 = vmul.f32 0.03125, %v1074_v23  ;;  %v6822_v18 = vld [vmem:[%s8869_s10 + $0xd8] sm:$0xff]   ;;  %v5710_v23 = vcombine.low %v1122_v9, %v1130_v12 }
 0x4c6   :  { %v1078_v61 = vadd.f32 1e-05, %v1076_v57  ;;  %v6805_v57 = vld [vmem:[%s8869_s10 + $0x40] sm:$0xff]  }
 0x4c8   :  { %7133 = vrsqrt.f32 %v1078_v61  ;;  %v6824_v61 = vld [vmem:[%s8869_s10 + $0x98] sm:$0xff]  }
 0x4ce   :  { %v7132_v27 = vpop.eup %7131 }
 0x4cf   :  { %v1081_v21 = vmul.f32 %v7132_v27, %v1065_v49  ;;  %v5687_v49 = vcombine.high %v1102_v32, %v1110_v14  ;;  %v6806_v27 = vld [vmem:[%s8869_s10] sm:$0xff]   ;;  %v6829_v32 = vld [vmem:[%s8869_s10 + $0x78] sm:$0xff]   ;;  %v6830_v14 = vld [vmem:[%s8869_s10 + $0xe8] sm:$0xff]  }
 0x4d1   :  { %v1089_v13 = vmul.f32 %v5680_v10, %v1081_v21  ;;  %v6807_v21 = vld [vmem:[%s8869_s10 + $0x48] sm:$0xff]  }
 0x4d2   :  { %v7134_v0 = vpop.eup %7133 }
 0x4d3   :  { %v1082_v22 = vmul.f32 %v7134_v0, %v1066_v54  ;;  %v7596_v45 = vadd.f32 %v5681_v29, %v1089_v13  ;;  %v1118_v54 = vld [vmem:[%s8867_s8 + $0x90] sm:$0xff] }
 0x4d4   :  { %v5703_v7 = vcombine.high %v1118_v54, %v1126_v48  ;;  %v5702_v3 = vcombine.low %v1118_v54, %v1126_v48  ;;  %v6809_v0 = vld [vmem:[%s8869_s10 + $0x50] sm:$0xff]   ;;  %v6839_v54 = vld [vmem:[%s8869_s10 + $0xb8] sm:$0xff]   ;;  %v6842_v48 = vld [vmem:[%s8869_s10 + $0x1c0] sm:$0xff]  }
 0x4d5   :  { %v1090_v25 = vmul.f32 %v5680_v10, %v1082_v22  ;;  %v6808_v10 = vld [vmem:[%s8869_s10 + $0x8] sm:$0xff]   ;;  %v6811_v13 = vld [vmem:[%s8869_s10 + $0x10] sm:$0xff]   ;;  %v6813_v22 = vld [vmem:[%s8869_s10 + $0x58] sm:$0xff]  }
 0x4d7   :  { %v7598_v37 = vadd.f32 %v5681_v29, %v1090_v25  ;;  %v6815_v29 = vld [vmem:[%s8869_s10 + $0x18] sm:$0xff]   ;;  %v6817_v25 = vld [vmem:[%s8869_s10 + $0x60] sm:$0xff]  }
 0x4d9   :  { %v7602_v35 = vpack.c.bf16 %v7598_v37, %v7596_v45 }
 0x4db   :  { %5714 = vmatmul.mubr.msk.bf16.vlgmr.msra.gmra.mrb[8].mxu0 %vm85_vm1, %v7602_v35  ;;  %5717 = vmatmul.mubr.msk.bf16.vlgmr.msra.gmra.mrb[16].mxu1 %vm85_vm1, %v7602_v35 }
 0x4dc   :  { %1423 = vmatpush1.bf16.msra.mxu0 %v5684_v55  ;;  %1595 = vmatpush1.bf16.msra.mxu1 %v5692_v15  ;;  %v6816_v55 = vld [vmem:[%s8869_s10 + $0x88] sm:$0xff]   ;;  %v6818_v15 = vld [vmem:[%s8869_s10 + $0xd0] sm:$0xff]  }
 0x4dd   :  { %1424 = vmatprep.subr.bf16.mxu0 %v5701_v38  ;;  %1596 = vmatprep.subr.bf16.mxu1 %v5709_v39  ;;  %v6827_v38 = vld [vmem:[%s8869_s10 + $0x30] sm:$0xff]   ;;  %v6828_v39 = vld [vmem:[%s8869_s10 + $0xa0] sm:$0xff]  }
 0x4de   :  { %1454 = vmatprep.mubr.bf16.mxu0 %v7184_v2  ;;  %1626 = vmatprep.mubr.bf16.mxu1 %v7184_v2 }
 0x4e0   :  { %1425 = vmatpush1.bf16.msra.mxu0 %v5700_v42  ;;  %1597 = vmatpush1.bf16.msra.mxu1 %v5708_v43  ;;  %v6833_v42 = vld [vmem:[%s8869_s10 + $0xf0] sm:$0xff]   ;;  %v6834_v43 = vld [vmem:[%s8869_s10 + $0x140] sm:$0xff]  }
 0x4e1   :  { %1465 = vmatprep.subr.bf16.mxu0 %v5687_v49  ;;  %1680 = vmatprep.subr.bf16.mxu1 %v5697_v52  ;;  %v6835_v49 = vld [vmem:[%s8869_s10 + $0xb0] sm:$0xff]   ;;  %v6837_v52 = vld [vmem:[%s8869_s10 + $0xf8] sm:$0xff]  }
 0x4e3   :  { %5715 = vmatmul.mubr.msk.bf16.vlgmr.msra.gmra.mrb[12].mxu0 %vm85_vm1, %v7602_v35  ;;  %5719 = vmatmul.mubr.msk.bf16.vlgmr.msra.gmra.mrb[20].mxu1 %vm85_vm1, %v7602_v35 }
 0x4e4   :  { %1466 = vmatpush1.bf16.msra.mxu0 %v5686_v26  ;;  %1681 = vmatpush1.bf16.msra.mxu1 %v5696_v62  ;;  %v7785_v26 = vsub.s32 1, %v7304_v19  ;;  %v7788_v62 = vsub.s32 7, %v7304_v19 }
 0x4e5   :  { %1467 = vmatprep.subr.bf16.mxu0 %v5703_v7  ;;  %1682 = vmatprep.subr.bf16.mxu1 %v5713_v36  ;;  %v1139_v7 = vrot.slane %v7782_v51, %v7308_v31  ;;  %v1163_v36 = vrot.slane %v7782_v51, %v7777_v56 }
 0x4e6   :  { %1497 = vmatprep.mubr.bf16.mxu0 %v7184_v2  ;;  %1712 = vmatprep.mubr.bf16.mxu1 %v7184_v2  ;;  %v1143_v63 = vrot.slane %v7782_v51, %v7785_v26  ;;  %v1167_v34 = vrot.slane %v7782_v51, %v7788_v62 }
 0x4e8   :  { %1468 = vmatpush1.bf16.msra.mxu0 %v5702_v3  ;;  %1683 = vmatpush1.bf16.msra.mxu1 %v5712_v47  ;;  %v7799_v3 = vsub.s32 2, %v7304_v19 }
 0x4e9   :  { %1551 = vmatprep.subr.bf16.mxu0 %v5691_v4  ;;  %6382 = vmatprep.subr.bf16.mxu1 %v6810_v5  ;;  %v7804_v5 = vld [vmem:[%s8868_s9 + $0x8] sm:$0xff] }
 0x4eb   :  { %5716 = vmatmul.mubr.msk.bf16.vlgmr.msra.gmra.mrb[16].mxu0 %vm85_vm1, %v7602_v35  ;;  %5721 = vmatmul.mubr.msk.bf16.vlgmr.msra.gmra.mrb[24].mxu1 %vm85_vm1, %v7602_v35 }
 0x4ec   :  { %1552 = vmatpush1.bf16.msra.mxu0 %v5690_v53  ;;  %1583 = vmatprep.mubr.bf16.mxu0 %v7184_v2 }
 0x4ed   :  { %1553 = vmatprep.subr.bf16.mxu0 %v5707_v8  ;;  %6383 = vmatpush3.bf16.msra.mxu1 %v6812_v6 }
 0x4ee   :  { %6384 = vmatprep.subr.bf16.mxu1 %v6814_v50 }
 0x4f0   :  { %1554 = vmatpush1.bf16.msra.mxu0 %v5706_v59 }
 0x4f1   :  { %1637 = vmatprep.subr.bf16.mxu0 %v5695_v58  ;;  %6385 = vmatpush3.bf16.msra.mxu1 %v6816_v55 }
 0x4f2   :  { %6386 = vmatprep.subr.bf16.mxu1 %v6818_v15  ;;  %v1147_v15 = vrot.slane %v7782_v51, %v7799_v3 }
 0x4f3   :  { %5718 = vmatmul.mubr.msk.bf16.vlgmr.msra.gmra.mrb[20].mxu0 %vm85_vm1, %v7602_v35 }
 0x4f4   :  { %1638 = vmatpush1.bf16.msra.mxu0 %v5694_v11  ;;  %1669 = vmatprep.mubr.bf16.mxu0 %v7184_v2  ;;  %v1179_v11 = vrot.slane %v7804_v5, %v7799_v3 }
 0x4f5   :  { %1639 = vmatprep.subr.bf16.mxu0 %v5711_v44  ;;  %6387 = vmatpush3.bf16.msra.mxu1 %v6820_v16 }
 0x4f6   :  { %6388 = vmatprep.subr.bf16.mxu1 %v6822_v18  ;;  %v1151_v18 = vrot.slane %v7782_v51, %v7807_v60 }
 0x4f8   :  { %1640 = vmatpush1.bf16.msra.mxu0 %v5710_v23  ;;  %v1183_v23 = vrot.slane %v7804_v5, %v7807_v60 }
 0x4f9   :  { %6360 = vmatprep.subr.bf16.mxu0 %v6805_v57  ;;  %6389 = vmatpush3.bf16.msra.mxu1 %v6824_v61 }
 0x4fb   :  { %5720 = vmatmul.mubr.msk.bf16.vlgmr.msra.gmra.mrb[24].mxu0 %vm85_vm1, %v7602_v35  ;;  %v6826_v35 = vld [vmem:[%s8869_s10 + $0xe0] sm:$0xff]  }
 0x4fc   :  { %6361 = vmatpush3.bf16.msra.mxu0 %v6806_v27  ;;  %6390 = vmatprep.subr.bf16.mxu1 %v6826_v35 }
 0x4fd   :  { %6362 = vmatprep.subr.bf16.mxu0 %v6807_v21  ;;  %6391 = vmatpush3.bf16.msra.mxu1 %v6828_v39  ;;  %v7828_v39 = vsub.s32 5, %v7304_v19 }
 0x4fe   :  { %6392 = vmatprep.subr.bf16.mxu1 %v6830_v14 }
 0x500   :  { %6363 = vmatpush3.bf16.msra.mxu0 %v6808_v10 }
 0x501   :  { %6364 = vmatprep.subr.bf16.mxu0 %v6809_v0  ;;  %6393 = vmatpush3.bf16.msra.mxu1 %v6832_v41 }
 0x502   :  { %6394 = vmatprep.subr.bf16.mxu1 %v6833_v42  ;;  %v6838_v42 = vld [vmem:[%s8869_s10 + $0x148] sm:$0xff]  }
 0x504   :  { %6365 = vmatpush3.bf16.msra.mxu0 %v6811_v13 }
 0x505   :  { %6366 = vmatprep.subr.bf16.mxu0 %v6813_v22  ;;  %6395 = vmatpush3.bf16.msra.mxu1 %v6835_v49 }
 0x506   :  { %6396 = vmatprep.subr.bf16.mxu1 %v6837_v52 }
 0x508   :  { %6367 = vmatpush3.bf16.msra.mxu0 %v6815_v29 }
 0x509   :  { %6368 = vmatprep.subr.bf16.mxu0 %v6817_v25  ;;  %6397 = vmatpush3.bf16.msra.mxu1 %v6839_v54 }
 0x50a   :  { %6426 = vmatprep.subr.bf16.mxu1 %v6842_v48 }
 0x50c   :  { %6369 = vmatpush3.bf16.msra.mxu0 %v6819_v20  ;;  %v7820_v20 = vsub.s32 4, %v7304_v19 }
 0x50d   :  { %6370 = vmatprep.subr.bf16.mxu0 %v6821_v17 }
 0x50e   :  { %v1155_v19 = vrot.slane %v7782_v51, %v7820_v20 }
 0x510   :  { %6371 = vmatpush3.bf16.msra.mxu0 %v6823_v28 }
 0x511   :  { %6372 = vmatprep.subr.bf16.mxu0 %v6825_v33 }
 0x514   :  { %6373 = vmatpush3.bf16.msra.mxu0 %v6827_v38  ;;  %v6836_v38 = vld [vmem:[%s8869_s10 + $0x100] sm:$0xff]  }
 0x515   :  { %6374 = vmatprep.subr.bf16.mxu0 %v6829_v32 }
 0x518   :  { %6375 = vmatpush3.bf16.msra.mxu0 %v6831_v40 }
 0x519   :  { %6404 = vmatprep.subr.bf16.mxu0 %v6834_v43 }
 0x5ae   :  { %v1413_v47 = vpop.f32.mrb[8].mxu0  ;;  %v1542_v4 = vpop.f32.mrb[16].mxu1 }
 0x5af   :  { %v1414_v24 = vadd.f32 %v1413_v47, %v1139_v7  ;;  %v1543_v53 = vadd.f32 %v1542_v4, %v1163_v36  ;;  %v1415_v8 = vpop.f32.mrb[9].mxu0  ;;  %v1544_v6 = vpop.f32.mrb[17].mxu1 }
 0x5b0   :  { %v1416_v30 = vadd.f32 %v1415_v8, %v1143_v63  ;;  %v1545_v46 = vadd.f32 %v1544_v6, %v1167_v34  ;;  %v1417_v50 = vpop.f32.mrb[10].mxu0  ;;  %v1546_v59 = vpop.f32.mrb[18].mxu1  ;;  %v1199_v8 = vrot.slane %v7804_v5, %v7788_v62 }
 0x5b1   :  { %v1418_v58 = vadd.f32 %v1417_v50, %v1139_v7  ;;  %v1547_v55 = vadd.f32 %v1546_v59, %v1163_v36  ;;  %v1419_v9 = vpop.f32.mrb[11].mxu0  ;;  %v1548_v12 = vpop.f32.mrb[19].mxu1  ;;  %v1723_v57 = vmax.f32 %v1414_v24, 0.0  ;;  %v1729_v61 = vmax.f32 %v1543_v53, 0.0  ;;  %v6840_v24 = vld [vmem:[%s8869_s10 + $0x108] sm:$0xff]   ;;  %v6841_v59 = vld [vmem:[%s8869_s10 + $0x150] sm:$0xff]  }
 0x5b2   :  { %v1420_v44 = vadd.f32 %v1419_v9, %v1143_v63  ;;  %v1549_v16 = vadd.f32 %v1548_v12, %v1167_v34  ;;  %v1724_v10 = vmax.f32 %v1416_v30, 0.0  ;;  %v1730_v0 = vmax.f32 %v1545_v46, 0.0 }
 0x5b3   :  { %v1739_v27 = vmax.f32 %v1418_v58, 0.0  ;;  %v1745_v21 = vmax.f32 %v1547_v55, 0.0  ;;  %v1195_v34 = vrot.slane %v7804_v5, %v7777_v56  ;;  %v1159_v53 = vrot.slane %v7782_v51, %v7828_v39 }
 0x5b4   :  { %v1740_v13 = vmax.f32 %v1420_v44, 0.0  ;;  %v1746_v22 = vmax.f32 %v1549_v16, 0.0 }
 0x5b5   :  { %v1755_v29 = vpack.c.bf16 %v1739_v27, %v1723_v57  ;;  %v7817_v25 = vpack.c.bf16 %v1745_v21, %v1729_v61  ;;  %v6844_v57 = vld [vmem:[%s8869_s10 + $0x180] sm:$0xff]  }
 0x5b6   :  { %v1756_v17 = vpack.c.bf16 %v1740_v13, %v1724_v10  ;;  %v7822_v28 = vpack.c.bf16 %v1746_v22, %v1730_v0  ;;  %v1456_v33 = vpop.f32.mrb[12].mxu0  ;;  %v1628_v35 = vpop.f32.mrb[20].mxu1  ;;  %v6845_v0 = vld [vmem:[%s8869_s10 + $0x158] sm:$0xff]  }
 0x5b7   :  { %v1457_v32 = vadd.f32 %v1456_v33, %v1147_v15  ;;  %v1629_v14 = vadd.f32 %v1628_v35, %v1179_v11  ;;  %v1458_v40 = vpop.f32.mrb[13].mxu0  ;;  %v1630_v41 = vpop.f32.mrb[21].mxu1  ;;  %v6846_v33 = vld [vmem:[%s8869_s10 + $0x1c8] sm:$0xff]  }
 0x5b8   :  { %v1459_v43 = vadd.f32 %v1458_v40, %v1151_v18  ;;  %v1631_v49 = vadd.f32 %v1630_v41, %v1183_v23  ;;  %v1460_v52 = vpop.f32.mrb[14].mxu0  ;;  %v1632_v54 = vpop.f32.mrb[22].mxu1  ;;  %2834 = vmatprep.mubr.bf16.mxu0 %v1756_v17  ;;  %v1171_v40 = vrot.slane %v7804_v5, %v7308_v31 }
 0x5b9   :  { %v1461_v48 = vadd.f32 %v1460_v52, %v1147_v15  ;;  %v1633_v7 = vadd.f32 %v1632_v54, %v1179_v11  ;;  %v1462_v36 = vpop.f32.mrb[15].mxu0  ;;  %v1634_v63 = vpop.f32.mrb[23].mxu1  ;;  %2835 = vmatmul.mubr.bf16.vlgmr.msra.gmra.mrb[28].mxu0 %v1755_v29  ;;  %v1725_v6 = vmax.f32 %v1457_v32, 0.0  ;;  %v1733_v30 = vmax.f32 %v1629_v14, 0.0 }
 0x5ba   :  { %v1463_v47 = vadd.f32 %v1462_v36, %v1151_v18  ;;  %v1635_v4 = vadd.f32 %v1634_v63, %v1183_v23  ;;  %6405 = vmatpush3.bf16.msra.mxu0 %v6836_v38  ;;  %v1726_v58 = vmax.f32 %v1459_v43, 0.0  ;;  %v1734_v55 = vmax.f32 %v1631_v49, 0.0  ;;  %v6843_v23 = vld [vmem:[%s8869_s10 + $0x110] sm:$0xff]   ;;  %v6847_v43 = vld [vmem:[%s8869_s10 + $0x118] sm:$0xff]   ;;  %v6848_v49 = vld [vmem:[%s8869_s10 + $0x188] sm:$0xff]  }
 0x5bb   :  { %v1741_v46 = vmax.f32 %v1461_v48, 0.0  ;;  %v1749_v50 = vmax.f32 %v1633_v7, 0.0  ;;  %6406 = vmatprep.subr.bf16.mxu0 %v6838_v42  ;;  %v1175_v52 = vrot.slane %v7804_v5, %v7785_v26  ;;  %v6849_v63 = vld [vmem:[%s8869_s10 + $0x160] sm:$0xff]  }
 0x5bc   :  { %v1742_v9 = vmax.f32 %v1463_v47, 0.0  ;;  %v1750_v12 = vmax.f32 %v1635_v4, 0.0 }
 0x5bd   :  { %v1757_v15 = vpack.c.bf16 %v1741_v46, %v1725_v6  ;;  %v7847_v11 = vpack.c.bf16 %v1749_v50, %v1733_v30  ;;  %v6851_v46 = vld [vmem:[%s8869_s10 + $0x120] sm:$0xff]   ;;  %v6852_v50 = vld [vmem:[%s8869_s10 + $0x190] sm:$0xff]  }
 0x5be   :  { %v1758_v51 = vpack.c.bf16 %v1742_v9, %v1726_v58  ;;  %v7849_v44 = vpack.c.bf16 %v1750_v12, %v1734_v55  ;;  %6407 = vmatpush3.bf16.msra.mxu0 %v6840_v24  ;;  %v1499_v16 = vpop.f32.mrb[16].mxu0  ;;  %v1714_v18 = vpop.f32.mrb[24].mxu1  ;;  %v6853_v55 = vld [vmem:[%s8869_s10 + $0x168] sm:$0xff]   ;;  %v6854_v9 = vld [vmem:[%s8869_s10 + $0x1d8] sm:$0xff]  }
 0x5bf   :  { %v1500_v61 = vadd.f32 %v1499_v16, %v1155_v19  ;;  %v1715_v27 = vadd.f32 %v1714_v18, %v1195_v34  ;;  %v1501_v21 = vpop.f32.mrb[17].mxu0  ;;  %v1716_v10 = vpop.f32.mrb[25].mxu1  ;;  %6408 = vmatprep.subr.bf16.mxu0 %v6841_v59 }
 0x5c0   :  { %v1502_v13 = vadd.f32 %v1501_v21, %v1159_v53  ;;  %v1717_v22 = vadd.f32 %v1716_v10, %v1199_v8  ;;  %v1503_v29 = vpop.f32.mrb[18].mxu0  ;;  %v1718_v17 = vpop.f32.mrb[26].mxu1  ;;  %2875 = vmatprep.mubr.bf16.mxu1 %v1758_v51  ;;  %v1187_v21 = vrot.slane %v7804_v5, %v7820_v20  ;;  %v6857_v10 = vld [vmem:[%s8869_s10 + $0x170] sm:$0xff]  }
 0x5c1   :  { %v1504_v35 = vadd.f32 %v1503_v29, %v1155_v19  ;;  %v1719_v38 = vadd.f32 %v1718_v17, %v1195_v34  ;;  %v1505_v32 = vpop.f32.mrb[19].mxu0  ;;  %v1720_v14 = vpop.f32.mrb[27].mxu1  ;;  %2876 = vmatmul.mubr.bf16.vlgmr.msra.gmra.mrb[28].mxu1 %v1757_v15  ;;  %v1727_v54 = vmax.f32 %v1500_v61, 0.0  ;;  %v1737_v48 = vmax.f32 %v1715_v27, 0.0  ;;  %v6850_v19 = vld [vmem:[%s8869_s10 + $0x1d0] sm:$0xff]  }
 0x5c2   :  { %v1506_v41 = vadd.f32 %v1505_v32, %v1159_v53  ;;  %v1721_v42 = vadd.f32 %v1720_v14, %v1199_v8  ;;  %6409 = vmatpush3.bf16.msra.mxu0 %v6843_v23  ;;  %6427 = vmatpush3.bf16.msra.mxu1 %v6844_v57  ;;  %v1728_v34 = vmax.f32 %v1502_v13, 0.0  ;;  %v1738_v47 = vmax.f32 %v1717_v22, 0.0  ;;  %v6855_v23 = vld [vmem:[%s8869_s10 + $0x128] sm:$0xff]   ;;  %v6856_v57 = vld [vmem:[%s8869_s10 + $0x198] sm:$0xff]   ;;  %v6860_v32 = vld [vmem:[%s8869_s10 + $0x1a0] sm:$0xff]  }
 0x5c3   :  { %v1743_v7 = vmax.f32 %v1504_v35, 0.0  ;;  %v1753_v36 = vmax.f32 %v1719_v38, 0.0  ;;  %2957 = vmatprep.mubr.bf16.mxu1 %v7822_v28  ;;  %6410 = vmatprep.subr.bf16.mxu0 %v6845_v0  ;;  %v6858_v0 = vld [vmem:[%s8869_s10 + $0x1e0] sm:$0xff]   ;;  %v1191_v29 = vrot.slane %v7804_v5, %v7828_v39  ;;  %v6859_v38 = vld [vmem:[%s8869_s10 + $0x130] sm:$0xff]   ;;  %v6861_v5 = vld [vmem:[%s8869_s10 + $0x178] sm:$0xff]  }
 0x5c4   :  { %v1744_v4 = vmax.f32 %v1506_v41, 0.0  ;;  %v1754_v24 = vmax.f32 %v1721_v42, 0.0  ;;  %6428 = vmatprep.subr.bf16.mxu1 %v6846_v33  ;;  %v6862_v41 = vld [vmem:[%s8869_s10 + $0x1e8] sm:$0xff]  }
 0x5c5   :  { %v7880_v53 = vpack.c.bf16 %v1743_v7, %v1727_v54  ;;  %v7882_v8 = vpack.c.bf16 %v1753_v36, %v1737_v48  ;;  %v6863_v48 = vld [vmem:[%s8869_s10 + $0x138] sm:$0xff]   ;;  %v6864_v7 = vld [vmem:[%s8869_s10 + $0x1a8] sm:$0xff]  }
 0x5c6   :  { %v1760_v6 = vpack.c.bf16 %v1744_v4, %v1728_v34  ;;  %v7884_v28 = vpack.c.bf16 %v1754_v24, %v1738_v47  ;;  %6411 = vmatpush3.bf16.msra.mxu0 %v6847_v43  ;;  %6429 = vmatpush3.bf16.msra.mxu1 %v6848_v49  ;;  %v1585_v30 = vpop.f32.mrb[20].mxu0  ;;  %v6866_v34 = vld [vmem:[%s8869_s10 + $0x240] sm:$0xff]  }
 0x5c7   :  { %v1586_v59 = vadd.f32 %v1585_v30, %v1171_v40  ;;  %v1587_v58 = vpop.f32.mrb[21].mxu0  ;;  %6412 = vmatprep.subr.bf16.mxu0 %v6849_v63  ;;  %6430 = vmatprep.subr.bf16.mxu1 %v6850_v19  ;;  %v6865_v19 = vld [vmem:[%s8869_s10 + $0x1f0] sm:$0xff]  }
 0x5c8   :  { %v1588_v12 = vadd.f32 %v1587_v58, %v1175_v52  ;;  %v1589_v15 = vpop.f32.mrb[22].mxu0  ;;  %2916 = vmatprep.mubr.bf16.mxu0 %v1760_v6  ;;  %v6867_v30 = vld [vmem:[%s8869_s10 + $0x1b0] sm:$0xff]   ;;  %v6871_v58 = vld [vmem:[%s8869_s10 + $0x1b8] sm:$0xff]  }
 0x5c9   :  { %v1590_v51 = vadd.f32 %v1589_v15, %v1171_v40  ;;  %v1591_v16 = vpop.f32.mrb[23].mxu0  ;;  %v1731_v61 = vmax.f32 %v1586_v59, 0.0  ;;  %v6870_v59 = vld [vmem:[%s8869_s10 + $0x248] sm:$0xff]   ;;  %v6876_v15 = vld [vmem:[%s8869_s10 + $0x280] sm:$0xff]  }
 0x5ca   :  { %v1592_v18 = vadd.f32 %v1591_v16, %v1175_v52  ;;  %6413 = vmatpush3.bf16.msra.mxu0 %v6851_v46  ;;  %6431 = vmatpush3.bf16.msra.mxu1 %v6852_v50  ;;  %v1732_v13 = vmax.f32 %v1588_v12, 0.0  ;;  %v6868_v46 = vld [vmem:[%s8869_s10 + $0x200] sm:$0xff]   ;;  %v6869_v50 = vld [vmem:[%s8869_s10 + $0x1f8] sm:$0xff]   ;;  %v6875_v12 = vld [vmem:[%s8869_s10 + $0x210] sm:$0xff]  }
 0x5cb   :  { %v1747_v27 = vmax.f32 %v1590_v51, 0.0  ;;  %6414 = vmatprep.subr.bf16.mxu0 %v6853_v55  ;;  %6432 = vmatprep.subr.bf16.mxu1 %v6854_v9  ;;  %v6872_v55 = vld [vmem:[%s8869_s10 + $0x208] sm:$0xff]   ;;  %v6873_v9 = vld [vmem:[%s8869_s10 + $0x250] sm:$0xff]   ;;  %v6877_v51 = vld [vmem:[%s8869_s10 + $0x258] sm:$0xff]  }
 0x5cc   :  { %v1748_v22 = vmax.f32 %v1592_v18, 0.0  ;;  %v6878_v16 = vld [vmem:[%s8869_s10 + $0x2c8] sm:$0xff]   ;;  %v6879_v18 = vld [vmem:[%s8869_s10 + $0x218] sm:$0xff]  }
 0x5cd   :  { %v7914_v17 = vpack.c.bf16 %v1747_v27, %v1731_v61  ;;  %v6883_v61 = vld [vmem:[%s8869_s10 + $0x220] sm:$0xff]   ;;  %v6885_v27 = vld [vmem:[%s8869_s10 + $0x268] sm:$0xff]  }
 0x5ce   :  { %v1764_v33 = vpack.c.bf16 %v1748_v22, %v1732_v13  ;;  %6415 = vmatpush3.bf16.msra.mxu0 %v6855_v23  ;;  %6433 = vmatpush3.bf16.msra.mxu1 %v6856_v57  ;;  %v1671_v35 = vpop.f32.mrb[24].mxu0  ;;  %v6880_v23 = vld [vmem:[%s8869_s10 + $0x288] sm:$0xff]   ;;  %v6881_v57 = vld [vmem:[%s8869_s10 + $0x260] sm:$0xff]   ;;  %v6889_v13 = vld [vmem:[%s8869_s10 + $0x270] sm:$0xff]  }
 0x5cf   :  { %v1672_v14 = vadd.f32 %v1671_v35, %v1187_v21  ;;  %v1673_v40 = vpop.f32.mrb[25].mxu0  ;;  %6416 = vmatprep.subr.bf16.mxu0 %v6857_v10  ;;  %6434 = vmatprep.subr.bf16.mxu1 %v6858_v0  ;;  %v6887_v10 = vld [vmem:[%s8869_s10 + $0x228] sm:$0xff]   ;;  %v6888_v0 = vld [vmem:[%s8869_s10 + $0x298] sm:$0xff]   ;;  %v6890_v22 = vld [vmem:[%s8869_s10 + $0x2e0] sm:$0xff]  }
 0x5d0   :  { %v1674_v42 = vadd.f32 %v1673_v40, %v1191_v29  ;;  %v1675_v43 = vpop.f32.mrb[26].mxu0  ;;  %v6893_v35 = vld [vmem:[%s8869_s10 + $0x278] sm:$0xff]   ;;  %v6897_v40 = vld [vmem:[%s8869_s10 + $0x2f0] sm:$0xff]  }
 0x5d1   :  { %v1676_v49 = vadd.f32 %v1675_v43, %v1187_v21  ;;  %v1677_v52 = vpop.f32.mrb[27].mxu0  ;;  %v1735_v36 = vmax.f32 %v1672_v14, 0.0  ;;  %v6886_v21 = vld [vmem:[%s8869_s10 + $0x2d8] sm:$0xff]   ;;  %v6896_v14 = vld [vmem:[%s8869_s10 + $0x2a8] sm:$0xff]  }
 0x5d2   :  { %v1678_v54 = vadd.f32 %v1677_v52, %v1191_v29  ;;  %6417 = vmatpush3.bf16.msra.mxu0 %v6859_v38  ;;  %6435 = vmatpush3.bf16.msra.mxu1 %v6860_v32  ;;  %v1736_v47 = vmax.f32 %v1674_v42, 0.0  ;;  %v6891_v29 = vld [vmem:[%s8869_s10 + $0x230] sm:$0xff]   ;;  %v6894_v38 = vld [vmem:[%s8869_s10 + $0x2e8] sm:$0xff]   ;;  %v6895_v32 = vld [vmem:[%s8869_s10 + $0x238] sm:$0xff]  }
 0x5d3   :  { %v1751_v63 = vmax.f32 %v1676_v49, 0.0  ;;  %6418 = vmatprep.subr.bf16.mxu0 %v6861_v5  ;;  %6436 = vmatprep.subr.bf16.mxu1 %v6862_v41  ;;  %v6898_v5 = vld [vmem:[%s8869_s10 + $0x340] sm:$0xff]   ;;  %v6899_v41 = vld [vmem:[%s8869_s10 + $0x2b0] sm:$0xff]   ;;  %v6901_v43 = vld [vmem:[%s8869_s10 + $0x2f8] sm:$0xff]  }
 0x5d4   :  { %v1752_v4 = vmax.f32 %v1678_v54, 0.0  ;;  %v6900_v42 = vld [vmem:[%s8869_s10 + $0x300] sm:$0xff]   ;;  %v6902_v49 = vld [vmem:[%s8869_s10 + $0x348] sm:$0xff]   ;;  %v6903_v52 = vld [vmem:[%s8869_s10 + $0x2b8] sm:$0xff]  }
 0x5d5   :  { %v7940_v24 = vpack.c.bf16 %v1751_v63, %v1735_v36  ;;  %v6904_v54 = vld [vmem:[%s8869_s10 + $0x308] sm:$0xff]   ;;  %v6908_v36 = vld [vmem:[%s8869_s10 + $0x380] sm:$0xff]   ;;  %v6909_v63 = vld [vmem:[%s8869_s10 + $0x358] sm:$0xff]  }
 0x5d6   :  { %v7942_v6 = vpack.c.bf16 %v1752_v4, %v1736_v47  ;;  %6419 = vmatpush3.bf16.msra.mxu0 %v6863_v48  ;;  %6437 = vmatpush3.bf16.msra.mxu1 %v6864_v7  ;;  %v6905_v48 = vld [vmem:[%s8869_s10 + $0x350] sm:$0xff]   ;;  %v6912_v47 = vld [vmem:[%s8869_s10 + $0x388] sm:$0xff]   ;;  %v6913_v4 = vld [vmem:[%s8869_s10 + $0x360] sm:$0xff]  }
 0x5d7   :  { %6438 = vmatprep.subr.bf16.mxu1 %v6865_v19  ;;  %6448 = vmatprep.subr.bf16.mxu0 %v6866_v34  ;;  %v6907_v7 = vld [vmem:[%s8869_s10 + $0x310] sm:$0xff]   ;;  %v6910_v19 = vld [vmem:[%s8869_s10 + $0x3c8] sm:$0xff]   ;;  %v6911_v34 = vld [vmem:[%s8869_s10 + $0x318] sm:$0xff]  }
 0x5d9   :  { %2917 = vmatmul.mubr.bf16.vlgmr.msra.gmra.mrb[32].mxu0 %v7880_v53  ;;  %v6874_v53 = vld [vmem:[%s8869_s10 + $0x2c0] sm:$0xff]  }
 0x5da   :  { %6439 = vmatpush3.bf16.msra.mxu1 %v6867_v30  ;;  %6449 = vmatpush3.bf16.msra.mxu0 %v6868_v46  ;;  %v6917_v30 = vld [vmem:[%s8869_s10 + $0x368] sm:$0xff]   ;;  %v6918_v46 = vld [vmem:[%s8869_s10 + $0x3d8] sm:$0xff]  }
 0x5db   :  { %2998 = vmatprep.mubr.bf16.mxu0 %v1764_v33  ;;  %6440 = vmatprep.subr.bf16.mxu1 %v6869_v50  ;;  %v6892_v33 = vld [vmem:[%s8869_s10 + $0x2a0] sm:$0xff]   ;;  %v6919_v50 = vld [vmem:[%s8869_s10 + $0x328] sm:$0xff]  }
 0x5dc   :  { %6450 = vmatprep.subr.bf16.mxu0 %v6870_v59  ;;  %v6920_v59 = vld [vmem:[%s8869_s10 + $0x398] sm:$0xff]  }
 0x5de   :  { %6441 = vmatpush3.bf16.msra.mxu1 %v6871_v58  ;;  %6451 = vmatpush3.bf16.msra.mxu0 %v6872_v55  ;;  %v6921_v58 = vld [vmem:[%s8869_s10 + $0x370] sm:$0xff]   ;;  %v6922_v55 = vld [vmem:[%s8869_s10 + $0x3e0] sm:$0xff]  }
 0x5df   :  { %6452 = vmatprep.subr.bf16.mxu0 %v6873_v9  ;;  %6470 = vmatprep.subr.bf16.mxu1 %v6874_v53  ;;  %v6923_v9 = vld [vmem:[%s8869_s10 + $0x330] sm:$0xff]   ;;  %v6924_v53 = vld [vmem:[%s8869_s10 + $0x3a0] sm:$0xff]  }
 0x5e1   :  { %2958 = vmatmul.mubr.bf16.vlgmr.msra.gmra.mrb[32].mxu1 %v7817_v25  ;;  %v6882_v25 = vld [vmem:[%s8869_s10 + $0x2d0] sm:$0xff]  }
 0x5e2   :  { %6453 = vmatpush3.bf16.msra.mxu0 %v6875_v12  ;;  %6471 = vmatpush3.bf16.msra.mxu1 %v6876_v15  ;;  %v6925_v12 = vld [vmem:[%s8869_s10 + $0x378] sm:$0xff]   ;;  %v6926_v15 = vld [vmem:[%s8869_s10 + $0x3e8] sm:$0xff]  }
 0x5e3   :  { %3039 = vmatprep.mubr.bf16.mxu1 %v7849_v44  ;;  %6454 = vmatprep.subr.bf16.mxu0 %v6877_v51  ;;  %v6884_v44 = vld [vmem:[%s8869_s10 + $0x290] sm:$0xff]   ;;  %v6927_v51 = vld [vmem:[%s8869_s10 + $0x338] sm:$0xff]  }
 0x5e4   :  { %6472 = vmatprep.subr.bf16.mxu1 %v6878_v16  ;;  %v6928_v16 = vld [vmem:[%s8869_s10 + $0x3a8] sm:$0xff]  }
 0x5e6   :  { %6455 = vmatpush3.bf16.msra.mxu0 %v6879_v18  ;;  %6473 = vmatpush3.bf16.msra.mxu1 %v6880_v23  ;;  %v6929_v18 = vld [vmem:[%s8869_s10 + $0x3f0] sm:$0xff]  }
 0x5e7   :  { %6456 = vmatprep.subr.bf16.mxu0 %v6881_v57  ;;  %6474 = vmatprep.subr.bf16.mxu1 %v6882_v25  ;;  %v6930_v23 = vld [vmem:[%s8869_s10 + $0x3b0] sm:$0xff]   ;;  %v6931_v57 = vld [vmem:[%s8869_s10 + $0x3f8] sm:$0xff]  }
 0x5e8   :  { %v6932_v25 = vld [vmem:[%s8869_s10 + $0x3b8] sm:$0xff]  }
 0x5ea   :  { %6457 = vmatpush3.bf16.msra.mxu0 %v6883_v61  ;;  %6475 = vmatpush3.bf16.msra.mxu1 %v6884_v44  ;;  %v7153_v61 = vld [vmem:[%s8860_s1] sm:$0xff]  }
 0x5eb   :  { %6458 = vmatprep.subr.bf16.mxu0 %v6885_v27  ;;  %6476 = vmatprep.subr.bf16.mxu1 %v6886_v21 }
 0x5ee   :  { %6459 = vmatpush3.bf16.msra.mxu0 %v6887_v10  ;;  %6477 = vmatpush3.bf16.msra.mxu1 %v6888_v0 }
 0x5ef   :  { %6460 = vmatprep.subr.bf16.mxu0 %v6889_v13  ;;  %6478 = vmatprep.subr.bf16.mxu1 %v6890_v22  ;;  %v5722_v13 = vld [vmem:[%s8870_s11] ss:$0 sm:$0xff] }
 0x5f2   :  { %6461 = vmatpush3.bf16.msra.mxu0 %v6891_v29  ;;  %6479 = vmatpush3.bf16.msra.mxu1 %v6892_v33 }
 0x5f3   :  { %6462 = vmatprep.subr.bf16.mxu0 %v6893_v35  ;;  %6480 = vmatprep.subr.bf16.mxu1 %v6894_v38 }
 0x5f6   :  { %6463 = vmatpush3.bf16.msra.mxu0 %v6895_v32  ;;  %6481 = vmatpush3.bf16.msra.mxu1 %v6896_v14 }
 0x5f7   :  { %6482 = vmatprep.subr.bf16.mxu1 %v6897_v40  ;;  %6492 = vmatprep.subr.bf16.mxu0 %v6898_v5 }
 0x5f9   :  { %2999 = vmatmul.mubr.bf16.vlgmr.msra.gmra.mrb[36].mxu0 %v7914_v17  ;;  %v6906_v17 = vld [vmem:[%s8869_s10 + $0x3c0] sm:$0xff]  }
 0x5fa   :  { %6483 = vmatpush3.bf16.msra.mxu1 %v6899_v41  ;;  %6493 = vmatpush3.bf16.msra.mxu0 %v6900_v42 }
 0x5fb   :  { %3080 = vmatprep.mubr.bf16.mxu0 %v7942_v6  ;;  %6484 = vmatprep.subr.bf16.mxu1 %v6901_v43  ;;  %v6915_v6 = vld [vmem:[%s8869_s10 + $0x320] sm:$0xff]  }
 0x5fc   :  { %6494 = vmatprep.subr.bf16.mxu0 %v6902_v49 }
 0x5fe   :  { %6485 = vmatpush3.bf16.msra.mxu1 %v6903_v52  ;;  %6495 = vmatpush3.bf16.msra.mxu0 %v6904_v54 }
 0x5ff   :  { %6496 = vmatprep.subr.bf16.mxu0 %v6905_v48  ;;  %6514 = vmatprep.subr.bf16.mxu1 %v6906_v17 }
 0x601   :  { %3040 = vmatmul.mubr.bf16.vlgmr.msra.gmra.mrb[36].mxu1 %v7847_v11  ;;  %v6914_v11 = vld [vmem:[%s8869_s10 + $0x3d0] sm:$0xff]  }
 0x602   :  { %6497 = vmatpush3.bf16.msra.mxu0 %v6907_v7  ;;  %6515 = vmatpush3.bf16.msra.mxu1 %v6908_v36 }
 0x603   :  { %3121 = vmatprep.mubr.bf16.mxu1 %v7884_v28  ;;  %6498 = vmatprep.subr.bf16.mxu0 %v6909_v63  ;;  %v6916_v28 = vld [vmem:[%s8869_s10 + $0x390] sm:$0xff]  }
 0x604   :  { %6516 = vmatprep.subr.bf16.mxu1 %v6910_v19 }
 0x606   :  { %6499 = vmatpush3.bf16.msra.mxu0 %v6911_v34  ;;  %6517 = vmatpush3.bf16.msra.mxu1 %v6912_v47 }
 0x607   :  { %6500 = vmatprep.subr.bf16.mxu0 %v6913_v4  ;;  %6518 = vmatprep.subr.bf16.mxu1 %v6914_v11 }
 0x60a   :  { %6501 = vmatpush3.bf16.msra.mxu0 %v6915_v6  ;;  %6519 = vmatpush3.bf16.msra.mxu1 %v6916_v28 }
 0x60b   :  { %6502 = vmatprep.subr.bf16.mxu0 %v6917_v30  ;;  %6520 = vmatprep.subr.bf16.mxu1 %v6918_v46 }
 0x60e   :  { %6503 = vmatpush3.bf16.msra.mxu0 %v6919_v50  ;;  %6521 = vmatpush3.bf16.msra.mxu1 %v6920_v59 }
 0x60f   :  { %6504 = vmatprep.subr.bf16.mxu0 %v6921_v58  ;;  %6522 = vmatprep.subr.bf16.mxu1 %v6922_v55 }
 0x612   :  { %6505 = vmatpush3.bf16.msra.mxu0 %v6923_v9  ;;  %6523 = vmatpush3.bf16.msra.mxu1 %v6924_v53 }
 0x613   :  { %6506 = vmatprep.subr.bf16.mxu0 %v6925_v12  ;;  %6524 = vmatprep.subr.bf16.mxu1 %v6926_v15 }
 0x616   :  { %6507 = vmatpush3.bf16.msra.mxu0 %v6927_v51  ;;  %6525 = vmatpush3.bf16.msra.mxu1 %v6928_v16 }
 0x617   :  { %6526 = vmatprep.subr.bf16.mxu1 %v6929_v18  ;;  %6760 = vmatprep.subr.bf16.mxu0 %v7179_v1 }
 0x619   :  { %3081 = vmatmul.mubr.bf16.vlgmr.msra.gmra.mrb[40].mxu0 %v7940_v24  ;;  %v7154_v24 = vld [vmem:[%s8860_s1 + $0x8] sm:$0xff]  }
 0x61a   :  { %6527 = vmatpush3.bf16.msra.mxu1 %v6930_v23  ;;  %6764 = vmatprep.mubr.msk.bf16.mxu0 %vm7180_vm0, %v7179_v1 }
 0x61b   :  { %6528 = vmatprep.subr.bf16.mxu1 %v6931_v57 }
 0x61e   :  { %6529 = vmatpush3.bf16.msra.mxu1 %v6932_v25 }
 0x61f   :  { %6768 = vmatprep.subr.bf16.mxu1 %v7179_v1 }
 0x621   :  { %3122 = vmatmul.mubr.bf16.vlgmr.msra.gmra.mrb[40].mxu1 %v7882_v8 }
 0x622   :  { %6769 = vmatpush3.bf16.msra.mxu1 %v7153_v61  ;;  %6772 = vmatprep.mubr.msk.bf16.mxu1 %vm7180_vm0, %v7179_v1 }
 0x623   :  { %6770 = vmatprep.subr.bf16.mxu1 %v7179_v1 }
 0x626   :  { %6771 = vmatpush3.bf16.msra.mxu1 %v7154_v24 }
 0x68c   :  { %v6376_v44 = vpop.f32.mrb[28].mxu0 }
 0x68d   :  { %v6377_v27 = vpop.f32.mrb[29].mxu0 }
 0x68e   :  { %v6378_v21 = vadd.f32 %v6377_v27, %v6376_v44  ;;  %v6379_v10 = vpop.f32.mrb[30].mxu0 }
 0x68f   :  { %v6380_v8 = vpop.f32.mrb[31].mxu0 }
 0x690   :  { %v6381_v0 = vadd.f32 %v6380_v8, %v6379_v10  ;;  %v2837_v33 = vadd.f32 %v6378_v21, %v5722_v13 }
 0x692   :  { %v2840_v14 = vadd.f32 %v6381_v0, %v5722_v13 }
 0x694   :  { %v6398_v22 = vpop.f32.mrb[28].mxu1 }
 0x695   :  { %v6399_v29 = vpop.f32.mrb[29].mxu1 }
 0x696   :  { %v6400_v35 = vadd.f32 %v6399_v29, %v6398_v22  ;;  %v6401_v38 = vpop.f32.mrb[30].mxu1 }
 0x697   :  { %v6402_v32 = vpop.f32.mrb[31].mxu1 }
 0x698   :  { %v2878_v40 = vadd.f32 %v6400_v35, %v2837_v33  ;;  %v6403_v5 = vadd.f32 %v6402_v32, %v6401_v38 }
 0x69a   :  { %v2881_v41 = vadd.f32 %v6403_v5, %v2840_v14 }
 0x6ac   :  { %v6420_v42 = vpop.f32.mrb[32].mxu0 }
 0x6ad   :  { %v6421_v43 = vpop.f32.mrb[33].mxu0 }
 0x6ae   :  { %v6422_v49 = vadd.f32 %v6421_v43, %v6420_v42  ;;  %v6423_v52 = vpop.f32.mrb[34].mxu0 }
 0x6af   :  { %v6424_v54 = vpop.f32.mrb[35].mxu0 }
 0x6b0   :  { %v2919_v48 = vadd.f32 %v6422_v49, %v2878_v40  ;;  %v6425_v17 = vadd.f32 %v6424_v54, %v6423_v52 }
 0x6b2   :  { %v2922_v7 = vadd.f32 %v6425_v17, %v2881_v41 }
 0x6b4   :  { %v6442_v36 = vpop.f32.mrb[32].mxu1 }
 0x6b5   :  { %v6443_v63 = vpop.f32.mrb[33].mxu1 }
 0x6b6   :  { %v6444_v19 = vadd.f32 %v6443_v63, %v6442_v36  ;;  %v6445_v34 = vpop.f32.mrb[34].mxu1  ;;  %v6934_v63 = vld [vmem:[%s8861_s2 + $0x18] sm:$0xff]  }
 0x6b7   :  { %v6446_v47 = vpop.f32.mrb[35].mxu1 }
 0x6b8   :  { %v2960_v4 = vadd.f32 %v6444_v19, %v2919_v48  ;;  %v6447_v11 = vadd.f32 %v6446_v47, %v6445_v34 }
 0x6ba   :  { %v2963_v6 = vadd.f32 %v6447_v11, %v2922_v7 }
 0x6cc   :  { %v6464_v28 = vpop.f32.mrb[36].mxu0 }
 0x6cd   :  { %v6465_v30 = vpop.f32.mrb[37].mxu0 }
 0x6ce   :  { %v6466_v46 = vadd.f32 %v6465_v30, %v6464_v28  ;;  %v6467_v50 = vpop.f32.mrb[38].mxu0  ;;  %v5851_v30 = vld [vmem:[%s8871_s12] ss:$0 sm:$0xff] }
 0x6cf   :  { %v6468_v59 = vpop.f32.mrb[39].mxu0 }
 0x6d0   :  { %v3001_v58 = vadd.f32 %v6466_v46, %v2960_v4  ;;  %v6469_v55 = vadd.f32 %v6468_v59, %v6467_v50 }
 0x6d2   :  { %v3004_v9 = vadd.f32 %v6469_v55, %v2963_v6  ;;  %v5852_v55 = vld [vmem:[%s8872_s13] ss:$0 sm:$0xff] }
 0x6d4   :  { %v6486_v53 = vpop.f32.mrb[36].mxu1 }
 0x6d5   :  { %v6487_v12 = vpop.f32.mrb[37].mxu1 }
 0x6d6   :  { %v6488_v15 = vadd.f32 %v6487_v12, %v6486_v53  ;;  %v6489_v51 = vpop.f32.mrb[38].mxu1 }
 0x6d7   :  { %v6490_v16 = vpop.f32.mrb[39].mxu1 }
 0x6d8   :  { %v3042_v18 = vadd.f32 %v6488_v15, %v3001_v58  ;;  %v6491_v23 = vadd.f32 %v6490_v16, %v6489_v51  ;;  %v5858_v51 = vld [vmem:[%s8862_s3 + $0x1] ss:$0 sm:$0xff] }
 0x6da   :  { %v3045_v57 = vadd.f32 %v6491_v23, %v3004_v9 }
 0x6ec   :  { %v6508_v25 = vpop.f32.mrb[40].mxu0 }
 0x6ed   :  { %v6509_v61 = vpop.f32.mrb[41].mxu0 }
 0x6ee   :  { %v6510_v24 = vadd.f32 %v6509_v61, %v6508_v25  ;;  %v6511_v44 = vpop.f32.mrb[42].mxu0 }
 0x6ef   :  { %v6512_v27 = vpop.f32.mrb[43].mxu0 }
 0x6f0   :  { %v3083_v21 = vadd.f32 %v6510_v24, %v3042_v18  ;;  %v6513_v10 = vadd.f32 %v6512_v27, %v6511_v44 }
 0x6f2   :  { %v3086_v8 = vadd.f32 %v6513_v10, %v3045_v57 }
 0x6f4   :  { %v6530_v0 = vpop.f32.mrb[40].mxu1 }
 0x6f5   :  { %v6531_v13 = vpop.f32.mrb[41].mxu1 }
 0x6f6   :  { %v6532_v22 = vadd.f32 %v6531_v13, %v6530_v0  ;;  %v6533_v29 = vpop.f32.mrb[42].mxu1 }
 0x6f7   :  { %v6534_v33 = vpop.f32.mrb[43].mxu1 }
 0x6f8   :  { %v3124_v35 = vadd.f32 %v6532_v22, %v3083_v21  ;;  %v6535_v38 = vadd.f32 %v6534_v33, %v6533_v29  ;;  %v6935_v29 = vld [vmem:[%s8863_s4 + $0x10] sm:$0xff]   ;;  %v6936_v33 = vld [vmem:[%s8863_s4 + $0x18] sm:$0xff]  }
 0x6fa   :  { %v3127_v32 = vadd.f32 %v6535_v38, %v3086_v8  ;;  %v3130_v14 = vadd.f32 %v3124_v35, %v7596_v45 }
 0x6fc   :  { %v3134_v40 = vsel %vm85_vm1, %v3130_v14, 0.0  ;;  %v3131_v5 = vadd.f32 %v3127_v32, %v7598_v37  ;;  %v6933_v37 = vld [vmem:[%s8861_s2 + $0x10] sm:$0xff]  }
 0x6fd   :  { %3135 = vadd.xlane.f32.xlu1 %v3134_v40  ;;  %6761 = vmatpush3.bf16.msra.mxu0 %v6933_v37 }
 0x6fe   :  { %v3137_v41 = vsel %vm85_vm1, %v3131_v5, 0.0  ;;  %6762 = vmatprep.subr.bf16.mxu0 %v7179_v1 }
 0x6ff   :  { %3138 = vadd.xlane.f32.xlu0 %v3137_v41 }
 0x701   :  { %6763 = vmatpush3.bf16.msra.mxu0 %v6934_v63 }
 0x702   :  { %6776 = vmatprep.subr.bf16.mxu0 %v7179_v1 }
 0x78a   :  { %v3136_v42 = vpop.xlane.xlu1 %3135 }
 0x78b   :  { %v3140_v43 = vmul.f32 0.03125, %v3136_v42 }
 0x78c   :  { %v3139_v49 = vpop.xlane.xlu0 %3138 }
 0x78d   :  { %v3142_v52 = vsub.f32 %v3130_v14, %v3140_v43  ;;  %v3141_v54 = vmul.f32 0.03125, %v3139_v49 }
 0x78f   :  { %v3143_v48 = vsub.f32 %v3131_v5, %v3141_v54  ;;  %v3144_v17 = vmul.f32 %v3142_v52, %v3142_v52 }
 0x791   :  { %v3146_v7 = vsel %vm85_vm1, %v3144_v17, 0.0  ;;  %v3145_v36 = vmul.f32 %v3143_v48, %v3143_v48 }
 0x792   :  { %3147 = vadd.xlane.f32.xlu1 %v3146_v7 }
 0x793   :  { %v3149_v45 = vsel %vm85_vm1, %v3145_v36, 0.0 }
 0x794   :  { %3150 = vadd.xlane.f32.xlu0 %v3149_v45 }
 0x81f   :  { %v3148_v19 = vpop.xlane.xlu1 %3147 }
 0x820   :  { %v3152_v34 = vmul.f32 0.03125, %v3148_v19 }
 0x821   :  { %v3151_v47 = vpop.xlane.xlu0 %3150 }
 0x822   :  { %v3154_v4 = vadd.f32 1e-05, %v3152_v34  ;;  %v3153_v11 = vmul.f32 0.03125, %v3151_v47 }
 0x824   :  { %7135 = vrsqrt.f32 %v3154_v4  ;;  %v3155_v6 = vadd.f32 1e-05, %v3153_v11 }
 0x826   :  { %7137 = vrsqrt.f32 %v3155_v6 }
 0x82e   :  { %v7136_v28 = vpop.eup %7135 }
 0x82f   :  { %v3158_v46 = vmul.f32 %v7136_v28, %v3142_v52 }
 0x830   :  { %v7138_v50 = vpop.eup %7137 }
 0x831   :  { %v3166_v59 = vmul.f32 %v5851_v30, %v3158_v46  ;;  %v3159_v58 = vmul.f32 %v7138_v50, %v3143_v48 }
 0x833   :  { %v3167_v9 = vmul.f32 %v5851_v30, %v3159_v58  ;;  %v8187_v53 = vadd.f32 %v5852_v55, %v3166_v59 }
 0x835   :  { %v8189_v12 = vadd.f32 %v5852_v55, %v3167_v9 }
 0x837   :  { %v3176_v15 = vpack.c.bf16 %v8189_v12, %v8187_v53 }
 0x839   :  { %6765 = vmatmul.mubr.msk.bf16.vlgmr.msra.gmra.mrb[44].mxu0 %vm85_vm1, %v3176_v15 }
 0x83a   :  { %6780 = vmatprep.mubr.msk.bf16.mxu0 %vm7180_vm0, %v7179_v1  ;;  %6777 = vmatpush3.bf16.msra.mxu0 %v6935_v29 }
 0x83b   :  { %6778 = vmatprep.subr.bf16.mxu0 %v7179_v1 }
 0x83e   :  { %6779 = vmatpush3.bf16.msra.mxu0 %v6936_v33 }
 0x90c   :  { %v3239_v16 = vpop.f32.mrb[44].mxu0 }
 0x90d   :  { %v3240_v18 = vadd.f32 %v5858_v51, %v3239_v16  ;;  %v6766_v23 = vpop.f32.mrb[45].mxu0 }
 0x90e   :  { %v3242_v57 = vpop.f32.mrb[46].mxu0 }
 0x90f   :  { %v3243_v25 = vadd.f32 %v5858_v51, %v3242_v57  ;;  %3258 = vrot.lane.b32.xlu1 %v3240_v18, %s7182_s22  ;;  %v6767_v61 = vpop.f32.mrb[47].mxu0  ;;  %v3246_v24 = vmul.f32 0.5, %v3240_v18 }
 0x911   :  { %3260 = vrot.lane.b32.xlu0 %v3243_v25, %s7182_s22  ;;  %v3247_v44 = vmul.f32 0.5, %v3243_v25  ;;  %v3251_v21 = vrot.slane %v3246_v24, %v7308_v31 }
 0x913   :  { %3345 = vrot.lane.b32.xlu1 %v3240_v18, %s7181_s21  ;;  %v3255_v10 = vrot.slane %v3247_v44, %v7308_v31 }
 0x917   :  { %3347 = vrot.lane.b32.xlu1 %v3243_v25, %s7181_s21 }
 0x981   :  { %v3259_v27 = vpop.permute.xlu1 %3258 }
 0x982   :  { %v3264_v0 = vmul.f32 %v3259_v27, %v3251_v21 }
 0x983   :  { %v3261_v8 = vpop.permute.xlu0 %3260 }
 0x984   :  { %v3265_v13 = vmul.f32 %v3261_v8, %v3255_v10 }
 0x985   :  { %v3346_v4 = vpop.permute.xlu1 %3345 }
 0x986   :  { %v3266_v22 = vpack.c.bf16 %v3265_v13, %v3264_v0 }
 0x988   :  { %6773 = vmatmul.mubr.msk.bf16.vlgmr.msra.gmra.mrb[44].mxu1 %vm85_vm1, %v3266_v22 }
 0x989   :  { %3830 = vmatprep.mubr.bf16.mxu1 %v7184_v2  ;;  %v3348_v46 = vpop.permute.xlu1 %3347 }
 0xa5b   :  { %v3304_v35 = vpop.f32.mrb[44].mxu1 }
 0xa5c   :  { %v3311_v38 = vsel %vm85_vm1, %v3304_v35, -inf  ;;  %v6774_v32 = vpop.f32.mrb[45].mxu1 }
 0xa5d   :  { %v3312_v14 = vrot.slane %v3311_v38, 4  ;;  %v3307_v40 = vpop.f32.mrb[46].mxu1 }
 0xa5e   :  { %v3318_v5 = vsel %vm85_vm1, %v3307_v40, -inf  ;;  %v6775_v41 = vpop.f32.mrb[47].mxu1 }
 0xa5f   :  { %v3313_v42 = vmax.f32 %v3311_v38, %v3312_v14  ;;  %v3319_v43 = vrot.slane %v3318_v5, 4 }
 0xa61   :  { %v3314_v49 = vrot.slane %v3313_v42, 2  ;;  %v3320_v52 = vmax.f32 %v3318_v5, %v3319_v43 }
 0xa63   :  { %v3315_v54 = vmax.f32 %v3313_v42, %v3314_v49  ;;  %v3321_v48 = vrot.slane %v3320_v52, 2 }
 0xa65   :  { %v3316_v17 = vrot.slane %v3315_v54, 1  ;;  %v3322_v7 = vmax.f32 %v3320_v52, %v3321_v48 }
 0xa67   :  { %v3317_v36 = vmax.f32 %v3315_v54, %v3316_v17  ;;  %v3323_v45 = vrot.slane %v3322_v7, 1 }
 0xa69   :  { %v3325_v37 = vsub.f32 %v3304_v35, %v3317_v36  ;;  %v3324_v63 = vmax.f32 %v3322_v7, %v3323_v45  ;;  %v5868_v7 = vld [vmem:[%s8864_s5 + $0x1] ss:$0 sm:$0xff] }
 0xa6b   :  { %v3327_v19 = vmul.f32 1.442695, %v3325_v37  ;;  %v3326_v34 = vsub.f32 %v3307_v40, %v3324_v63 }
 0xa6d   :  { %7139 = vpow2.f32 %v3327_v19  ;;  %v3329_v47 = vmul.f32 1.442695, %v3326_v34 }
 0xa6f   :  { %7141 = vpow2.f32 %v3329_v47 }
 0xa77   :  { %v7140_v11 = vpop.eup %7139 }
 0xa78   :  { %v3331_v6 = vsel %vm85_vm1, %v7140_v11, 0.0  ;;  %v3351_v28 = vmul.f32 %v7140_v11, %v3346_v4 }
 0xa79   :  { %v7142_v30 = vpop.eup %7141  ;;  %v3332_v50 = vrot.slane %v3331_v6, 4 }
 0xa7a   :  { %v3353_v59 = vsel %vm85_vm1, %v3351_v28, 0.0  ;;  %v3338_v58 = vsel %vm85_vm1, %v7142_v30, 0.0  ;;  %v3352_v55 = vmul.f32 %v7142_v30, %v3348_v46 }
 0xa7b   :  { %v3333_v9 = vadd.f32 %v3332_v50, %v3331_v6  ;;  %v3354_v15 = vrot.slane %v3353_v59, 4  ;;  %v3339_v51 = vrot.slane %v3338_v58, 4 }
 0xa7c   :  { %v3360_v16 = vsel %vm85_vm1, %v3352_v55, 0.0 }
 0xa7d   :  { %v3334_v18 = vrot.slane %v3333_v9, 2  ;;  %v3340_v23 = vadd.f32 %v3339_v51, %v3338_v58  ;;  %v3361_v57 = vrot.slane %v3360_v16, 4  ;;  %v3355_v25 = vadd.f32 %v3354_v15, %v3353_v59 }
 0xa7f   :  { %v3335_v61 = vadd.f32 %v3334_v18, %v3333_v9  ;;  %v3341_v24 = vrot.slane %v3340_v23, 2  ;;  %v3362_v44 = vadd.f32 %v3361_v57, %v3360_v16  ;;  %v3356_v10 = vrot.slane %v3355_v25, 2  ;;  %v5884_v16 = vld [vmem:[%s8867_s8 + $0x140] sm:$0xff]  ;;  %v5877_v18 = vld [vmem:[%s8867_s8 + $0x108] sm:$0xff] }
 0xa80   :  { %v5885_v57 = vld [vmem:[%s8867_s8 + $0x148] sm:$0xff] }
 0xa81   :  { %v3336_v27 = vrot.slane %v3335_v61, 1  ;;  %v3342_v21 = vadd.f32 %v3341_v24, %v3340_v23  ;;  %v3363_v13 = vrot.slane %v3362_v44, 2  ;;  %v3357_v29 = vadd.f32 %v3356_v10, %v3355_v25 }
 0xa82   :  { %v5913_v24 = vcombine.high %v5877_v18, %v5885_v57 }
 0xa83   :  { %v3337_v8 = vadd.f32 %v3336_v27, %v3335_v61  ;;  %v3343_v0 = vrot.slane %v3342_v21, 1  ;;  %v3364_v33 = vadd.f32 %v3363_v13, %v3362_v44  ;;  %v3358_v35 = vrot.slane %v3357_v29, 1  ;;  %v5892_v44 = vld [vmem:[%s8867_s8 + $0x180] sm:$0xff] }
 0xa84   :  { %v5912_v61 = vcombine.low %v5877_v18, %v5885_v57  ;;  %3839 = vmatprep.subr.bf16.mxu0 %v5913_v24  ;;  %v5900_v27 = vld [vmem:[%s8867_s8 + $0x1c0] sm:$0xff]  ;;  %v5905_v24 = vld [vmem:[%s8867_s8 + $0x1e8] sm:$0xff] }
 0xa85   :  { %7143 = vrcp.f32 %v3337_v8  ;;  %v3344_v22 = vadd.f32 %v3343_v0, %v3342_v21  ;;  %v3365_v38 = vrot.slane %v3364_v33, 1  ;;  %v3359_v32 = vadd.f32 %v3358_v35, %v3357_v29  ;;  %v5893_v21 = vld [vmem:[%s8867_s8 + $0x188] sm:$0xff]  ;;  %v5878_v29 = vld [vmem:[%s8867_s8 + $0x110] sm:$0xff]  ;;  %v5879_v35 = vld [vmem:[%s8867_s8 + $0x118] sm:$0xff] }
 0xa86   :  { %v5927_v10 = vcombine.high %v5892_v44, %v5900_v27  ;;  %v5901_v8 = vld [vmem:[%s8867_s8 + $0x1c8] sm:$0xff]  ;;  %v5926_v0 = vcombine.low %v5892_v44, %v5900_v27  ;;  %v5896_v57 = vld [vmem:[%s8867_s8 + $0x1a0] sm:$0xff] }
 0xa87   :  { %7145 = vrcp.f32 %v3344_v22  ;;  %v3366_v40 = vadd.f32 %v3365_v38, %v3364_v33  ;;  %v5928_v13 = vcombine.low %v5893_v21, %v5901_v8  ;;  %v5929_v22 = vcombine.high %v5893_v21, %v5901_v8  ;;  %v5886_v33 = vld [vmem:[%s8867_s8 + $0x150] sm:$0xff] }
 0xa88   :  { %v5915_v38 = vcombine.high %v5878_v29, %v5886_v33  ;;  %v5882_v8 = vld [vmem:[%s8867_s8 + $0x130] sm:$0xff] }
 0xa8f   :  { %v7144_v14 = vpop.eup %7143 }
 0xa90   :  { %v3369_v5 = vmul.f32 %v7144_v14, %v3359_v32  ;;  %v5887_v32 = vld [vmem:[%s8867_s8 + $0x158] sm:$0xff]  ;;  %v5914_v14 = vcombine.low %v5878_v29, %v5886_v33 }
 0xa91   :  { %v7146_v41 = vpop.eup %7145 }
 0xa92   :  { %v3370_v42 = vmul.f32 %v7146_v41, %v3366_v40  ;;  %v3371_v43 = vpack.c.bf16 %v3369_v5, %v3369_v5  ;;  %v5916_v40 = vcombine.low %v5879_v35, %v5887_v32  ;;  %v5917_v5 = vcombine.high %v5879_v35, %v5887_v32  ;;  %v5898_v32 = vld [vmem:[%s8867_s8 + $0x1b0] sm:$0xff] }
 0xa94   :  { %v3372_v49 = vpack.c.bf16 %v3370_v42, %v3370_v42  ;;  %v3388_v52 = vunpack.c.l.b16 %v3371_v43 }
 0xa96   :  { %v3389_v54 = vunpack.c.l.b16 %v3372_v49 }
 0xa98   :  { %v3390_v48 = vsel %vm974_vm2, %v3389_v54, %v3388_v52  ;;  %v5874_v52 = vld [vmem:[%s8865_s6 + $0x1] ss:$0 sm:$0xff] }
 0xa99   :  { %v3391_v17 = vpack.c.b16 %v3390_v48, %v3390_v48 }
 0xa9b   :  { %6781 = vmatmul.mubr.msk.bf16.vlgmr.msra.gmra.mrb[48].mxu0 %vm85_vm1, %v3391_v17  ;;  %v5875_v17 = vld [vmem:[%s8866_s7 + $0x1] ss:$0 sm:$0xff] }
 0xa9c   :  { %3871 = vmatprep.mubr.bf16.mxu0 %v7184_v2  ;;  %3840 = vmatpush1.bf16.msra.mxu0 %v5912_v61  ;;  %v5897_v61 = vld [vmem:[%s8867_s8 + $0x1a8] sm:$0xff] }
 0xa9d   :  { %3841 = vmatprep.subr.bf16.mxu0 %v5929_v22  ;;  %v5891_v22 = vld [vmem:[%s8867_s8 + $0x178] sm:$0xff]  ;;  %v5936_v33 = vcombine.low %v5897_v61, %v5905_v24 }
 0xaa0   :  { %3842 = vmatpush1.bf16.msra.mxu0 %v5928_v13  ;;  %v5883_v13 = vld [vmem:[%s8867_s8 + $0x138] sm:$0xff] }
 0xaa1   :  { %3921 = vmatprep.subr.bf16.mxu0 %v5917_v5  ;;  %v5907_v5 = vld [vmem:[%s8867_s8 + $0x1f8] sm:$0xff] }
 0xb6e   :  { %v3441_v36 = vpop.f32.mrb[48].mxu0 }
 0xb6f   :  { %v3442_v45 = vadd.f32 %v5868_v7, %v3441_v36  ;;  %v6782_v37 = vpop.f32.mrb[49].mxu0 }
 0xb70   :  { %v3444_v63 = vpop.f32.mrb[50].mxu0 }
 0xb71   :  { %v3448_v19 = vrot.slane %v3442_v45, 1  ;;  %v6783_v34 = vpop.f32.mrb[51].mxu0  ;;  %v3451_v4 = vadd.f32 %v3442_v45, %v8187_v53  ;;  %v5876_v53 = vld [vmem:[%s8867_s8 + $0x100] sm:$0xff] }
 0xb72   :  { %v5911_v23 = vcombine.high %v5876_v53, %v5884_v16  ;;  %v5910_v25 = vcombine.low %v5876_v53, %v5884_v16 }
 0xb73   :  { %v3452_v47 = vadd.f32 %v3448_v19, %v8189_v12 }
 0xb74   :  { %3798 = vmatprep.subr.bf16.mxu1 %v5911_v23 }
 0xb75   :  { %v3459_v11 = vrot.slane %v3452_v47, 7  ;;  %3799 = vmatpush1.bf16.msra.mxu1 %v5910_v25  ;;  %v5904_v25 = vld [vmem:[%s8867_s8 + $0x1e0] sm:$0xff] }
 0xb76   :  { %3800 = vmatprep.subr.bf16.mxu1 %v5927_v10  ;;  %v5935_v21 = vcombine.high %v5896_v57, %v5904_v25  ;;  %v5937_v10 = vcombine.high %v5897_v61, %v5905_v24  ;;  %v5934_v29 = vcombine.low %v5896_v57, %v5904_v25  ;;  %v6964_v57 = vld [vmem:[%s8869_s10 + $0x4b0] sm:$0xff]   ;;  %v6965_v25 = vld [vmem:[%s8869_s10 + $0x478] sm:$0xff]  }
 0xb77   :  { %v3460_v6 = vsel %vm974_vm2, %v3459_v11, %v3451_v4  ;;  %v6966_v61 = vld [vmem:[%s8869_s10 + $0x4f8] sm:$0xff]  }
 0xb78   :  { %v3463_v28 = vsel %vm3462_vm9, %v3460_v6, 0.0  ;;  %v6967_v24 = vld [vmem:[%s8869_s10 + $0x438] sm:$0xff]  }
 0xb79   :  { %3464 = vadd.xlane.f32.xlu0 %v3463_v28  ;;  %3801 = vmatpush1.bf16.msra.mxu1 %v5926_v0  ;;  %v5902_v28 = vld [vmem:[%s8867_s8 + $0x1d0] sm:$0xff] }
 0xb7a   :  { %3880 = vmatprep.subr.bf16.mxu1 %v5915_v38  ;;  %v5890_v0 = vld [vmem:[%s8867_s8 + $0x170] sm:$0xff]  ;;  %v5925_v38 = vcombine.high %v5883_v13, %v5891_v22 }
 0xb7b   :  { %v5923_v35 = vcombine.high %v5882_v8, %v5890_v0 }
 0xc06   :  { %v3465_v30 = vpop.xlane.xlu0 %3464 }
 0xc07   :  { %v3466_v46 = vmul.f32 0.03125, %v3465_v30  ;;  %v5895_v30 = vld [vmem:[%s8867_s8 + $0x198] sm:$0xff] }
 0xc09   :  { %v3468_v50 = vrot.slane %v3466_v46, 1  ;;  %v3471_v59 = vsub.f32 %v3451_v4, %v3466_v46  ;;  %v5894_v4 = vld [vmem:[%s8867_s8 + $0x190] sm:$0xff]  ;;  %v5903_v46 = vld [vmem:[%s8867_s8 + $0x1d8] sm:$0xff] }
 0xc0a   :  { %v5930_v53 = vcombine.low %v5894_v4, %v5902_v28  ;;  %v5932_v16 = vcombine.low %v5895_v30, %v5903_v46 }
 0xc0b   :  { %v3472_v58 = vsub.f32 %v3452_v47, %v3468_v50  ;;  %v3473_v9 = vmul.f32 %v3471_v59, %v3471_v59 }
 0xc0d   :  { %v3474_v55 = vmul.f32 %v3472_v58, %v3472_v58 }
 0xc0f   :  { %v3477_v15 = vrot.slane %v3474_v55, 7  ;;  %v5933_v55 = vcombine.high %v5895_v30, %v5903_v46  ;;  %v6950_v30 = vld [vmem:[%s8869_s10 + $0x4d8] sm:$0xff]  }
 0xc10   :  { %v6951_v46 = vld [vmem:[%s8869_s10 + $0x418] sm:$0xff]  }
 0xc11   :  { %v3478_v51 = vsel %vm974_vm2, %v3477_v15, %v3473_v9  ;;  %v5880_v9 = vld [vmem:[%s8867_s8 + $0x120] sm:$0xff] }
 0xc12   :  { %v3480_v12 = vsel %vm3462_vm9, %v3478_v51, 0.0  ;;  %v5888_v15 = vld [vmem:[%s8867_s8 + $0x160] sm:$0xff]  ;;  %v5881_v51 = vld [vmem:[%s8867_s8 + $0x128] sm:$0xff] }
 0xc13   :  { %3481 = vadd.xlane.f32.xlu1 %v3480_v12  ;;  %v5889_v12 = vld [vmem:[%s8867_s8 + $0x168] sm:$0xff]  ;;  %v5919_v18 = vcombine.high %v5880_v9, %v5888_v15  ;;  %v5918_v44 = vcombine.low %v5880_v9, %v5888_v15  ;;  %v6956_v9 = vld [vmem:[%s8869_s10 + $0x4a0] sm:$0xff]  }
 0xc14   :  { %v5921_v23 = vcombine.high %v5881_v51, %v5889_v12  ;;  %v5920_v27 = vcombine.low %v5881_v51, %v5889_v12  ;;  %v6957_v15 = vld [vmem:[%s8869_s10 + $0x468] sm:$0xff]  }
 0xc15   :  { %v6958_v51 = vld [vmem:[%s8869_s10 + $0x4e8] sm:$0xff]  }
 0xc16   :  { %v6959_v12 = vld [vmem:[%s8869_s10 + $0x428] sm:$0xff]  }
 0xca0   :  { %v3482_v41 = vpop.xlane.xlu1 %3481 }
 0xca1   :  { %v3483_v42 = vmul.f32 0.03125, %v3482_v41  ;;  %v5922_v41 = vcombine.low %v5882_v8, %v5890_v0 }
 0xca3   :  { %v3484_v43 = vadd.f32 1e-05, %v3483_v42  ;;  %v5924_v42 = vcombine.low %v5883_v13, %v5891_v22 }
 0xca5   :  { %7147 = vrsqrt.f32 %v3484_v43 }
 0xcaf   :  { %v7148_v49 = vpop.eup %7147 }
 0xcb0   :  { %v3487_v54 = vrot.slane %v7148_v49, 1  ;;  %v3490_v48 = vmul.f32 %v7148_v49, %v3471_v59 }
 0xcb2   :  { %v3491_v7 = vmul.f32 %v3487_v54, %v3472_v58  ;;  %v3498_v36 = vmul.f32 %v5874_v52, %v3490_v48  ;;  %v5931_v58 = vcombine.high %v5894_v4, %v5902_v28  ;;  %v6937_v48 = vld [vmem:[%s8869_s10 + $0x440] sm:$0xff]   ;;  %v6946_v4 = vld [vmem:[%s8869_s10 + $0x4d0] sm:$0xff]   ;;  %v6949_v28 = vld [vmem:[%s8869_s10 + $0x458] sm:$0xff]  }
 0xcb4   :  { %v3499_v45 = vmul.f32 %v5874_v52, %v3491_v7  ;;  %v8274_v37 = vadd.f32 %v5875_v17, %v3498_v36  ;;  %v6939_v7 = vld [vmem:[%s8869_s10 + $0x400] sm:$0xff]  }
 0xcb5   :  { %v6940_v36 = vld [vmem:[%s8869_s10 + $0x480] sm:$0xff]  }
 0xcb6   :  { %v8276_v63 = vadd.f32 %v5875_v17, %v3499_v45  ;;  %v3508_v19 = vpack.c.bf16 %v8274_v37, %v8274_v37  ;;  %v6938_v17 = vld [vmem:[%s8869_s10 + $0x4c0] sm:$0xff]   ;;  %v6941_v45 = vld [vmem:[%s8869_s10 + $0x448] sm:$0xff]  }
 0xcb8   :  { %v3509_v34 = vpack.c.bf16 %v8276_v63, %v8276_v63  ;;  %v3630_v11 = vunpack.c.l.b16 %v3508_v19  ;;  %v6943_v19 = vld [vmem:[%s8869_s10 + $0x408] sm:$0xff]  }
 0xcba   :  { %v3631_v47 = vunpack.c.l.b16 %v3509_v34  ;;  %v6944_v34 = vld [vmem:[%s8869_s10 + $0x488] sm:$0xff]  }
 0xcbc   :  { %v3632_v6 = vrot.slane %v3631_v47, 7  ;;  %v6945_v47 = vld [vmem:[%s8869_s10 + $0x450] sm:$0xff]  }
 0xcbe   :  { %v3633_v50 = vsel %vm974_vm2, %v3632_v6, %v3630_v11  ;;  %v6947_v11 = vld [vmem:[%s8869_s10 + $0x410] sm:$0xff]  }
 0xcbf   :  { %v8295_v59 = vpack.c.b16 %v3633_v50, %v3633_v50  ;;  %v6948_v6 = vld [vmem:[%s8869_s10 + $0x490] sm:$0xff]   ;;  %v6952_v50 = vld [vmem:[%s8869_s10 + $0x498] sm:$0xff]  }
 0xcc1   :  { %5942 = vmatmul.mubr.msk.bf16.vlgmr.msra.gmra.mrb[48].mxu1 %vm85_vm1, %v8295_v59  ;;  %5943 = vmatmul.mubr.msk.bf16.vlgmr.msra.gmra.mrb[52].mxu0 %vm85_vm1, %v8295_v59 }
 0xcc2   :  { %3881 = vmatpush1.bf16.msra.mxu1 %v5914_v14  ;;  %3922 = vmatpush1.bf16.msra.mxu0 %v5916_v40  ;;  %v5906_v14 = vld [vmem:[%s8867_s8 + $0x1f0] sm:$0xff]  ;;  %v5899_v40 = vld [vmem:[%s8867_s8 + $0x1b8] sm:$0xff] }
 0xcc3   :  { %3882 = vmatprep.subr.bf16.mxu1 %v5931_v58  ;;  %3923 = vmatprep.subr.bf16.mxu0 %v5933_v55  ;;  %v5939_v43 = vcombine.high %v5898_v32, %v5906_v14  ;;  %v5941_v49 = vcombine.high %v5899_v40, %v5907_v5  ;;  %v5938_v52 = vcombine.low %v5898_v32, %v5906_v14  ;;  %v6954_v58 = vld [vmem:[%s8869_s10 + $0x4e0] sm:$0xff]  }
 0xcc4   :  { %3912 = vmatprep.mubr.bf16.mxu1 %v7184_v2  ;;  %3953 = vmatprep.mubr.bf16.mxu0 %v7184_v2  ;;  %v5940_v54 = vcombine.low %v5899_v40, %v5907_v5  ;;  %v6955_v55 = vld [vmem:[%s8869_s10 + $0x420] sm:$0xff]  }
 0xcc6   :  { %3883 = vmatpush1.bf16.msra.mxu1 %v5930_v53  ;;  %3924 = vmatpush1.bf16.msra.mxu0 %v5932_v16  ;;  %v6960_v53 = vld [vmem:[%s8869_s10 + $0x4a8] sm:$0xff]   ;;  %v6961_v16 = vld [vmem:[%s8869_s10 + $0x470] sm:$0xff]  }
 0xcc7   :  { %3962 = vmatprep.subr.bf16.mxu1 %v5919_v18  ;;  %4003 = vmatprep.subr.bf16.mxu0 %v5921_v23  ;;  %v6962_v18 = vld [vmem:[%s8869_s10 + $0x4f0] sm:$0xff]  }
 0xcc8   :  { %v6963_v23 = vld [vmem:[%s8869_s10 + $0x430] sm:$0xff]  }
 0xcc9   :  { %5944 = vmatmul.mubr.msk.bf16.vlgmr.msra.gmra.mrb[52].mxu1 %vm85_vm1, %v8295_v59  ;;  %5945 = vmatmul.mubr.msk.bf16.vlgmr.msra.gmra.mrb[56].mxu0 %vm85_vm1, %v8295_v59 }
 0xcca   :  { %3963 = vmatpush1.bf16.msra.mxu1 %v5918_v44  ;;  %4004 = vmatpush1.bf16.msra.mxu0 %v5920_v27  ;;  %v6968_v44 = vld [vmem:[%s8869_s10 + $0x4b8] sm:$0xff]   ;;  %v6969_v27 = vld [vmem:[%s8869_s10 + $0x540] sm:$0xff]  }
 0xccb   :  { %3964 = vmatprep.subr.bf16.mxu1 %v5935_v21  ;;  %4005 = vmatprep.subr.bf16.mxu0 %v5937_v10  ;;  %v6970_v21 = vld [vmem:[%s8869_s10 + $0x5c0] sm:$0xff]   ;;  %v8472_v10 = vld [vmem:[%s8868_s9 + $0x10] sm:$0xff] }
 0xccc   :  { %3994 = vmatprep.mubr.bf16.mxu1 %v7184_v2  ;;  %4035 = vmatprep.mubr.bf16.mxu0 %v7184_v2  ;;  %v3551_v8 = vrot.slane %v8472_v10, %v7308_v31  ;;  %v3559_v0 = vrot.slane %v8472_v10, %v7799_v3  ;;  %v3555_v13 = vrot.slane %v8472_v10, %v7785_v26 }
 0xccd   :  { %v3563_v22 = vrot.slane %v8472_v10, %v7807_v60 }
 0xcce   :  { %3965 = vmatpush1.bf16.msra.mxu1 %v5934_v29  ;;  %4006 = vmatpush1.bf16.msra.mxu0 %v5936_v33 }
 0xccf   :  { %4044 = vmatprep.subr.bf16.mxu1 %v5923_v35  ;;  %4085 = vmatprep.subr.bf16.mxu0 %v5925_v38 }
 0xcd1   :  { %5946 = vmatmul.mubr.msk.bf16.vlgmr.msra.gmra.mrb[56].mxu1 %vm85_vm1, %v8295_v59  ;;  %5947 = vmatmul.mubr.msk.bf16.vlgmr.msra.gmra.mrb[60].mxu0 %vm85_vm1, %v8295_v59 }
 0xcd2   :  { %4045 = vmatpush1.bf16.msra.mxu1 %v5922_v41  ;;  %4086 = vmatpush1.bf16.msra.mxu0 %v5924_v42 }
 0xcd3   :  { %4046 = vmatprep.subr.bf16.mxu1 %v5939_v43  ;;  %4087 = vmatprep.subr.bf16.mxu0 %v5941_v49 }
 0xcd4   :  { %4076 = vmatprep.mubr.bf16.mxu1 %v7184_v2  ;;  %4117 = vmatprep.mubr.bf16.mxu0 %v7184_v2  ;;  %v6942_v2 = vld [vmem:[%s8869_s10 + $0x4c8] sm:$0xff]  }
 0xcd6   :  { %4047 = vmatpush1.bf16.msra.mxu1 %v5938_v52  ;;  %4088 = vmatpush1.bf16.msra.mxu0 %v5940_v54 }
 0xcd7   :  { %6545 = vmatprep.subr.bf16.mxu1 %v6937_v48  ;;  %6567 = vmatprep.subr.bf16.mxu0 %v6938_v17 }
 0xcd9   :  { %5948 = vmatmul.mubr.msk.bf16.vlgmr.msra.gmra.mrb[60].mxu1 %vm85_vm1, %v8295_v59  ;;  %5949 = vmatmul.mubr.msk.bf16.vlgmr.msra.gmra.mrb[64].mxu0 %vm85_vm1, %v8295_v59  ;;  %v6953_v59 = vld [vmem:[%s8869_s10 + $0x460] sm:$0xff]  }
 0xcda   :  { %6546 = vmatpush3.bf16.msra.mxu1 %v6939_v7  ;;  %6568 = vmatpush3.bf16.msra.mxu0 %v6940_v36 }
 0xcdb   :  { %6547 = vmatprep.subr.bf16.mxu1 %v6941_v45  ;;  %6569 = vmatprep.subr.bf16.mxu0 %v6942_v2  ;;  %v3571_v45 = vrot.slane %v8472_v10, %v7828_v39  ;;  %v3579_v2 = vrot.slane %v8472_v10, %v7788_v62 }
 0xcde   :  { %6548 = vmatpush3.bf16.msra.mxu1 %v6943_v19  ;;  %6570 = vmatpush3.bf16.msra.mxu0 %v6944_v34  ;;  %v6971_v19 = vld [vmem:[%s8869_s10 + $0x500] sm:$0xff]  }
 0xcdf   :  { %6549 = vmatprep.subr.bf16.mxu1 %v6945_v47  ;;  %6571 = vmatprep.subr.bf16.mxu0 %v6946_v4  ;;  %v6972_v34 = vld [vmem:[%s8869_s10 + $0x580] sm:$0xff]  }
 0xce2   :  { %6550 = vmatpush3.bf16.msra.mxu1 %v6947_v11  ;;  %6572 = vmatpush3.bf16.msra.mxu0 %v6948_v6  ;;  %v6973_v11 = vld [vmem:[%s8869_s10 + $0x548] sm:$0xff]  }
 0xce3   :  { %6551 = vmatprep.subr.bf16.mxu1 %v6949_v28  ;;  %6573 = vmatprep.subr.bf16.mxu0 %v6950_v30  ;;  %v6974_v6 = vld [vmem:[%s8869_s10 + $0x5c8] sm:$0xff]  }
 0xce6   :  { %6552 = vmatpush3.bf16.msra.mxu1 %v6951_v46  ;;  %6574 = vmatpush3.bf16.msra.mxu0 %v6952_v50 }
 0xce7   :  { %6553 = vmatprep.subr.bf16.mxu1 %v6953_v59  ;;  %6575 = vmatprep.subr.bf16.mxu0 %v6954_v58 }
 0xcea   :  { %6554 = vmatpush3.bf16.msra.mxu1 %v6955_v55  ;;  %6576 = vmatpush3.bf16.msra.mxu0 %v6956_v9 }
 0xceb   :  { %6555 = vmatprep.subr.bf16.mxu1 %v6957_v15  ;;  %6577 = vmatprep.subr.bf16.mxu0 %v6958_v51  ;;  %v6975_v15 = vld [vmem:[%s8869_s10 + $0x508] sm:$0xff]  }
 0xcec   :  { %v6976_v51 = vld [vmem:[%s8869_s10 + $0x588] sm:$0xff]  }
 0xcee   :  { %6556 = vmatpush3.bf16.msra.mxu1 %v6959_v12  ;;  %6578 = vmatpush3.bf16.msra.mxu0 %v6960_v53 }
 0xcef   :  { %6557 = vmatprep.subr.bf16.mxu1 %v6961_v16  ;;  %6579 = vmatprep.subr.bf16.mxu0 %v6962_v18  ;;  %v6977_v16 = vld [vmem:[%s8869_s10 + $0x550] sm:$0xff]  }
 0xcf0   :  { %v6978_v18 = vld [vmem:[%s8869_s10 + $0x5d0] sm:$0xff]  }
 0xcf2   :  { %6558 = vmatpush3.bf16.msra.mxu1 %v6963_v23  ;;  %6580 = vmatpush3.bf16.msra.mxu0 %v6964_v57 }
 0xcf3   :  { %6559 = vmatprep.subr.bf16.mxu1 %v6965_v25  ;;  %6581 = vmatprep.subr.bf16.mxu0 %v6966_v61 }
 0xcf6   :  { %6560 = vmatpush3.bf16.msra.mxu1 %v6967_v24  ;;  %6582 = vmatpush3.bf16.msra.mxu0 %v6968_v44  ;;  %v6979_v24 = vld [vmem:[%s8869_s10 + $0x510] sm:$0xff]  }
 0xcf7   :  { %6589 = vmatprep.subr.bf16.mxu1 %v6969_v27  ;;  %6611 = vmatprep.subr.bf16.mxu0 %v6970_v21  ;;  %v6980_v44 = vld [vmem:[%s8869_s10 + $0x590] sm:$0xff]   ;;  %v6981_v27 = vld [vmem:[%s8869_s10 + $0x558] sm:$0xff]  }
 0xcf8   :  { %v6982_v21 = vld [vmem:[%s8869_s10 + $0x5d8] sm:$0xff]  }
 0xd94   :  { %v3832_v29 = vpop.f32.mrb[48].mxu1  ;;  %v3873_v33 = vpop.f32.mrb[52].mxu0 }
 0xd95   :  { %v3833_v35 = vadd.f32 %v3832_v29, %v3551_v8  ;;  %v3874_v38 = vadd.f32 %v3873_v33, %v3559_v0  ;;  %v3834_v32 = vpop.f32.mrb[49].mxu1  ;;  %v3875_v14 = vpop.f32.mrb[53].mxu0 }
 0xd96   :  { %v3835_v40 = vadd.f32 %v3834_v32, %v3555_v13  ;;  %v3876_v5 = vadd.f32 %v3875_v14, %v3563_v22  ;;  %v3836_v41 = vpop.f32.mrb[50].mxu1  ;;  %v3877_v42 = vpop.f32.mrb[54].mxu0 }
 0xd97   :  { %v4126_v43 = vmax.f32 %v3833_v35, 0.0  ;;  %v4128_v49 = vmax.f32 %v3874_v38, 0.0  ;;  %v3837_v52 = vpop.f32.mrb[51].mxu1  ;;  %v3878_v54 = vpop.f32.mrb[55].mxu0  ;;  %v6983_v35 = vld [vmem:[%s8869_s10 + $0x518] sm:$0xff]  }
 0xd98   :  { %v4127_v48 = vmax.f32 %v3835_v40, 0.0  ;;  %v4129_v17 = vmax.f32 %v3876_v5, 0.0  ;;  %v6984_v38 = vld [vmem:[%s8869_s10 + $0x598] sm:$0xff]   ;;  %v6985_v40 = vld [vmem:[%s8869_s10 + $0x560] sm:$0xff]   ;;  %v6989_v52 = vld [vmem:[%s8869_s10 + $0x568] sm:$0xff]  }
 0xd99   :  { %v4142_v47 = vpack.c.bf16 %v4126_v43, %v4126_v43  ;;  %v4144_v4 = vpack.c.bf16 %v4128_v49, %v4128_v49  ;;  %v6986_v5 = vld [vmem:[%s8869_s10 + $0x5e0] sm:$0xff]   ;;  %v8545_v41 = vld [vmem:[%s8868_s9 + $0x18] sm:$0xff]  ;;  %v6990_v54 = vld [vmem:[%s8869_s10 + $0x5e8] sm:$0xff]  }
 0xd9a   :  { %v4143_v7 = vpack.c.bf16 %v4127_v48, %v4127_v48  ;;  %v4145_v36 = vpack.c.bf16 %v4129_v17, %v4129_v17  ;;  %v3607_v42 = vrot.slane %v8545_v41, %v7777_v56  ;;  %v6987_v43 = vld [vmem:[%s8869_s10 + $0x520] sm:$0xff]  }
 0xd9b   :  { %v6988_v49 = vld [vmem:[%s8869_s10 + $0x5a0] sm:$0xff]  }
 0xd9c   :  { %v8498_v28 = vpop.f32.mrb[52].mxu1  ;;  %v8500_v30 = vpop.f32.mrb[56].mxu0  ;;  %5223 = vmatprep.mubr.bf16.mxu1 %v4143_v7  ;;  %5263 = vmatprep.mubr.bf16.mxu0 %v4145_v36 }
 0xd9d   :  { %v3916_v46 = vpop.f32.mrb[53].mxu1  ;;  %v3957_v50 = vpop.f32.mrb[57].mxu0  ;;  %5224 = vmatmul.mubr.bf16.vlgmr.msra.gmra.mrb[64].mxu1 %v4142_v47  ;;  %5264 = vmatmul.mubr.bf16.vlgmr.msra.gmra.mrb[68].mxu0 %v4144_v4  ;;  %v6992_v47 = vld [vmem:[%s8869_s10 + $0x5a8] sm:$0xff]   ;;  %v3567_v4 = vrot.slane %v8472_v10, %v7820_v20 }
 0xd9e   :  { %v3917_v59 = vadd.f32 %v3916_v46, %v3571_v45  ;;  %v3958_v58 = vadd.f32 %v3957_v50, %v3579_v2  ;;  %6590 = vmatpush3.bf16.msra.mxu1 %v6971_v19  ;;  %6612 = vmatpush3.bf16.msra.mxu0 %v6972_v34  ;;  %v3918_v55 = vpop.f32.mrb[54].mxu1  ;;  %v3959_v9 = vpop.f32.mrb[58].mxu0  ;;  %v6991_v34 = vld [vmem:[%s8869_s10 + $0x528] sm:$0xff]   ;;  %v6993_v50 = vld [vmem:[%s8869_s10 + $0x570] sm:$0xff]  }
 0xd9f   :  { %v3919_v12 = vpop.f32.mrb[55].mxu1  ;;  %v3960_v53 = vpop.f32.mrb[59].mxu0  ;;  %6591 = vmatprep.subr.bf16.mxu1 %v6973_v11  ;;  %6613 = vmatprep.subr.bf16.mxu0 %v6974_v6  ;;  %v3575_v11 = vrot.slane %v8472_v10, %v7777_v56  ;;  %v3595_v55 = vrot.slane %v8545_v41, %v7807_v60  ;;  %v6995_v56 = vld [vmem:[%s8869_s10 + $0x530] sm:$0xff]   ;;  %v3915_v9 = vadd.f32 %v8498_v28, %v3567_v4  ;;  %v6998_v60 = vld [vmem:[%s8869_s10 + $0x5f8] sm:$0xff]  }
 0xda0   :  { %v4131_v23 = vmax.f32 %v3917_v59, 0.0  ;;  %v4133_v57 = vmax.f32 %v3958_v58, 0.0  ;;  %v6994_v59 = vld [vmem:[%s8869_s10 + $0x5f0] sm:$0xff]   ;;  %v3587_v58 = vrot.slane %v8545_v41, %v7785_v26  ;;  %v6997_v26 = vld [vmem:[%s8869_s10 + $0x578] sm:$0xff]   ;;  %v3583_v4 = vrot.slane %v8545_v41, %v7308_v31 }
 0xda1   :  { %v6996_v10 = vld [vmem:[%s8869_s10 + $0x5b0] sm:$0xff]   ;;  %v6999_v28 = vld [vmem:[%s8869_s10 + $0x538] sm:$0xff]   ;;  %v4130_v53 = vmax.f32 %v3915_v9, 0.0  ;;  %v3603_v31 = vrot.slane %v8545_v41, %v7828_v39 }
 0xda2   :  { %v4147_v25 = vpack.c.bf16 %v4131_v23, %v4131_v23  ;;  %v4149_v61 = vpack.c.bf16 %v4133_v57, %v4133_v57  ;;  %6592 = vmatpush3.bf16.msra.mxu1 %v6975_v15  ;;  %6614 = vmatpush3.bf16.msra.mxu0 %v6976_v51  ;;  %v3956_v15 = vadd.f32 %v8500_v30, %v3575_v11  ;;  %v7000_v30 = vld [vmem:[%s8869_s10 + $0x5b8] sm:$0xff]   ;;  %v7002_v23 = vld [vmem:[%s8869_s10 + $0x6c0] sm:$0xff]   ;;  %v7024_v11 = vld [vmem:[%s8869_s10 + $0x6a8] sm:$0xff]  }
 0xda3   :  { %6593 = vmatprep.subr.bf16.mxu1 %v6977_v16  ;;  %6615 = vmatprep.subr.bf16.mxu0 %v6978_v18  ;;  %v7001_v18 = vld [vmem:[%s8869_s10 + $0x640] sm:$0xff]   ;;  %v7029_v39 = vld [vmem:[%s8869_s10 + $0x678] sm:$0xff]  }
 0xda4   :  { %v8526_v8 = vpop.f32.mrb[56].mxu1  ;;  %v8528_v0 = vpop.f32.mrb[60].mxu0  ;;  %5303 = vmatprep.mubr.bf16.mxu1 %v4147_v25  ;;  %5343 = vmatprep.mubr.bf16.mxu0 %v4149_v61  ;;  %v4132_v16 = vmax.f32 %v3956_v15, 0.0  ;;  %v7003_v61 = vld [vmem:[%s8869_s10 + $0x600] sm:$0xff]   ;;  %v7031_v9 = vld [vmem:[%s8869_s10 + $0x638] sm:$0xff]  }
 0xda5   :  { %v3998_v13 = vpop.f32.mrb[57].mxu1  ;;  %v4039_v22 = vpop.f32.mrb[61].mxu0 }
 0xda6   :  { %6594 = vmatpush3.bf16.msra.mxu1 %v6979_v24  ;;  %6616 = vmatpush3.bf16.msra.mxu0 %v6980_v44  ;;  %v4000_v29 = vpop.f32.mrb[58].mxu1  ;;  %v4041_v33 = vpop.f32.mrb[62].mxu0  ;;  %v3999_v51 = vadd.f32 %v3998_v13, %v3587_v58  ;;  %v4040_v12 = vadd.f32 %v4039_v22, %v3595_v55  ;;  %v4146_v24 = vpack.c.bf16 %v4130_v53, %v4130_v53  ;;  %v7005_v13 = vld [vmem:[%s8869_s10 + $0x648] sm:$0xff]   ;;  %v7027_v58 = vld [vmem:[%s8869_s10 + $0x630] sm:$0xff]  }
 0xda7   :  { %v4001_v32 = vpop.f32.mrb[59].mxu1  ;;  %v4042_v14 = vpop.f32.mrb[63].mxu0  ;;  %6595 = vmatprep.subr.bf16.mxu1 %v6981_v27  ;;  %6617 = vmatprep.subr.bf16.mxu0 %v6982_v21  ;;  %v4148_v44 = vpack.c.bf16 %v4132_v16, %v4132_v16  ;;  %v7004_v27 = vld [vmem:[%s8869_s10 + $0x680] sm:$0xff]   ;;  %v7006_v22 = vld [vmem:[%s8869_s10 + $0x6c8] sm:$0xff]   ;;  %v3997_v55 = vadd.f32 %v8526_v8, %v3583_v4 }
 0xda8   :  { %v4135_v57 = vmax.f32 %v3999_v51, 0.0  ;;  %v4137_v25 = vmax.f32 %v4040_v12, 0.0  ;;  %v7007_v33 = vld [vmem:[%s8869_s10 + $0x608] sm:$0xff]   ;;  %v7010_v32 = vld [vmem:[%s8869_s10 + $0x6d0] sm:$0xff]   ;;  %v7035_v12 = vld [vmem:[%s8869_s10 + $0x700] sm:$0xff]  }
 0xda9   :  { %v7011_v14 = vld [vmem:[%s8869_s10 + $0x610] sm:$0xff]   ;;  %v4134_v15 = vmax.f32 %v3997_v55, 0.0  ;;  %v7037_v16 = vld [vmem:[%s8869_s10 + $0x748] sm:$0xff]  }
 0xdaa   :  { %6596 = vmatpush3.bf16.msra.mxu1 %v6983_v35  ;;  %6618 = vmatpush3.bf16.msra.mxu0 %v6984_v38  ;;  %v4151_v21 = vpack.c.bf16 %v4135_v57, %v4135_v57  ;;  %v4153_v29 = vpack.c.bf16 %v4137_v25, %v4137_v25  ;;  %v7008_v35 = vld [vmem:[%s8869_s10 + $0x688] sm:$0xff]   ;;  %v7009_v38 = vld [vmem:[%s8869_s10 + $0x650] sm:$0xff]  }
 0xdab   :  { %6597 = vmatprep.subr.bf16.mxu1 %v6985_v40  ;;  %6619 = vmatprep.subr.bf16.mxu0 %v6986_v5  ;;  %v7012_v40 = vld [vmem:[%s8869_s10 + $0x690] sm:$0xff]   ;;  %v7013_v5 = vld [vmem:[%s8869_s10 + $0x658] sm:$0xff]   ;;  %v7039_v25 = vld [vmem:[%s8869_s10 + $0x708] sm:$0xff]  }
 0xdac   :  { %v8561_v48 = vpop.f32.mrb[60].mxu1  ;;  %v4119_v17 = vpop.f32.mrb[64].mxu0 }
 0xdad   :  { %v8563_v7 = vadd.f32 %v4119_v17, %v3607_v42  ;;  %v8565_v36 = vpop.f32.mrb[61].mxu1  ;;  %v8567_v45 = vpop.f32.mrb[65].mxu0  ;;  %v7014_v42 = vld [vmem:[%s8869_s10 + $0x6d8] sm:$0xff]   ;;  %v7019_v17 = vld [vmem:[%s8869_s10 + $0x620] sm:$0xff]  }
 0xdae   :  { %6598 = vmatpush3.bf16.msra.mxu1 %v6987_v43  ;;  %6620 = vmatpush3.bf16.msra.mxu0 %v6988_v49  ;;  %v4082_v2 = vpop.f32.mrb[62].mxu1  ;;  %v4123_v19 = vpop.f32.mrb[66].mxu0  ;;  %v7015_v43 = vld [vmem:[%s8869_s10 + $0x618] sm:$0xff]  }
 0xdaf   :  { %v4083_v6 = vpop.f32.mrb[63].mxu1  ;;  %v4124_v46 = vpop.f32.mrb[67].mxu0  ;;  %6599 = vmatprep.subr.bf16.mxu1 %v6989_v52  ;;  %6621 = vmatprep.subr.bf16.mxu0 %v6990_v54  ;;  %v7016_v49 = vld [vmem:[%s8869_s10 + $0x698] sm:$0xff]   ;;  %v7017_v52 = vld [vmem:[%s8869_s10 + $0x660] sm:$0xff]   ;;  %v7021_v19 = vld [vmem:[%s8869_s10 + $0x668] sm:$0xff]   ;;  %v4140_v4 = vmax.f32 %v8563_v7, 0.0 }
 0xdb0   :  { %v7018_v54 = vld [vmem:[%s8869_s10 + $0x6e0] sm:$0xff]   ;;  %v7025_v6 = vld [vmem:[%s8869_s10 + $0x670] sm:$0xff]   ;;  %v3591_v46 = vrot.slane %v8545_v41, %v7799_v3 }
 0xdb1   :  { %v7020_v2 = vld [vmem:[%s8869_s10 + $0x6a0] sm:$0xff]   ;;  %v7028_v3 = vld [vmem:[%s8869_s10 + $0x6b0] sm:$0xff]  }
 0xdb2   :  { %6600 = vmatpush3.bf16.msra.mxu1 %v6991_v34  ;;  %6622 = vmatpush3.bf16.msra.mxu0 %v6992_v47  ;;  %v7022_v34 = vld [vmem:[%s8869_s10 + $0x6e8] sm:$0xff]  }
 0xdb3   :  { %6601 = vmatprep.subr.bf16.mxu1 %v6993_v50  ;;  %6623 = vmatprep.subr.bf16.mxu0 %v6994_v59  ;;  %v7023_v47 = vld [vmem:[%s8869_s10 + $0x628] sm:$0xff]   ;;  %v7026_v50 = vld [vmem:[%s8869_s10 + $0x6f0] sm:$0xff]   ;;  %v3611_v59 = vrot.slane %v8545_v41, %v7788_v62  ;;  %v7030_v62 = vld [vmem:[%s8869_s10 + $0x6f8] sm:$0xff]  }
 0xdb5   :  { %v4122_v8 = vadd.f32 %v8567_v45, %v3611_v59 }
 0xdb6   :  { %6602 = vmatpush3.bf16.msra.mxu1 %v6995_v56  ;;  %6624 = vmatpush3.bf16.msra.mxu0 %v6996_v10  ;;  %v4038_v56 = vadd.f32 %v8528_v0, %v3591_v46  ;;  %v4081_v10 = vadd.f32 %v8565_v36, %v3603_v31  ;;  %v7032_v0 = vld [vmem:[%s8869_s10 + $0x6b8] sm:$0xff]   ;;  %v7034_v36 = vld [vmem:[%s8869_s10 + $0x7c0] sm:$0xff]  }
 0xdb7   :  { %6603 = vmatprep.subr.bf16.mxu1 %v6997_v26  ;;  %6625 = vmatprep.subr.bf16.mxu0 %v6998_v60  ;;  %v7033_v26 = vld [vmem:[%s8869_s10 + $0x740] sm:$0xff]   ;;  %v4141_v51 = vmax.f32 %v4122_v8, 0.0 }
 0xdb8   :  { %v4136_v60 = vmax.f32 %v4038_v56, 0.0  ;;  %v4139_v45 = vmax.f32 %v4081_v10, 0.0  ;;  %v6207_v31 = vld [vmem:[%s8870_s11 + $0x1] ss:$0 sm:$0xff] }
 0xdb9   :  { %v4157_v57 = vpack.c.bf16 %v4141_v51, %v4141_v51 }
 0xdba   :  { %6604 = vmatpush3.bf16.msra.mxu1 %v6999_v28  ;;  %6626 = vmatpush3.bf16.msra.mxu0 %v7000_v30  ;;  %v4150_v28 = vpack.c.bf16 %v4134_v15, %v4134_v15  ;;  %v7036_v30 = vld [vmem:[%s8869_s10 + $0x780] sm:$0xff]   ;;  %v4152_v53 = vpack.c.bf16 %v4136_v60, %v4136_v60 }
 0xdbb   :  { %6633 = vmatprep.subr.bf16.mxu1 %v7001_v18  ;;  %6655 = vmatprep.subr.bf16.mxu0 %v7002_v23  ;;  %v4155_v18 = vpack.c.bf16 %v4139_v45, %v4139_v45  ;;  %v7038_v23 = vld [vmem:[%s8869_s10 + $0x7c8] sm:$0xff]  }
 0xdbd   :  { %5304 = vmatmul.mubr.bf16.vlgmr.msra.gmra.mrb[68].mxu1 %v4146_v24  ;;  %5344 = vmatmul.mubr.bf16.vlgmr.msra.gmra.mrb[72].mxu0 %v4148_v44  ;;  %v7041_v24 = vld [vmem:[%s8869_s10 + $0x750] sm:$0xff]  }
 0xdbe   :  { %6634 = vmatpush3.bf16.msra.mxu1 %v7003_v61  ;;  %5383 = vmatprep.mubr.bf16.mxu1 %v4151_v21  ;;  %v7040_v61 = vld [vmem:[%s8869_s10 + $0x788] sm:$0xff]   ;;  %v7042_v44 = vld [vmem:[%s8869_s10 + $0x7d0] sm:$0xff]  }
 0xdbf   :  { %6656 = vmatpush3.bf16.msra.mxu0 %v7004_v27  ;;  %5423 = vmatprep.mubr.bf16.mxu0 %v4153_v29  ;;  %v7043_v27 = vld [vmem:[%s8869_s10 + $0x710] sm:$0xff]   ;;  %v7047_v29 = vld [vmem:[%s8869_s10 + $0x718] sm:$0xff]  }
 0xdc0   :  { %6635 = vmatprep.subr.bf16.mxu1 %v7005_v13  ;;  %6657 = vmatprep.subr.bf16.mxu0 %v7006_v22  ;;  %v7044_v21 = vld [vmem:[%s8869_s10 + $0x790] sm:$0xff]   ;;  %v7045_v13 = vld [vmem:[%s8869_s10 + $0x758] sm:$0xff]  }
 0xdc1   :  { %v7046_v22 = vld [vmem:[%s8869_s10 + $0x7d8] sm:$0xff]  }
 0xdc2   :  { %6636 = vmatpush3.bf16.msra.mxu1 %v7007_v33  ;;  %v7048_v33 = vld [vmem:[%s8869_s10 + $0x798] sm:$0xff]  }
 0xdc3   :  { %6658 = vmatpush3.bf16.msra.mxu0 %v7008_v35  ;;  %6637 = vmatprep.subr.bf16.mxu1 %v7009_v38  ;;  %v7049_v35 = vld [vmem:[%s8869_s10 + $0x760] sm:$0xff]  }
 0xdc4   :  { %6659 = vmatprep.subr.bf16.mxu0 %v7010_v32  ;;  %v7050_v38 = vld [vmem:[%s8869_s10 + $0x7e0] sm:$0xff]  }
 0xdc5   :  { %v7051_v32 = vld [vmem:[%s8869_s10 + $0x720] sm:$0xff]  }
 0xdc6   :  { %6638 = vmatpush3.bf16.msra.mxu1 %v7011_v14  ;;  %v7052_v14 = vld [vmem:[%s8869_s10 + $0x7a0] sm:$0xff]  }
 0xdc7   :  { %6660 = vmatpush3.bf16.msra.mxu0 %v7012_v40  ;;  %6639 = vmatprep.subr.bf16.mxu1 %v7013_v5  ;;  %v7053_v40 = vld [vmem:[%s8869_s10 + $0x768] sm:$0xff]  }
 0xdc8   :  { %6661 = vmatprep.subr.bf16.mxu0 %v7014_v42  ;;  %v7054_v5 = vld [vmem:[%s8869_s10 + $0x7e8] sm:$0xff]  }
 0xdc9   :  { %v7055_v42 = vld [vmem:[%s8869_s10 + $0x728] sm:$0xff]  }
 0xdca   :  { %6640 = vmatpush3.bf16.msra.mxu1 %v7015_v43  ;;  %v3599_v43 = vrot.slane %v8545_v41, %v7820_v20  ;;  %v7059_v20 = vld [vmem:[%s8869_s10 + $0x730] sm:$0xff]  }
 0xdcb   :  { %6662 = vmatpush3.bf16.msra.mxu0 %v7016_v49  ;;  %6641 = vmatprep.subr.bf16.mxu1 %v7017_v52  ;;  %v7056_v49 = vld [vmem:[%s8869_s10 + $0x7a8] sm:$0xff]   ;;  %v7057_v52 = vld [vmem:[%s8869_s10 + $0x770] sm:$0xff]  }
 0xdcc   :  { %6663 = vmatprep.subr.bf16.mxu0 %v7018_v54  ;;  %v7058_v54 = vld [vmem:[%s8869_s10 + $0x7f0] sm:$0xff]   ;;  %v4079_v41 = vadd.f32 %v8561_v48, %v3599_v43  ;;  %v7063_v48 = vld [vmem:[%s8869_s10 + $0x738] sm:$0xff]  }
 0xdce   :  { %6642 = vmatpush3.bf16.msra.mxu1 %v7019_v17  ;;  %v7060_v17 = vld [vmem:[%s8869_s10 + $0x7b0] sm:$0xff]  }
 0xdcf   :  { %6664 = vmatpush3.bf16.msra.mxu0 %v7020_v2  ;;  %6643 = vmatprep.subr.bf16.mxu1 %v7021_v19  ;;  %v7061_v2 = vld [vmem:[%s8869_s10 + $0x778] sm:$0xff]  }
 0xdd0   :  { %6665 = vmatprep.subr.bf16.mxu0 %v7022_v34  ;;  %v7062_v19 = vld [vmem:[%s8869_s10 + $0x7f8] sm:$0xff]   ;;  %v4138_v34 = vmax.f32 %v4079_v41, 0.0 }
 0xdd2   :  { %6644 = vmatpush3.bf16.msra.mxu1 %v7023_v47  ;;  %v7064_v47 = vld [vmem:[%s8869_s10 + $0x7b8] sm:$0xff]  }
 0xdd3   :  { %6666 = vmatpush3.bf16.msra.mxu0 %v7024_v11  ;;  %6645 = vmatprep.subr.bf16.mxu1 %v7025_v6  ;;  %v4154_v11 = vpack.c.bf16 %v4138_v34, %v4138_v34  ;;  %v4156_v6 = vpack.c.bf16 %v4140_v4, %v4140_v4 }
 0xdd4   :  { %6667 = vmatprep.subr.bf16.mxu0 %v7026_v50 }
 0xdd6   :  { %6646 = vmatpush3.bf16.msra.mxu1 %v7027_v58 }
 0xdd7   :  { %6668 = vmatpush3.bf16.msra.mxu0 %v7028_v3  ;;  %6647 = vmatprep.subr.bf16.mxu1 %v7029_v39 }
 0xdd8   :  { %6669 = vmatprep.subr.bf16.mxu0 %v7030_v62 }
 0xdda   :  { %6648 = vmatpush3.bf16.msra.mxu1 %v7031_v9 }
 0xddb   :  { %6670 = vmatpush3.bf16.msra.mxu0 %v7032_v0  ;;  %6677 = vmatprep.subr.bf16.mxu1 %v7033_v26 }
 0xddc   :  { %6699 = vmatprep.subr.bf16.mxu0 %v7034_v36 }
 0xddd   :  { %5384 = vmatmul.mubr.bf16.vlgmr.msra.gmra.mrb[72].mxu1 %v4150_v28 }
 0xdde   :  { %5424 = vmatmul.mubr.bf16.vlgmr.msra.gmra.mrb[76].mxu0 %v4152_v53  ;;  %6678 = vmatpush3.bf16.msra.mxu1 %v7035_v12 }
 0xddf   :  { %5463 = vmatprep.mubr.bf16.mxu1 %v4155_v18  ;;  %6700 = vmatpush3.bf16.msra.mxu0 %v7036_v30 }
 0xde0   :  { %5503 = vmatprep.mubr.bf16.mxu0 %v4157_v57  ;;  %6679 = vmatprep.subr.bf16.mxu1 %v7037_v16 }
 0xde1   :  { %6701 = vmatprep.subr.bf16.mxu0 %v7038_v23 }
 0xde2   :  { %6680 = vmatpush3.bf16.msra.mxu1 %v7039_v25 }
 0xde3   :  { %6702 = vmatpush3.bf16.msra.mxu0 %v7040_v61  ;;  %6681 = vmatprep.subr.bf16.mxu1 %v7041_v24 }
 0xde4   :  { %6703 = vmatprep.subr.bf16.mxu0 %v7042_v44 }
 0xde6   :  { %6682 = vmatpush3.bf16.msra.mxu1 %v7043_v27 }
 0xde7   :  { %6704 = vmatpush3.bf16.msra.mxu0 %v7044_v21  ;;  %6683 = vmatprep.subr.bf16.mxu1 %v7045_v13 }
 0xde8   :  { %6705 = vmatprep.subr.bf16.mxu0 %v7046_v22 }
 0xdea   :  { %6684 = vmatpush3.bf16.msra.mxu1 %v7047_v29 }
 0xdeb   :  { %6706 = vmatpush3.bf16.msra.mxu0 %v7048_v33  ;;  %6685 = vmatprep.subr.bf16.mxu1 %v7049_v35 }
 0xdec   :  { %6707 = vmatprep.subr.bf16.mxu0 %v7050_v38 }
 0xdee   :  { %6686 = vmatpush3.bf16.msra.mxu1 %v7051_v32 }
 0xdef   :  { %6708 = vmatpush3.bf16.msra.mxu0 %v7052_v14  ;;  %6687 = vmatprep.subr.bf16.mxu1 %v7053_v40 }
 0xdf0   :  { %6709 = vmatprep.subr.bf16.mxu0 %v7054_v5 }
 0xdf2   :  { %6688 = vmatpush3.bf16.msra.mxu1 %v7055_v42 }
 0xdf3   :  { %6710 = vmatpush3.bf16.msra.mxu0 %v7056_v49  ;;  %6689 = vmatprep.subr.bf16.mxu1 %v7057_v52 }
 0xdf4   :  { %6711 = vmatprep.subr.bf16.mxu0 %v7058_v54 }
 0xdf6   :  { %6690 = vmatpush3.bf16.msra.mxu1 %v7059_v20 }
 0xdf7   :  { %6712 = vmatpush3.bf16.msra.mxu0 %v7060_v17  ;;  %6691 = vmatprep.subr.bf16.mxu1 %v7061_v2 }
 0xdf8   :  { %6713 = vmatprep.subr.bf16.mxu0 %v7062_v19 }
 0xdfa   :  { %6692 = vmatpush3.bf16.msra.mxu1 %v7063_v48 }
 0xdfb   :  { %6714 = vmatpush3.bf16.msra.mxu0 %v7064_v47  ;;  %6784 = vmatprep.subr.bf16.mxu1 %v7179_v1 }
 0xdfd   :  { %5464 = vmatmul.mubr.bf16.vlgmr.msra.gmra.mrb[76].mxu1 %v4154_v11 }
 0xdfe   :  { %5504 = vmatmul.mubr.bf16.vlgmr.msra.gmra.mrb[80].mxu0 %v4156_v6  ;;  %6788 = vmatprep.mubr.msk.bf16.mxu1 %vm7180_vm0, %v7179_v1 }
 0xe70   :  { %v6561_v46 = vpop.f32.mrb[64].mxu1  ;;  %v6583_v50 = vpop.f32.mrb[68].mxu0 }
 0xe71   :  { %v6562_v59 = vpop.f32.mrb[65].mxu1  ;;  %v6584_v7 = vpop.f32.mrb[69].mxu0 }
 0xe72   :  { %v6563_v58 = vadd.f32 %v6562_v59, %v6561_v46  ;;  %v6585_v55 = vadd.f32 %v6584_v7, %v6583_v50  ;;  %v6564_v3 = vpop.f32.mrb[66].mxu1  ;;  %v6586_v39 = vpop.f32.mrb[70].mxu0  ;;  %v7066_v59 = vld [vmem:[%s8873_s14 + $0x8] sm:$0xff]  }
 0xe73   :  { %v6565_v56 = vpop.f32.mrb[67].mxu1  ;;  %v6587_v62 = vpop.f32.mrb[71].mxu0  ;;  %v6338_v39 = vld [vmem:[%s8871_s12 + $0x1] ss:$0 sm:$0xff] }
 0xe74   :  { %v5226_v10 = vadd.f32 %v6563_v58, %v6207_v31 }
 0xe76   :  { %v5266_v8 = vadd.f32 %v6585_v55, %v5226_v10  ;;  %v6339_v10 = vld [vmem:[%s8872_s13 + $0x1] ss:$0 sm:$0xff]  ;;  %s7185_s13 = smov [#allocation2]  }
 0xe77   :  { %s5654_s27 = sshll.u32 %s7185_s13, 4  ;;  %s5655_s27 = int_to_ptr.vmem [resolvable:$true] %s5654_s27 }
 0xe78   :  { %s7155_s2 = scalar_lea.vmem %s5655_s27, 32  ;;  %p7160_p1 = scmp.lt.s32.totalorder %s5655_s27, %s5655_s27 }
 0xe79   :  { %p7156_p0 = scmp.ne.s32.totalorder %s5655_s27, %s7155_s2  ;;  %p7161_p2 = scmp.lt.s32.totalorder %s7155_s2, %s7155_s2 }
 0xe7b   :  { %p7162_p3 = por %p7161_p2, %p7160_p1 }
 0xe7d   :  { %p7163_p4 = pnand %p7162_p3, %p7156_p0 }
 0xe90   :  { %v6605_v9 = vpop.f32.mrb[68].mxu1  ;;  %v6627_v15 = vpop.f32.mrb[72].mxu0 }
 0xe91   :  { %v6606_v0 = vpop.f32.mrb[69].mxu1  ;;  %v6628_v26 = vpop.f32.mrb[73].mxu0 }
 0xe92   :  { %v6607_v60 = vadd.f32 %v6606_v0, %v6605_v9  ;;  %v6629_v36 = vadd.f32 %v6628_v26, %v6627_v15  ;;  %v6608_v45 = vpop.f32.mrb[70].mxu1  ;;  %v6630_v51 = vpop.f32.mrb[74].mxu0 }
 0xe93   :  { %v6609_v12 = vpop.f32.mrb[71].mxu1  ;;  %v6631_v28 = vpop.f32.mrb[75].mxu0 }
 0xe94   :  { %v5306_v30 = vadd.f32 %v6607_v60, %v5266_v8 }
 0xe96   :  { %v5346_v53 = vadd.f32 %v6629_v36, %v5306_v30  ;;  %v6340_v30 = vld [vmem:[%s8874_s15] ss:$0 sm:$0xff] }
 0xeb0   :  { %v6649_v16 = vpop.f32.mrb[72].mxu1 }
 0xeb1   :  { %v6671_v18 = vpop.f32.mrb[76].mxu0  ;;  %v6650_v23 = vpop.f32.mrb[73].mxu1 }
 0xeb2   :  { %v6651_v57 = vadd.f32 %v6650_v23, %v6649_v16  ;;  %v6672_v25 = vpop.f32.mrb[77].mxu0  ;;  %v6652_v61 = vpop.f32.mrb[74].mxu1 }
 0xeb3   :  { %v6673_v24 = vadd.f32 %v6672_v25, %v6671_v18  ;;  %v6674_v44 = vpop.f32.mrb[78].mxu0  ;;  %v6653_v27 = vpop.f32.mrb[75].mxu1 }
 0xeb4   :  { %v5386_v21 = vadd.f32 %v6651_v57, %v5346_v53  ;;  %v6675_v13 = vpop.f32.mrb[79].mxu0 }
 0xeb6   :  { %v5426_v22 = vadd.f32 %v6673_v24, %v5386_v21 }
 0xed0   :  { %v6693_v29 = vpop.f32.mrb[76].mxu1 }
 0xed1   :  { %v6715_v33 = vpop.f32.mrb[80].mxu0  ;;  %v6694_v35 = vpop.f32.mrb[77].mxu1 }
 0xed2   :  { %v6695_v38 = vadd.f32 %v6694_v35, %v6693_v29  ;;  %v6716_v32 = vpop.f32.mrb[81].mxu0  ;;  %v6696_v14 = vpop.f32.mrb[78].mxu1 }
 0xed3   :  { %v6717_v40 = vadd.f32 %v6716_v32, %v6715_v33  ;;  %v6718_v5 = vpop.f32.mrb[82].mxu0  ;;  %v6697_v42 = vpop.f32.mrb[79].mxu1 }
 0xed4   :  { %v5466_v43 = vadd.f32 %v6695_v38, %v5426_v22  ;;  %v6719_v49 = vpop.f32.mrb[83].mxu0 }
 0xed6   :  { %v5506_v52 = vadd.f32 %v6717_v40, %v5466_v43 }
 0xed8   :  { %v5512_v54 = vrot.slane %v5506_v52, 1  ;;  %v5515_v41 = vadd.f32 %v5506_v52, %v8274_v37  ;;  %v7065_v37 = vld [vmem:[%s8873_s14] sm:$0xff]  }
 0xed9   :  { %6785 = vmatpush3.bf16.msra.mxu1 %v7065_v37 }
 0xeda   :  { %v5516_v20 = vadd.f32 %v5512_v54, %v8276_v63  ;;  %6786 = vmatprep.subr.bf16.mxu1 %v7179_v1 }
 0xedc   :  { %v5523_v17 = vrot.slane %v5516_v20, 7 }
 0xedd   :  { %6787 = vmatpush3.bf16.msra.mxu1 %v7066_v59 }
 0xede   :  { %v5524_v2 = vsel %vm974_vm2, %v5523_v17, %v5515_v41 }
 0xedf   :  { %v5526_v19 = vsel %vm3462_vm9, %v5524_v2, 0.0 }
 0xee0   :  { %5527 = vadd.xlane.f32.xlu0 %v5526_v19 }
 0xf6d   :  { %v5528_v48 = vpop.xlane.xlu0 %5527 }
 0xf6e   :  { %v5529_v34 = vmul.f32 0.03125, %v5528_v48 }
 0xf70   :  { %v5531_v47 = vrot.slane %v5529_v34, 1  ;;  %v5534_v4 = vsub.f32 %v5515_v41, %v5529_v34 }
 0xf72   :  { %v5535_v11 = vsub.f32 %v5516_v20, %v5531_v47  ;;  %v5536_v46 = vmul.f32 %v5534_v4, %v5534_v4 }
 0xf74   :  { %v5537_v6 = vmul.f32 %v5535_v11, %v5535_v11 }
 0xf76   :  { %v5540_v50 = vrot.slane %v5537_v6, 7 }
 0xf78   :  { %v5541_v31 = vsel %vm974_vm2, %v5540_v50, %v5536_v46 }
 0xf79   :  { %v5543_v63 = vsel %vm3462_vm9, %v5541_v31, 0.0 }
 0xf7a   :  { %5544 = vadd.xlane.f32.xlu0 %v5543_v63 }
0x1007   :  { %v5545_v7 = vpop.xlane.xlu0 %5544 }
0x1008   :  { %v5546_v58 = vmul.f32 0.03125, %v5545_v7 }
0x100a   :  { %v5547_v55 = vadd.f32 1e-05, %v5546_v58 }
0x100c   :  { %7149 = vrsqrt.f32 %v5547_v55 }
0x1016   :  { %v7150_v3 = vpop.eup %7149 }
0x1017   :  { %v5550_v56 = vrot.slane %v7150_v3, 1  ;;  %v5553_v62 = vmul.f32 %v7150_v3, %v5534_v4 }
0x1019   :  { %v5554_v8 = vmul.f32 %v5550_v56, %v5535_v11  ;;  %v5561_v9 = vmul.f32 %v6338_v39, %v5553_v62 }
0x101b   :  { %v5562_v15 = vmul.f32 %v6338_v39, %v5554_v8  ;;  %v5569_v1 = vadd.f32 %v6339_v10, %v5561_v9 }
0x101d   :  { %v5570_v0 = vadd.f32 %v6339_v10, %v5562_v15  ;;  %v5571_v26 = vpack.c.bf16 %v5569_v1, %v5569_v1 }
0x101f   :  { %v5572_v60 = vpack.c.bf16 %v5570_v0, %v5570_v0  ;;  %v5586_v45 = vunpack.c.l.b16 %v5571_v26 }
0x1021   :  { %v5587_v36 = vunpack.c.l.b16 %v5572_v60 }
0x1023   :  { %v5588_v51 = vrot.slane %v5587_v36, 7 }
0x1025   :  { %v5589_v12 = vsel %vm974_vm2, %v5588_v51, %v5586_v45 }
0x1026   :  { %v5590_v28 = vpack.c.b16 %v5589_v12, %v5589_v12 }
0x1028   :  { %6789 = vmatmul.mubr.msk.bf16.vlgmr.msra.gmra.mrb[80].mxu1 %vm85_vm1, %v5590_v28 }
0x10fb   :  { %v5640_v53 = vpop.f32.mrb[80].mxu1 }
0x10fc   :  { %v5641_v16 = vadd.f32 %v6340_v30, %v5640_v53  ;;  %v6790_v18 = vpop.f32.mrb[81].mxu1 }
0x10fd   :  { %v5643_v23 = vpop.f32.mrb[82].mxu1 }
0x10fe   :  { %v6791_v57 = vpop.f32.mrb[83].mxu1  ;;  %5647 = vst.msk [vmem:[#allocation2] sm:$0x3] %vm5646_vm10, %v5641_v16 }
0x10ff   :  { %7166 = shalt.err (!%p7163_p4)
}
0x1100   :  { %s7167_s15 = scalar_lea.hbm %s8875_s16, 32 }
0x1101   :  { %p7168_p5 = scmp.ne.s32.totalorder %s8875_s16, %s7167_s15  ;;  %p7171_p6 = scmp.lt.u32.totalorder %s7167_s15, %s8875_s16 }
0x1103   :  { %p7173_p7 = pnand %p7171_p6, %p7168_p5 }
0x1105   :  { %7176 = shalt.err (!%p7173_p7)
}
0x1106   :  { %5657 = dma.vmem_to_hbm [thread:$0]  %s5655_s27, 32, %s8875_s16, [#allocation3]  }
0x1107   :  { %7177 = dma.done.wait [#allocation3], 32  }
0x1108   :  { %7178 = vsyncadd [#allocation3], 4294967264 }
0x1109   :  { %5661 = vsyncpa [#allocation3], 1 }

</bundles_post_ra>
